<compile_context>
chip_gen: v5e
topology: v5e:2x2
jax: 0.10.0
libtpu: 0.0.40
codegen_flags: <defaults>
</compile_context>

<pallas_src>
import functools

import jax
import jax.numpy as jnp
from jax.experimental import pallas as pl
from jax.experimental.pallas import tpu as pltpu

N_HIDDEN = 32
N_LATENT = 8
PRELU_ALPHA = 0.25      # PyTorch nn.PReLU default init
N_W_BLOCKS = 19         # number of (32,32) weight blocks in the packed slab
BIAS_ROWS = 16          # bias rows appended after the weight blocks


def _prelu(v):
    return jnp.where(v >= 0.0, v, PRELU_ALPHA * v)


def _omni_kernel(data_ref, w_ref, out_ref, gi0_ref, h1_ref, *, T, Bp):
    """data_ref: (2*T*Bp, 32) = [x_pad ; eps_pad], w_ref: packed weight slab.

    out_ref rows: [0,TB)=recon  [TB,2TB)=mu  [2TB,3TB)=logvar
                  [3TB,3TB+Bp)=h_last0  [3TB+Bp,3TB+2Bp)=h_last1
    """
    H = N_HIDDEN
    TB = T * Bp
    BIAS0 = N_W_BLOCKS * 32

    x = data_ref[0:TB, :]          # (TB, 32) lanes F..32 are zero
    eps = data_ref[TB:2 * TB, :]   # (TB, 32) lanes L..32 are zero

    def W(k):                      # (32, 32) weight block, 8-aligned row view
        return w_ref[32 * k:32 * (k + 1), :]

    def Bv(i):                     # (1, 32) bias row
        return w_ref[BIAS0 + i:BIAS0 + i + 1, :]

    def dot(a, b):
        return jnp.dot(a, b, preferred_element_type=jnp.float32)

    # ---- layer-0 gate input projections over ALL rows (biases folded) ------
    gi0_ref[0:TB, :] = dot(x, W(0)) + Bv(0)            # r: + (b_ir0 + b_hr0)
    gi0_ref[TB:2 * TB, :] = dot(x, W(1)) + Bv(1)       # z: + (b_iz0 + b_hz0)
    gi0_ref[2 * TB:3 * TB, :] = dot(x, W(2)) + Bv(2)   # n: + b_in0 only

    # ---- hoist loop-invariant weights / bias broadcasts ---------------------
    whr0, whz0, whn0 = W(3), W(4), W(5)
    wir1, wiz1, win1 = W(6), W(7), W(8)
    whr1, whz1, whn1 = W(9), W(10), W(11)

    b0_hn = jnp.broadcast_to(Bv(3), (Bp, H))
    b1_r = jnp.broadcast_to(Bv(4), (Bp, H))
    b1_z = jnp.broadcast_to(Bv(5), (Bp, H))
    b1_ni = jnp.broadcast_to(Bv(6), (Bp, H))
    b1_hn = jnp.broadcast_to(Bv(7), (Bp, H))

    def cell(gr, gz, gn, ghr, ghz, ghn, h):
        r = jax.nn.sigmoid(gr + ghr)
        z = jax.nn.sigmoid(gz + ghz)
        n = jnp.tanh(gn + r * ghn)
        return (1.0 - z) * n + z * h

    def step0(t, h):
        s = t * Bp
        gr = gi0_ref[s:s + Bp, :]
        gz = gi0_ref[TB + s:TB + s + Bp, :]
        gn = gi0_ref[2 * TB + s:2 * TB + s + Bp, :]
        return cell(gr, gz, gn,
                    dot(h, whr0), dot(h, whz0), dot(h, whn0) + b0_hn, h)

    def step1(h0_in, h):
        gr = dot(h0_in, wir1) + b1_r
        gz = dot(h0_in, wiz1) + b1_z
        gn = dot(h0_in, win1) + b1_ni
        return cell(gr, gz, gn,
                    dot(h, whr1), dot(h, whz1), dot(h, whn1) + b1_hn, h)

    h0 = jnp.zeros((Bp, H), jnp.float32)
    h1 = jnp.zeros((Bp, H), jnp.float32)

    # ---- software-pipelined recurrence: layer-0 step t || layer-1 step t-1 --
    h0 = step0(0, h0)
    h0_prev = h0
    for t in range(1, T):                    # T is small & static -> unrolled
        h0 = step0(t, h0)                    # independent of step1 below
        h1 = step1(h0_prev, h1)
        h1_ref[(t - 1) * Bp:t * Bp, :] = h1
        h0_prev = h0
    h1 = step1(h0_prev, h1)                  # epilogue: layer-1 step T-1
    h1_ref[(T - 1) * Bp:T * Bp, :] = h1

    # ---- VAE encoder / reparameterization / decoder over all T*Bp rows -----
    gru_out = h1_ref[...]                                    # (TB, 32)
    e = _prelu(dot(gru_out, W(12)) + Bv(8))
    e = _prelu(dot(e, W(13)) + Bv(9))
    mu = dot(e, W(14)) + Bv(10)              # lanes L..32 are exactly zero
    lv = dot(e, W(15)) + Bv(11)              # lanes L..32 are exactly zero
    zlat = mu + eps * jnp.exp(0.5 * lv)      # padded lanes: 0 + 0*1 = 0
    d = _prelu(dot(zlat, W(16)) + Bv(12))    # W(16) rows L..32 are zero
    d = _prelu(dot(d, W(17)) + Bv(13))
    rec = jax.nn.sigmoid(dot(d, W(18)) + Bv(14))

    out_ref[0:TB, :] = rec
    out_ref[TB:2 * TB, :] = mu
    out_ref[2 * TB:3 * TB, :] = lv
    out_ref[3 * TB:3 * TB + Bp, :] = h0
    out_ref[3 * TB + Bp:3 * TB + 2 * Bp, :] = h1


def _pad_block(a, rows=32, cols=32):
    out = jnp.zeros((rows, cols), jnp.float32)
    return out.at[:a.shape[0], :a.shape[1]].set(a)


def _pad_row(v, cols=32):
    out = jnp.zeros((cols,), jnp.float32)
    return out.at[:v.shape[0]].set(v)


def _pack_weight_slab(params):
    """Pack all weights/biases into one (N_W_BLOCKS*32 + 16, 32) slab."""
    H, L = N_HIDDEN, N_LATENT
    (w_ih0, w_hh0, b_ih0, b_hh0, w_ih1, w_hh1, b_ih1, b_hh1,
     we0, be0, we1, be1, we2, be2,
     wd0, bd0, wd1, bd1, wd2, bd2) = params

    def gates_t(w):   # (3H, in) PyTorch layout -> three (in, H) matrices
        return w[0:H].T, w[H:2 * H].T, w[2 * H:3 * H].T

    wir0, wiz0, win0 = gates_t(w_ih0)     # (F, H)
    whr0, whz0, whn0 = gates_t(w_hh0)     # (H, H)
    wir1, wiz1, win1 = gates_t(w_ih1)     # (H, H)
    whr1, whz1, whn1 = gates_t(w_hh1)     # (H, H)

    we2_mu = we2[0:L].T                   # (H, L)
    we2_lv = we2[L:2 * L].T               # (H, L)

    wblocks = [
        _pad_block(wir0), _pad_block(wiz0), _pad_block(win0),   # 0..2
        whr0, whz0, whn0,                                       # 3..5
        wir1, wiz1, win1,                                       # 6..8
        whr1, whz1, whn1,                                       # 9..11
        we0.T, we1.T,                                           # 12..13
        _pad_block(we2_mu), _pad_block(we2_lv),                 # 14..15
        _pad_block(wd0.T),                                      # 16 (L rows)
        wd1.T,                                                  # 17
        _pad_block(wd2.T),                                      # 18 (F cols)
    ]
    assert len(wblocks) == N_W_BLOCKS

    bi0, bh0 = b_ih0.reshape(-1), b_hh0.reshape(-1)
    bi1, bh1 = b_ih1.reshape(-1), b_hh1.reshape(-1)
    be2f, bd2f = be2.reshape(-1), bd2.reshape(-1)
    brows = [
        bi0[0:H] + bh0[0:H], bi0[H:2 * H] + bh0[H:2 * H],       # 0,1
        bi0[2 * H:3 * H], bh0[2 * H:3 * H],                     # 2,3
        bi1[0:H] + bh1[0:H], bi1[H:2 * H] + bh1[H:2 * H],       # 4,5
        bi1[2 * H:3 * H], bh1[2 * H:3 * H],                     # 6,7
        be0.reshape(-1), be1.reshape(-1),                       # 8,9
        _pad_row(be2f[0:L]), _pad_row(be2f[L:2 * L]),           # 10,11
        bd0.reshape(-1), bd1.reshape(-1),                       # 12,13
        _pad_row(bd2f),                                         # 14
        jnp.zeros((32,), jnp.float32),                          # 15 (pad)
    ]
    bias_slab = jnp.stack(brows, axis=0)                        # (16, 32)
    return jnp.concatenate(wblocks + [bias_slab], axis=0)


def omni_anomaly_forward(x, eps, params):
    """x: (B, T, F), eps: (B, T, L). Returns flattened recon/mu/logvar + hidden."""
    B, T, F = x.shape
    L, H = N_LATENT, N_HIDDEN
    assert F <= 32 and L <= 32
    Bp = ((B + 7) // 8) * 8          # sublane-aligned batch
    TB = T * Bp

    # time-major, batch-/lane-padded data slab: rows [0,TB)=x, [TB,2TB)=eps
    x_tm = jnp.transpose(x, (1, 0, 2))
    eps_tm = jnp.transpose(eps, (1, 0, 2))
    x_pad = jnp.zeros((T, Bp, 32), jnp.float32).at[:, :B, :F].set(x_tm)
    eps_pad = jnp.zeros((T, Bp, 32), jnp.float32).at[:, :B, :L].set(eps_tm)
    data_slab = jnp.concatenate(
        [x_pad.reshape(TB, 32), eps_pad.reshape(TB, 32)], axis=0)

    w_slab = _pack_weight_slab(params)

    out_rows = 3 * TB + 2 * Bp
    kernel = functools.partial(_omni_kernel, T=T, Bp=Bp)
    out = pl.pallas_call(
        kernel,
        out_shape=jax.ShapeDtypeStruct((out_rows, 32), jnp.float32),
        in_specs=[pl.BlockSpec(memory_space=pltpu.MemorySpace.VMEM)] * 2,
        out_specs=pl.BlockSpec(memory_space=pltpu.MemorySpace.VMEM),
        scratch_shapes=[
            pltpu.VMEM((3 * TB, 32), jnp.float32),   # layer-0 gate inputs
            pltpu.VMEM((TB, 32), jnp.float32),       # layer-1 hidden over time
        ],
    )(data_slab, w_slab)
    # TODO(synk): on v7x a ("parallel",) batch grid over the 2 TensorCores
    # would add throughput; kept grid=() since the chain is latency-bound.

    rec = out[0:TB].reshape(T, Bp, 32)[:, :B, :F]
    mu = out[TB:2 * TB].reshape(T, Bp, 32)[:, :B, :L]
    lv = out[2 * TB:3 * TB].reshape(T, Bp, 32)[:, :B, :L]
    h_last0 = out[3 * TB:3 * TB + B, :H]
    h_last1 = out[3 * TB + Bp:3 * TB + Bp + B, :H]

    recon = jnp.transpose(rec, (1, 0, 2)).reshape(-1)
    mu_f = jnp.transpose(mu, (1, 0, 2)).reshape(-1)
    lv_f = jnp.transpose(lv, (1, 0, 2)).reshape(-1)
    hidden = jnp.stack([h_last0, h_last1], axis=0)
    return recon, mu_f, lv_f, hidden


def init_params(key, feats):
    """PyTorch-style uniform(-1/sqrt(fan),1/sqrt(fan)) init, (out,in) layout."""
    H, L = N_HIDDEN, N_LATENT
    keys = jax.random.split(key, 20)

    def u(k, shape, fan):
        b = 1.0 / float(fan) ** 0.5
        return jax.random.uniform(k, shape, jnp.float32, -b, b)

    return (
        # GRU layer 0
        u(keys[0], (3 * H, feats), H), u(keys[1], (3 * H, H), H),
        u(keys[2], (1, 3 * H), H), u(keys[3], (1, 3 * H), H),
        # GRU layer 1
        u(keys[4], (3 * H, H), H), u(keys[5], (3 * H, H), H),
        u(keys[6], (1, 3 * H), H), u(keys[7], (1, 3 * H), H),
        # encoder
        u(keys[8], (H, H), H), u(keys[9], (1, H), H),
        u(keys[10], (H, H), H), u(keys[11], (1, H), H),
        u(keys[12], (2 * L, H), H), u(keys[13], (1, 2 * L), H),
        # decoder
        u(keys[14], (H, L), L), u(keys[15], (1, H), L),
        u(keys[16], (H, H), H), u(keys[17], (1, H), H),
        u(keys[18], (feats, H), H), u(keys[19], (1, feats), H),
    )


def reference_forward(x, eps, params):
    """Plain-JAX reference mirroring the PyTorch forward."""
    (w_ih0, w_hh0, b_ih0, b_hh0, w_ih1, w_hh1, b_ih1, b_hh1,
     we0, be0, we1, be1, we2, be2,
     wd0, bd0, wd1, bd1, wd2, bd2) = params
    H, L = N_HIDDEN, N_LATENT
    B, T, _ = x.shape

    def cell(xt, h, w_ih, w_hh, b_ih, b_hh):
        gi = xt @ w_ih.T + b_ih
        gh = h @ w_hh.T + b_hh
        r = jax.nn.sigmoid(gi[:, :H] + gh[:, :H])
        z = jax.nn.sigmoid(gi[:, H:2 * H] + gh[:, H:2 * H])
        n = jnp.tanh(gi[:, 2 * H:] + r * gh[:, 2 * H:])
        return (1 - z) * n + z * h

    h0 = jnp.zeros((B, H), jnp.float32)
    h1 = jnp.zeros((B, H), jnp.float32)
    recs, mus, lvs = [], [], []
    for t in range(T):
        h0 = cell(x[:, t, :], h0, w_ih0, w_hh0, b_ih0, b_hh0)
        h1 = cell(h0, h1, w_ih1, w_hh1, b_ih1, b_hh1)
        e = _prelu(h1 @ we0.T + be0)
        e = _prelu(e @ we1.T + be1)
        mulv = e @ we2.T + be2
        mu, lv = mulv[:, :L], mulv[:, L:]
        z = mu + eps[:, t, :] * jnp.exp(0.5 * lv)
        d = _prelu(z @ wd0.T + bd0)
        d = _prelu(d @ wd1.T + bd1)
        recs.append(jax.nn.sigmoid(d @ wd2.T + bd2))
        mus.append(mu)
        lvs.append(lv)
    recon = jnp.stack(recs, axis=1)
    mu = jnp.stack(mus, axis=1)
    lv = jnp.stack(lvs, axis=1)
    hidden = jnp.stack([h0, h1], axis=0)
    return recon.reshape(-1), mu.reshape(-1), lv.reshape(-1), hidden


if __name__ == "__main__":
    B, T, F = 2, 8, 4
    key = jax.random.PRNGKey(0)
    kx, keps, kp = jax.random.split(key, 3)
    x = jax.random.uniform(kx, (B, T, F), jnp.float32)
    eps = jax.random.normal(keps, (B, T, N_LATENT), jnp.float32)
    params = init_params(kp, F)

    fwd = jax.jit(omni_anomaly_forward)
    recon, mu, logvar, hidden = fwd(x, eps, params)
    jax.block_until_ready((recon, mu, logvar, hidden))

    r_ref, m_ref, lv_ref, h_ref = reference_forward(x, eps, params)
    assert recon.shape == (B * T * F,) and mu.shape == (B * T * N_LATENT,)
    assert logvar.shape == (B * T * N_LATENT,) and hidden.shape == (2, B, N_HIDDEN)
    assert jnp.allclose(recon, r_ref, atol=2e-4), "recon mismatch"
    assert jnp.allclose(mu, m_ref, atol=2e-4), "mu mismatch"
    assert jnp.allclose(logvar, lv_ref, atol=2e-4), "logvar mismatch"
    assert jnp.allclose(hidden, h_ref, atol=2e-4), "hidden mismatch"

    print("KERNEL_OK")
</pallas_src>

<mosaic_0001>
module attributes {stable_mosaic.version = 11 : i64} {
  func.func @_omni_kernel(%arg0: memref<128x32xf32, #tpu.memory_space<vmem>>, %arg1: memref<624x32xf32, #tpu.memory_space<vmem>>, %arg2: memref<208x32xf32, #tpu.memory_space<vmem>>, %arg3: memref<192x32xf32, #tpu.memory_space<vmem>>, %arg4: memref<64x32xf32, #tpu.memory_space<vmem>>) attributes {dimension_semantics = [], scalar_prefetch = 0 : i64, scratch_operands = 2 : i64, tpu.core_type = #tpu.core_type<tc>} {
    %c0 = arith.constant 0 : index
    %c0_0 = arith.constant 0 : index
    %0 = vector.load %arg0[%c0, %c0_0] : memref<128x32xf32, #tpu.memory_space<vmem>>, vector<64x32xf32>
    %c64 = arith.constant 64 : index
    %c0_1 = arith.constant 0 : index
    %1 = vector.load %arg0[%c64, %c0_1] : memref<128x32xf32, #tpu.memory_space<vmem>>, vector<64x32xf32>
    %c0_2 = arith.constant 0 : index
    %c0_3 = arith.constant 0 : index
    %2 = vector.load %arg1[%c0_2, %c0_3] : memref<624x32xf32, #tpu.memory_space<vmem>>, vector<32x32xf32>
    %cst = arith.constant dense<0.000000e+00> : vector<64x32xf32>
    %3 = tpu.matmul %0, %2, %cst {dimension_numbers = #tpu.dot_dimension_numbers<[1], [0], [0], [1], [0, 0, 1, 1], [], []>} : vector<64x32xf32>, vector<32x32xf32>, vector<64x32xf32> -> vector<64x32xf32>
    %c608 = arith.constant 608 : index
    %c0_4 = arith.constant 0 : index
    %4 = vector.load %arg1[%c608, %c0_4] : memref<624x32xf32, #tpu.memory_space<vmem>>, vector<1x32xf32>
    %5 = vector.broadcast %4 : vector<1x32xf32> to vector<64x32xf32>
    %6 = arith.addf %3, %5 : vector<64x32xf32>
    %c0_5 = arith.constant 0 : index
    %c0_6 = arith.constant 0 : index
    %7 = vector.load %arg3[%c0_5, %c0_6] : memref<192x32xf32, #tpu.memory_space<vmem>>, vector<64x32xf32>
    tpu.vector_store %arg3[%c0_5, %c0_6], %6 {strides = array<i32>} : memref<192x32xf32, #tpu.memory_space<vmem>>, vector<64x32xf32>,
    %c32 = arith.constant 32 : index
    %c0_7 = arith.constant 0 : index
    %8 = vector.load %arg1[%c32, %c0_7] : memref<624x32xf32, #tpu.memory_space<vmem>>, vector<32x32xf32>
    %cst_8 = arith.constant dense<0.000000e+00> : vector<64x32xf32>
    %9 = tpu.matmul %0, %8, %cst_8 {dimension_numbers = #tpu.dot_dimension_numbers<[1], [0], [0], [1], [0, 0, 1, 1], [], []>} : vector<64x32xf32>, vector<32x32xf32>, vector<64x32xf32> -> vector<64x32xf32>
    %c609 = arith.constant 609 : index
    %c0_9 = arith.constant 0 : index
    %10 = vector.load %arg1[%c609, %c0_9] : memref<624x32xf32, #tpu.memory_space<vmem>>, vector<1x32xf32>
    %11 = vector.broadcast %10 : vector<1x32xf32> to vector<64x32xf32>
    %12 = arith.addf %9, %11 : vector<64x32xf32>
    %c64_10 = arith.constant 64 : index
    %c0_11 = arith.constant 0 : index
    %13 = vector.load %arg3[%c64_10, %c0_11] : memref<192x32xf32, #tpu.memory_space<vmem>>, vector<64x32xf32>
    tpu.vector_store %arg3[%c64_10, %c0_11], %12 {strides = array<i32>} : memref<192x32xf32, #tpu.memory_space<vmem>>, vector<64x32xf32>,
    %c64_12 = arith.constant 64 : index
    %c0_13 = arith.constant 0 : index
    %14 = vector.load %arg1[%c64_12, %c0_13] : memref<624x32xf32, #tpu.memory_space<vmem>>, vector<32x32xf32>
    %cst_14 = arith.constant dense<0.000000e+00> : vector<64x32xf32>
    %15 = tpu.matmul %0, %14, %cst_14 {dimension_numbers = #tpu.dot_dimension_numbers<[1], [0], [0], [1], [0, 0, 1, 1], [], []>} : vector<64x32xf32>, vector<32x32xf32>, vector<64x32xf32> -> vector<64x32xf32>
    %c610 = arith.constant 610 : index
    %c0_15 = arith.constant 0 : index
    %16 = vector.load %arg1[%c610, %c0_15] : memref<624x32xf32, #tpu.memory_space<vmem>>, vector<1x32xf32>
    %17 = vector.broadcast %16 : vector<1x32xf32> to vector<64x32xf32>
    %18 = arith.addf %15, %17 : vector<64x32xf32>
    %c128 = arith.constant 128 : index
    %c0_16 = arith.constant 0 : index
    %19 = vector.load %arg3[%c128, %c0_16] : memref<192x32xf32, #tpu.memory_space<vmem>>, vector<64x32xf32>
    tpu.vector_store %arg3[%c128, %c0_16], %18 {strides = array<i32>} : memref<192x32xf32, #tpu.memory_space<vmem>>, vector<64x32xf32>,
    %c96 = arith.constant 96 : index
    %c0_17 = arith.constant 0 : index
    %20 = vector.load %arg1[%c96, %c0_17] : memref<624x32xf32, #tpu.memory_space<vmem>>, vector<32x32xf32>
    %c128_18 = arith.constant 128 : index
    %c0_19 = arith.constant 0 : index
    %21 = vector.load %arg1[%c128_18, %c0_19] : memref<624x32xf32, #tpu.memory_space<vmem>>, vector<32x32xf32>
    %c160 = arith.constant 160 : index
    %c0_20 = arith.constant 0 : index
    %22 = vector.load %arg1[%c160, %c0_20] : memref<624x32xf32, #tpu.memory_space<vmem>>, vector<32x32xf32>
    %c192 = arith.constant 192 : index
    %c0_21 = arith.constant 0 : index
    %23 = vector.load %arg1[%c192, %c0_21] : memref<624x32xf32, #tpu.memory_space<vmem>>, vector<32x32xf32>
    %c224 = arith.constant 224 : index
    %c0_22 = arith.constant 0 : index
    %24 = vector.load %arg1[%c224, %c0_22] : memref<624x32xf32, #tpu.memory_space<vmem>>, vector<32x32xf32>
    %c256 = arith.constant 256 : index
    %c0_23 = arith.constant 0 : index
    %25 = vector.load %arg1[%c256, %c0_23] : memref<624x32xf32, #tpu.memory_space<vmem>>, vector<32x32xf32>
    %c288 = arith.constant 288 : index
    %c0_24 = arith.constant 0 : index
    %26 = vector.load %arg1[%c288, %c0_24] : memref<624x32xf32, #tpu.memory_space<vmem>>, vector<32x32xf32>
    %c320 = arith.constant 320 : index
    %c0_25 = arith.constant 0 : index
    %27 = vector.load %arg1[%c320, %c0_25] : memref<624x32xf32, #tpu.memory_space<vmem>>, vector<32x32xf32>
    %c352 = arith.constant 352 : index
    %c0_26 = arith.constant 0 : index
    %28 = vector.load %arg1[%c352, %c0_26] : memref<624x32xf32, #tpu.memory_space<vmem>>, vector<32x32xf32>
    %c611 = arith.constant 611 : index
    %c0_27 = arith.constant 0 : index
    %29 = vector.load %arg1[%c611, %c0_27] : memref<624x32xf32, #tpu.memory_space<vmem>>, vector<1x32xf32>
    %30 = vector.shape_cast %29 : vector<1x32xf32> to vector<1x32xf32>
    %31 = vector.broadcast %30 : vector<1x32xf32> to vector<8x32xf32>
    %c612 = arith.constant 612 : index
    %c0_28 = arith.constant 0 : index
    %32 = vector.load %arg1[%c612, %c0_28] : memref<624x32xf32, #tpu.memory_space<vmem>>, vector<1x32xf32>
    %33 = vector.shape_cast %32 : vector<1x32xf32> to vector<1x32xf32>
    %34 = vector.broadcast %33 : vector<1x32xf32> to vector<8x32xf32>
    %c613 = arith.constant 613 : index
    %c0_29 = arith.constant 0 : index
    %35 = vector.load %arg1[%c613, %c0_29] : memref<624x32xf32, #tpu.memory_space<vmem>>, vector<1x32xf32>
    %36 = vector.shape_cast %35 : vector<1x32xf32> to vector<1x32xf32>
    %37 = vector.broadcast %36 : vector<1x32xf32> to vector<8x32xf32>
    %c614 = arith.constant 614 : index
    %c0_30 = arith.constant 0 : index
    %38 = vector.load %arg1[%c614, %c0_30] : memref<624x32xf32, #tpu.memory_space<vmem>>, vector<1x32xf32>
    %39 = vector.shape_cast %38 : vector<1x32xf32> to vector<1x32xf32>
    %40 = vector.broadcast %39 : vector<1x32xf32> to vector<8x32xf32>
    %c615 = arith.constant 615 : index
    %c0_31 = arith.constant 0 : index
    %41 = vector.load %arg1[%c615, %c0_31] : memref<624x32xf32, #tpu.memory_space<vmem>>, vector<1x32xf32>
    %42 = vector.shape_cast %41 : vector<1x32xf32> to vector<1x32xf32>
    %43 = vector.broadcast %42 : vector<1x32xf32> to vector<8x32xf32>
    %cst_32 = arith.constant 0.000000e+00 : f32
    %44 = vector.broadcast %cst_32 : f32 to vector<8x32xf32>
    %cst_33 = arith.constant 0.000000e+00 : f32
    %45 = vector.broadcast %cst_33 : f32 to vector<8x32xf32>
    %c0_34 = arith.constant 0 : index
    %c0_35 = arith.constant 0 : index
    %46 = vector.load %arg3[%c0_34, %c0_35] : memref<192x32xf32, #tpu.memory_space<vmem>>, vector<8x32xf32>
    %c64_36 = arith.constant 64 : index
    %c0_37 = arith.constant 0 : index
    %47 = vector.load %arg3[%c64_36, %c0_37] : memref<192x32xf32, #tpu.memory_space<vmem>>, vector<8x32xf32>
    %c128_38 = arith.constant 128 : index
    %c0_39 = arith.constant 0 : index
    %48 = vector.load %arg3[%c128_38, %c0_39] : memref<192x32xf32, #tpu.memory_space<vmem>>, vector<8x32xf32>
    %cst_40 = arith.constant dense<0.000000e+00> : vector<8x32xf32>
    %49 = tpu.matmul %44, %20, %cst_40 {dimension_numbers = #tpu.dot_dimension_numbers<[1], [0], [0], [1], [0, 0, 1, 1], [], []>} : vector<8x32xf32>, vector<32x32xf32>, vector<8x32xf32> -> vector<8x32xf32>
    %cst_41 = arith.constant dense<0.000000e+00> : vector<8x32xf32>
    %50 = tpu.matmul %44, %21, %cst_41 {dimension_numbers = #tpu.dot_dimension_numbers<[1], [0], [0], [1], [0, 0, 1, 1], [], []>} : vector<8x32xf32>, vector<32x32xf32>, vector<8x32xf32> -> vector<8x32xf32>
    %cst_42 = arith.constant dense<0.000000e+00> : vector<8x32xf32>
    %51 = tpu.matmul %44, %22, %cst_42 {dimension_numbers = #tpu.dot_dimension_numbers<[1], [0], [0], [1], [0, 0, 1, 1], [], []>} : vector<8x32xf32>, vector<32x32xf32>, vector<8x32xf32> -> vector<8x32xf32>
    %52 = arith.addf %51, %31 : vector<8x32xf32>
    %53 = arith.addf %46, %49 : vector<8x32xf32>
    %54 = arith.negf %53 : vector<8x32xf32>
    %55 = math.exp %54 : vector<8x32xf32>
    %cst_43 = arith.constant 1.000000e+00 : f32
    %56 = vector.broadcast %cst_43 : f32 to vector<8x32xf32>
    %57 = arith.addf %56, %55 : vector<8x32xf32>
    %58 = arith.divf %56, %57 : vector<8x32xf32>
    %59 = arith.addf %47, %50 : vector<8x32xf32>
    %60 = arith.negf %59 : vector<8x32xf32>
    %61 = math.exp %60 : vector<8x32xf32>
    %cst_44 = arith.constant 1.000000e+00 : f32
    %62 = vector.broadcast %cst_44 : f32 to vector<8x32xf32>
    %63 = arith.addf %62, %61 : vector<8x32xf32>
    %64 = arith.divf %62, %63 : vector<8x32xf32>
    %65 = arith.mulf %58, %52 : vector<8x32xf32>
    %66 = arith.addf %48, %65 : vector<8x32xf32>
    %67 = math.tanh %66 : vector<8x32xf32>
    %cst_45 = arith.constant 1.000000e+00 : f32
    %68 = vector.broadcast %cst_45 : f32 to vector<8x32xf32>
    %69 = arith.subf %68, %64 : vector<8x32xf32>
    %70 = arith.mulf %69, %67 : vector<8x32xf32>
    %71 = arith.mulf %64, %44 : vector<8x32xf32>
    %72 = arith.addf %70, %71 : vector<8x32xf32>
    %c8 = arith.constant 8 : index
    %c0_46 = arith.constant 0 : index
    %73 = vector.load %arg3[%c8, %c0_46] : memref<192x32xf32, #tpu.memory_space<vmem>>, vector<8x32xf32>
    %c72 = arith.constant 72 : index
    %c0_47 = arith.constant 0 : index
    %74 = vector.load %arg3[%c72, %c0_47] : memref<192x32xf32, #tpu.memory_space<vmem>>, vector<8x32xf32>
    %c136 = arith.constant 136 : index
    %c0_48 = arith.constant 0 : index
    %75 = vector.load %arg3[%c136, %c0_48] : memref<192x32xf32, #tpu.memory_space<vmem>>, vector<8x32xf32>
    %cst_49 = arith.constant dense<0.000000e+00> : vector<8x32xf32>
    %76 = tpu.matmul %72, %20, %cst_49 {dimension_numbers = #tpu.dot_dimension_numbers<[1], [0], [0], [1], [0, 0, 1, 1], [], []>} : vector<8x32xf32>, vector<32x32xf32>, vector<8x32xf32> -> vector<8x32xf32>
    %cst_50 = arith.constant dense<0.000000e+00> : vector<8x32xf32>
    %77 = tpu.matmul %72, %21, %cst_50 {dimension_numbers = #tpu.dot_dimension_numbers<[1], [0], [0], [1], [0, 0, 1, 1], [], []>} : vector<8x32xf32>, vector<32x32xf32>, vector<8x32xf32> -> vector<8x32xf32>
    %cst_51 = arith.constant dense<0.000000e+00> : vector<8x32xf32>
    %78 = tpu.matmul %72, %22, %cst_51 {dimension_numbers = #tpu.dot_dimension_numbers<[1], [0], [0], [1], [0, 0, 1, 1], [], []>} : vector<8x32xf32>, vector<32x32xf32>, vector<8x32xf32> -> vector<8x32xf32>
    %79 = arith.addf %78, %31 : vector<8x32xf32>
    %80 = arith.addf %73, %76 : vector<8x32xf32>
    %81 = arith.negf %80 : vector<8x32xf32>
    %82 = math.exp %81 : vector<8x32xf32>
    %cst_52 = arith.constant 1.000000e+00 : f32
    %83 = vector.broadcast %cst_52 : f32 to vector<8x32xf32>
    %84 = arith.addf %83, %82 : vector<8x32xf32>
    %85 = arith.divf %83, %84 : vector<8x32xf32>
    %86 = arith.addf %74, %77 : vector<8x32xf32>
    %87 = arith.negf %86 : vector<8x32xf32>
    %88 = math.exp %87 : vector<8x32xf32>
    %cst_53 = arith.constant 1.000000e+00 : f32
    %89 = vector.broadcast %cst_53 : f32 to vector<8x32xf32>
    %90 = arith.addf %89, %88 : vector<8x32xf32>
    %91 = arith.divf %89, %90 : vector<8x32xf32>
    %92 = arith.mulf %85, %79 : vector<8x32xf32>
    %93 = arith.addf %75, %92 : vector<8x32xf32>
    %94 = math.tanh %93 : vector<8x32xf32>
    %cst_54 = arith.constant 1.000000e+00 : f32
    %95 = vector.broadcast %cst_54 : f32 to vector<8x32xf32>
    %96 = arith.subf %95, %91 : vector<8x32xf32>
    %97 = arith.mulf %96, %94 : vector<8x32xf32>
    %98 = arith.mulf %91, %72 : vector<8x32xf32>
    %99 = arith.addf %97, %98 : vector<8x32xf32>
    %cst_55 = arith.constant dense<0.000000e+00> : vector<8x32xf32>
    %100 = tpu.matmul %72, %23, %cst_55 {dimension_numbers = #tpu.dot_dimension_numbers<[1], [0], [0], [1], [0, 0, 1, 1], [], []>} : vector<8x32xf32>, vector<32x32xf32>, vector<8x32xf32> -> vector<8x32xf32>
    %101 = arith.addf %100, %34 : vector<8x32xf32>
    %cst_56 = arith.constant dense<0.000000e+00> : vector<8x32xf32>
    %102 = tpu.matmul %72, %24, %cst_56 {dimension_numbers = #tpu.dot_dimension_numbers<[1], [0], [0], [1], [0, 0, 1, 1], [], []>} : vector<8x32xf32>, vector<32x32xf32>, vector<8x32xf32> -> vector<8x32xf32>
    %103 = arith.addf %102, %37 : vector<8x32xf32>
    %cst_57 = arith.constant dense<0.000000e+00> : vector<8x32xf32>
    %104 = tpu.matmul %72, %25, %cst_57 {dimension_numbers = #tpu.dot_dimension_numbers<[1], [0], [0], [1], [0, 0, 1, 1], [], []>} : vector<8x32xf32>, vector<32x32xf32>, vector<8x32xf32> -> vector<8x32xf32>
    %105 = arith.addf %104, %40 : vector<8x32xf32>
    %cst_58 = arith.constant dense<0.000000e+00> : vector<8x32xf32>
    %106 = tpu.matmul %45, %26, %cst_58 {dimension_numbers = #tpu.dot_dimension_numbers<[1], [0], [0], [1], [0, 0, 1, 1], [], []>} : vector<8x32xf32>, vector<32x32xf32>, vector<8x32xf32> -> vector<8x32xf32>
    %cst_59 = arith.constant dense<0.000000e+00> : vector<8x32xf32>
    %107 = tpu.matmul %45, %27, %cst_59 {dimension_numbers = #tpu.dot_dimension_numbers<[1], [0], [0], [1], [0, 0, 1, 1], [], []>} : vector<8x32xf32>, vector<32x32xf32>, vector<8x32xf32> -> vector<8x32xf32>
    %cst_60 = arith.constant dense<0.000000e+00> : vector<8x32xf32>
    %108 = tpu.matmul %45, %28, %cst_60 {dimension_numbers = #tpu.dot_dimension_numbers<[1], [0], [0], [1], [0, 0, 1, 1], [], []>} : vector<8x32xf32>, vector<32x32xf32>, vector<8x32xf32> -> vector<8x32xf32>
    %109 = arith.addf %108, %43 : vector<8x32xf32>
    %110 = arith.addf %101, %106 : vector<8x32xf32>
    %111 = arith.negf %110 : vector<8x32xf32>
    %112 = math.exp %111 : vector<8x32xf32>
    %cst_61 = arith.constant 1.000000e+00 : f32
    %113 = vector.broadcast %cst_61 : f32 to vector<8x32xf32>
    %114 = arith.addf %113, %112 : vector<8x32xf32>
    %115 = arith.divf %113, %114 : vector<8x32xf32>
    %116 = arith.addf %103, %107 : vector<8x32xf32>
    %117 = arith.negf %116 : vector<8x32xf32>
    %118 = math.exp %117 : vector<8x32xf32>
    %cst_62 = arith.constant 1.000000e+00 : f32
    %119 = vector.broadcast %cst_62 : f32 to vector<8x32xf32>
    %120 = arith.addf %119, %118 : vector<8x32xf32>
    %121 = arith.divf %119, %120 : vector<8x32xf32>
    %122 = arith.mulf %115, %109 : vector<8x32xf32>
    %123 = arith.addf %105, %122 : vector<8x32xf32>
    %124 = math.tanh %123 : vector<8x32xf32>
    %cst_63 = arith.constant 1.000000e+00 : f32
    %125 = vector.broadcast %cst_63 : f32 to vector<8x32xf32>
    %126 = arith.subf %125, %121 : vector<8x32xf32>
    %127 = arith.mulf %126, %124 : vector<8x32xf32>
    %128 = arith.mulf %121, %45 : vector<8x32xf32>
    %129 = arith.addf %127, %128 : vector<8x32xf32>
    %c0_64 = arith.constant 0 : index
    %c0_65 = arith.constant 0 : index
    %130 = vector.load %arg4[%c0_64, %c0_65] : memref<64x32xf32, #tpu.memory_space<vmem>>, vector<8x32xf32>
    tpu.vector_store %arg4[%c0_64, %c0_65], %129 {strides = array<i32>} : memref<64x32xf32, #tpu.memory_space<vmem>>, vector<8x32xf32>,
    %c16 = arith.constant 16 : index
    %c0_66 = arith.constant 0 : index
    %131 = vector.load %arg3[%c16, %c0_66] : memref<192x32xf32, #tpu.memory_space<vmem>>, vector<8x32xf32>
    %c80 = arith.constant 80 : index
    %c0_67 = arith.constant 0 : index
    %132 = vector.load %arg3[%c80, %c0_67] : memref<192x32xf32, #tpu.memory_space<vmem>>, vector<8x32xf32>
    %c144 = arith.constant 144 : index
    %c0_68 = arith.constant 0 : index
    %133 = vector.load %arg3[%c144, %c0_68] : memref<192x32xf32, #tpu.memory_space<vmem>>, vector<8x32xf32>
    %cst_69 = arith.constant dense<0.000000e+00> : vector<8x32xf32>
    %134 = tpu.matmul %99, %20, %cst_69 {dimension_numbers = #tpu.dot_dimension_numbers<[1], [0], [0], [1], [0, 0, 1, 1], [], []>} : vector<8x32xf32>, vector<32x32xf32>, vector<8x32xf32> -> vector<8x32xf32>
    %cst_70 = arith.constant dense<0.000000e+00> : vector<8x32xf32>
    %135 = tpu.matmul %99, %21, %cst_70 {dimension_numbers = #tpu.dot_dimension_numbers<[1], [0], [0], [1], [0, 0, 1, 1], [], []>} : vector<8x32xf32>, vector<32x32xf32>, vector<8x32xf32> -> vector<8x32xf32>
    %cst_71 = arith.constant dense<0.000000e+00> : vector<8x32xf32>
    %136 = tpu.matmul %99, %22, %cst_71 {dimension_numbers = #tpu.dot_dimension_numbers<[1], [0], [0], [1], [0, 0, 1, 1], [], []>} : vector<8x32xf32>, vector<32x32xf32>, vector<8x32xf32> -> vector<8x32xf32>
    %137 = arith.addf %136, %31 : vector<8x32xf32>
    %138 = arith.addf %131, %134 : vector<8x32xf32>
    %139 = arith.negf %138 : vector<8x32xf32>
    %140 = math.exp %139 : vector<8x32xf32>
    %cst_72 = arith.constant 1.000000e+00 : f32
    %141 = vector.broadcast %cst_72 : f32 to vector<8x32xf32>
    %142 = arith.addf %141, %140 : vector<8x32xf32>
    %143 = arith.divf %141, %142 : vector<8x32xf32>
    %144 = arith.addf %132, %135 : vector<8x32xf32>
    %145 = arith.negf %144 : vector<8x32xf32>
    %146 = math.exp %145 : vector<8x32xf32>
    %cst_73 = arith.constant 1.000000e+00 : f32
    %147 = vector.broadcast %cst_73 : f32 to vector<8x32xf32>
    %148 = arith.addf %147, %146 : vector<8x32xf32>
    %149 = arith.divf %147, %148 : vector<8x32xf32>
    %150 = arith.mulf %143, %137 : vector<8x32xf32>
    %151 = arith.addf %133, %150 : vector<8x32xf32>
    %152 = math.tanh %151 : vector<8x32xf32>
    %cst_74 = arith.constant 1.000000e+00 : f32
    %153 = vector.broadcast %cst_74 : f32 to vector<8x32xf32>
    %154 = arith.subf %153, %149 : vector<8x32xf32>
    %155 = arith.mulf %154, %152 : vector<8x32xf32>
    %156 = arith.mulf %149, %99 : vector<8x32xf32>
    %157 = arith.addf %155, %156 : vector<8x32xf32>
    %cst_75 = arith.constant dense<0.000000e+00> : vector<8x32xf32>
    %158 = tpu.matmul %99, %23, %cst_75 {dimension_numbers = #tpu.dot_dimension_numbers<[1], [0], [0], [1], [0, 0, 1, 1], [], []>} : vector<8x32xf32>, vector<32x32xf32>, vector<8x32xf32> -> vector<8x32xf32>
    %159 = arith.addf %158, %34 : vector<8x32xf32>
    %cst_76 = arith.constant dense<0.000000e+00> : vector<8x32xf32>
    %160 = tpu.matmul %99, %24, %cst_76 {dimension_numbers = #tpu.dot_dimension_numbers<[1], [0], [0], [1], [0, 0, 1, 1], [], []>} : vector<8x32xf32>, vector<32x32xf32>, vector<8x32xf32> -> vector<8x32xf32>
    %161 = arith.addf %160, %37 : vector<8x32xf32>
    %cst_77 = arith.constant dense<0.000000e+00> : vector<8x32xf32>
    %162 = tpu.matmul %99, %25, %cst_77 {dimension_numbers = #tpu.dot_dimension_numbers<[1], [0], [0], [1], [0, 0, 1, 1], [], []>} : vector<8x32xf32>, vector<32x32xf32>, vector<8x32xf32> -> vector<8x32xf32>
    %163 = arith.addf %162, %40 : vector<8x32xf32>
    %cst_78 = arith.constant dense<0.000000e+00> : vector<8x32xf32>
    %164 = tpu.matmul %129, %26, %cst_78 {dimension_numbers = #tpu.dot_dimension_numbers<[1], [0], [0], [1], [0, 0, 1, 1], [], []>} : vector<8x32xf32>, vector<32x32xf32>, vector<8x32xf32> -> vector<8x32xf32>
    %cst_79 = arith.constant dense<0.000000e+00> : vector<8x32xf32>
    %165 = tpu.matmul %129, %27, %cst_79 {dimension_numbers = #tpu.dot_dimension_numbers<[1], [0], [0], [1], [0, 0, 1, 1], [], []>} : vector<8x32xf32>, vector<32x32xf32>, vector<8x32xf32> -> vector<8x32xf32>
    %cst_80 = arith.constant dense<0.000000e+00> : vector<8x32xf32>
    %166 = tpu.matmul %129, %28, %cst_80 {dimension_numbers = #tpu.dot_dimension_numbers<[1], [0], [0], [1], [0, 0, 1, 1], [], []>} : vector<8x32xf32>, vector<32x32xf32>, vector<8x32xf32> -> vector<8x32xf32>
    %167 = arith.addf %166, %43 : vector<8x32xf32>
    %168 = arith.addf %159, %164 : vector<8x32xf32>
    %169 = arith.negf %168 : vector<8x32xf32>
    %170 = math.exp %169 : vector<8x32xf32>
    %cst_81 = arith.constant 1.000000e+00 : f32
    %171 = vector.broadcast %cst_81 : f32 to vector<8x32xf32>
    %172 = arith.addf %171, %170 : vector<8x32xf32>
    %173 = arith.divf %171, %172 : vector<8x32xf32>
    %174 = arith.addf %161, %165 : vector<8x32xf32>
    %175 = arith.negf %174 : vector<8x32xf32>
    %176 = math.exp %175 : vector<8x32xf32>
    %cst_82 = arith.constant 1.000000e+00 : f32
    %177 = vector.broadcast %cst_82 : f32 to vector<8x32xf32>
    %178 = arith.addf %177, %176 : vector<8x32xf32>
    %179 = arith.divf %177, %178 : vector<8x32xf32>
    %180 = arith.mulf %173, %167 : vector<8x32xf32>
    %181 = arith.addf %163, %180 : vector<8x32xf32>
    %182 = math.tanh %181 : vector<8x32xf32>
    %cst_83 = arith.constant 1.000000e+00 : f32
    %183 = vector.broadcast %cst_83 : f32 to vector<8x32xf32>
    %184 = arith.subf %183, %179 : vector<8x32xf32>
    %185 = arith.mulf %184, %182 : vector<8x32xf32>
    %186 = arith.mulf %179, %129 : vector<8x32xf32>
    %187 = arith.addf %185, %186 : vector<8x32xf32>
    %c8_84 = arith.constant 8 : index
    %c0_85 = arith.constant 0 : index
    %188 = vector.load %arg4[%c8_84, %c0_85] : memref<64x32xf32, #tpu.memory_space<vmem>>, vector<8x32xf32>
    tpu.vector_store %arg4[%c8_84, %c0_85], %187 {strides = array<i32>} : memref<64x32xf32, #tpu.memory_space<vmem>>, vector<8x32xf32>,
    %c24 = arith.constant 24 : index
    %c0_86 = arith.constant 0 : index
    %189 = vector.load %arg3[%c24, %c0_86] : memref<192x32xf32, #tpu.memory_space<vmem>>, vector<8x32xf32>
    %c88 = arith.constant 88 : index
    %c0_87 = arith.constant 0 : index
    %190 = vector.load %arg3[%c88, %c0_87] : memref<192x32xf32, #tpu.memory_space<vmem>>, vector<8x32xf32>
    %c152 = arith.constant 152 : index
    %c0_88 = arith.constant 0 : index
    %191 = vector.load %arg3[%c152, %c0_88] : memref<192x32xf32, #tpu.memory_space<vmem>>, vector<8x32xf32>
    %cst_89 = arith.constant dense<0.000000e+00> : vector<8x32xf32>
    %192 = tpu.matmul %157, %20, %cst_89 {dimension_numbers = #tpu.dot_dimension_numbers<[1], [0], [0], [1], [0, 0, 1, 1], [], []>} : vector<8x32xf32>, vector<32x32xf32>, vector<8x32xf32> -> vector<8x32xf32>
    %cst_90 = arith.constant dense<0.000000e+00> : vector<8x32xf32>
    %193 = tpu.matmul %157, %21, %cst_90 {dimension_numbers = #tpu.dot_dimension_numbers<[1], [0], [0], [1], [0, 0, 1, 1], [], []>} : vector<8x32xf32>, vector<32x32xf32>, vector<8x32xf32> -> vector<8x32xf32>
    %cst_91 = arith.constant dense<0.000000e+00> : vector<8x32xf32>
    %194 = tpu.matmul %157, %22, %cst_91 {dimension_numbers = #tpu.dot_dimension_numbers<[1], [0], [0], [1], [0, 0, 1, 1], [], []>} : vector<8x32xf32>, vector<32x32xf32>, vector<8x32xf32> -> vector<8x32xf32>
    %195 = arith.addf %194, %31 : vector<8x32xf32>
    %196 = arith.addf %189, %192 : vector<8x32xf32>
    %197 = arith.negf %196 : vector<8x32xf32>
    %198 = math.exp %197 : vector<8x32xf32>
    %cst_92 = arith.constant 1.000000e+00 : f32
    %199 = vector.broadcast %cst_92 : f32 to vector<8x32xf32>
    %200 = arith.addf %199, %198 : vector<8x32xf32>
    %201 = arith.divf %199, %200 : vector<8x32xf32>
    %202 = arith.addf %190, %193 : vector<8x32xf32>
    %203 = arith.negf %202 : vector<8x32xf32>
    %204 = math.exp %203 : vector<8x32xf32>
    %cst_93 = arith.constant 1.000000e+00 : f32
    %205 = vector.broadcast %cst_93 : f32 to vector<8x32xf32>
    %206 = arith.addf %205, %204 : vector<8x32xf32>
    %207 = arith.divf %205, %206 : vector<8x32xf32>
    %208 = arith.mulf %201, %195 : vector<8x32xf32>
    %209 = arith.addf %191, %208 : vector<8x32xf32>
    %210 = math.tanh %209 : vector<8x32xf32>
    %cst_94 = arith.constant 1.000000e+00 : f32
    %211 = vector.broadcast %cst_94 : f32 to vector<8x32xf32>
    %212 = arith.subf %211, %207 : vector<8x32xf32>
    %213 = arith.mulf %212, %210 : vector<8x32xf32>
    %214 = arith.mulf %207, %157 : vector<8x32xf32>
    %215 = arith.addf %213, %214 : vector<8x32xf32>
    %cst_95 = arith.constant dense<0.000000e+00> : vector<8x32xf32>
    %216 = tpu.matmul %157, %23, %cst_95 {dimension_numbers = #tpu.dot_dimension_numbers<[1], [0], [0], [1], [0, 0, 1, 1], [], []>} : vector<8x32xf32>, vector<32x32xf32>, vector<8x32xf32> -> vector<8x32xf32>
    %217 = arith.addf %216, %34 : vector<8x32xf32>
    %cst_96 = arith.constant dense<0.000000e+00> : vector<8x32xf32>
    %218 = tpu.matmul %157, %24, %cst_96 {dimension_numbers = #tpu.dot_dimension_numbers<[1], [0], [0], [1], [0, 0, 1, 1], [], []>} : vector<8x32xf32>, vector<32x32xf32>, vector<8x32xf32> -> vector<8x32xf32>
    %219 = arith.addf %218, %37 : vector<8x32xf32>
    %cst_97 = arith.constant dense<0.000000e+00> : vector<8x32xf32>
    %220 = tpu.matmul %157, %25, %cst_97 {dimension_numbers = #tpu.dot_dimension_numbers<[1], [0], [0], [1], [0, 0, 1, 1], [], []>} : vector<8x32xf32>, vector<32x32xf32>, vector<8x32xf32> -> vector<8x32xf32>
    %221 = arith.addf %220, %40 : vector<8x32xf32>
    %cst_98 = arith.constant dense<0.000000e+00> : vector<8x32xf32>
    %222 = tpu.matmul %187, %26, %cst_98 {dimension_numbers = #tpu.dot_dimension_numbers<[1], [0], [0], [1], [0, 0, 1, 1], [], []>} : vector<8x32xf32>, vector<32x32xf32>, vector<8x32xf32> -> vector<8x32xf32>
    %cst_99 = arith.constant dense<0.000000e+00> : vector<8x32xf32>
    %223 = tpu.matmul %187, %27, %cst_99 {dimension_numbers = #tpu.dot_dimension_numbers<[1], [0], [0], [1], [0, 0, 1, 1], [], []>} : vector<8x32xf32>, vector<32x32xf32>, vector<8x32xf32> -> vector<8x32xf32>
    %cst_100 = arith.constant dense<0.000000e+00> : vector<8x32xf32>
    %224 = tpu.matmul %187, %28, %cst_100 {dimension_numbers = #tpu.dot_dimension_numbers<[1], [0], [0], [1], [0, 0, 1, 1], [], []>} : vector<8x32xf32>, vector<32x32xf32>, vector<8x32xf32> -> vector<8x32xf32>
    %225 = arith.addf %224, %43 : vector<8x32xf32>
    %226 = arith.addf %217, %222 : vector<8x32xf32>
    %227 = arith.negf %226 : vector<8x32xf32>
    %228 = math.exp %227 : vector<8x32xf32>
    %cst_101 = arith.constant 1.000000e+00 : f32
    %229 = vector.broadcast %cst_101 : f32 to vector<8x32xf32>
    %230 = arith.addf %229, %228 : vector<8x32xf32>
    %231 = arith.divf %229, %230 : vector<8x32xf32>
    %232 = arith.addf %219, %223 : vector<8x32xf32>
    %233 = arith.negf %232 : vector<8x32xf32>
    %234 = math.exp %233 : vector<8x32xf32>
    %cst_102 = arith.constant 1.000000e+00 : f32
    %235 = vector.broadcast %cst_102 : f32 to vector<8x32xf32>
    %236 = arith.addf %235, %234 : vector<8x32xf32>
    %237 = arith.divf %235, %236 : vector<8x32xf32>
    %238 = arith.mulf %231, %225 : vector<8x32xf32>
    %239 = arith.addf %221, %238 : vector<8x32xf32>
    %240 = math.tanh %239 : vector<8x32xf32>
    %cst_103 = arith.constant 1.000000e+00 : f32
    %241 = vector.broadcast %cst_103 : f32 to vector<8x32xf32>
    %242 = arith.subf %241, %237 : vector<8x32xf32>
    %243 = arith.mulf %242, %240 : vector<8x32xf32>
    %244 = arith.mulf %237, %187 : vector<8x32xf32>
    %245 = arith.addf %243, %244 : vector<8x32xf32>
    %c16_104 = arith.constant 16 : index
    %c0_105 = arith.constant 0 : index
    %246 = vector.load %arg4[%c16_104, %c0_105] : memref<64x32xf32, #tpu.memory_space<vmem>>, vector<8x32xf32>
    tpu.vector_store %arg4[%c16_104, %c0_105], %245 {strides = array<i32>} : memref<64x32xf32, #tpu.memory_space<vmem>>, vector<8x32xf32>,
    %c32_106 = arith.constant 32 : index
    %c0_107 = arith.constant 0 : index
    %247 = vector.load %arg3[%c32_106, %c0_107] : memref<192x32xf32, #tpu.memory_space<vmem>>, vector<8x32xf32>
    %c96_108 = arith.constant 96 : index
    %c0_109 = arith.constant 0 : index
    %248 = vector.load %arg3[%c96_108, %c0_109] : memref<192x32xf32, #tpu.memory_space<vmem>>, vector<8x32xf32>
    %c160_110 = arith.constant 160 : index
    %c0_111 = arith.constant 0 : index
    %249 = vector.load %arg3[%c160_110, %c0_111] : memref<192x32xf32, #tpu.memory_space<vmem>>, vector<8x32xf32>
    %cst_112 = arith.constant dense<0.000000e+00> : vector<8x32xf32>
    %250 = tpu.matmul %215, %20, %cst_112 {dimension_numbers = #tpu.dot_dimension_numbers<[1], [0], [0], [1], [0, 0, 1, 1], [], []>} : vector<8x32xf32>, vector<32x32xf32>, vector<8x32xf32> -> vector<8x32xf32>
    %cst_113 = arith.constant dense<0.000000e+00> : vector<8x32xf32>
    %251 = tpu.matmul %215, %21, %cst_113 {dimension_numbers = #tpu.dot_dimension_numbers<[1], [0], [0], [1], [0, 0, 1, 1], [], []>} : vector<8x32xf32>, vector<32x32xf32>, vector<8x32xf32> -> vector<8x32xf32>
    %cst_114 = arith.constant dense<0.000000e+00> : vector<8x32xf32>
    %252 = tpu.matmul %215, %22, %cst_114 {dimension_numbers = #tpu.dot_dimension_numbers<[1], [0], [0], [1], [0, 0, 1, 1], [], []>} : vector<8x32xf32>, vector<32x32xf32>, vector<8x32xf32> -> vector<8x32xf32>
    %253 = arith.addf %252, %31 : vector<8x32xf32>
    %254 = arith.addf %247, %250 : vector<8x32xf32>
    %255 = arith.negf %254 : vector<8x32xf32>
    %256 = math.exp %255 : vector<8x32xf32>
    %cst_115 = arith.constant 1.000000e+00 : f32
    %257 = vector.broadcast %cst_115 : f32 to vector<8x32xf32>
    %258 = arith.addf %257, %256 : vector<8x32xf32>
    %259 = arith.divf %257, %258 : vector<8x32xf32>
    %260 = arith.addf %248, %251 : vector<8x32xf32>
    %261 = arith.negf %260 : vector<8x32xf32>
    %262 = math.exp %261 : vector<8x32xf32>
    %cst_116 = arith.constant 1.000000e+00 : f32
    %263 = vector.broadcast %cst_116 : f32 to vector<8x32xf32>
    %264 = arith.addf %263, %262 : vector<8x32xf32>
    %265 = arith.divf %263, %264 : vector<8x32xf32>
    %266 = arith.mulf %259, %253 : vector<8x32xf32>
    %267 = arith.addf %249, %266 : vector<8x32xf32>
    %268 = math.tanh %267 : vector<8x32xf32>
    %cst_117 = arith.constant 1.000000e+00 : f32
    %269 = vector.broadcast %cst_117 : f32 to vector<8x32xf32>
    %270 = arith.subf %269, %265 : vector<8x32xf32>
    %271 = arith.mulf %270, %268 : vector<8x32xf32>
    %272 = arith.mulf %265, %215 : vector<8x32xf32>
    %273 = arith.addf %271, %272 : vector<8x32xf32>
    %cst_118 = arith.constant dense<0.000000e+00> : vector<8x32xf32>
    %274 = tpu.matmul %215, %23, %cst_118 {dimension_numbers = #tpu.dot_dimension_numbers<[1], [0], [0], [1], [0, 0, 1, 1], [], []>} : vector<8x32xf32>, vector<32x32xf32>, vector<8x32xf32> -> vector<8x32xf32>
    %275 = arith.addf %274, %34 : vector<8x32xf32>
    %cst_119 = arith.constant dense<0.000000e+00> : vector<8x32xf32>
    %276 = tpu.matmul %215, %24, %cst_119 {dimension_numbers = #tpu.dot_dimension_numbers<[1], [0], [0], [1], [0, 0, 1, 1], [], []>} : vector<8x32xf32>, vector<32x32xf32>, vector<8x32xf32> -> vector<8x32xf32>
    %277 = arith.addf %276, %37 : vector<8x32xf32>
    %cst_120 = arith.constant dense<0.000000e+00> : vector<8x32xf32>
    %278 = tpu.matmul %215, %25, %cst_120 {dimension_numbers = #tpu.dot_dimension_numbers<[1], [0], [0], [1], [0, 0, 1, 1], [], []>} : vector<8x32xf32>, vector<32x32xf32>, vector<8x32xf32> -> vector<8x32xf32>
    %279 = arith.addf %278, %40 : vector<8x32xf32>
    %cst_121 = arith.constant dense<0.000000e+00> : vector<8x32xf32>
    %280 = tpu.matmul %245, %26, %cst_121 {dimension_numbers = #tpu.dot_dimension_numbers<[1], [0], [0], [1], [0, 0, 1, 1], [], []>} : vector<8x32xf32>, vector<32x32xf32>, vector<8x32xf32> -> vector<8x32xf32>
    %cst_122 = arith.constant dense<0.000000e+00> : vector<8x32xf32>
    %281 = tpu.matmul %245, %27, %cst_122 {dimension_numbers = #tpu.dot_dimension_numbers<[1], [0], [0], [1], [0, 0, 1, 1], [], []>} : vector<8x32xf32>, vector<32x32xf32>, vector<8x32xf32> -> vector<8x32xf32>
    %cst_123 = arith.constant dense<0.000000e+00> : vector<8x32xf32>
    %282 = tpu.matmul %245, %28, %cst_123 {dimension_numbers = #tpu.dot_dimension_numbers<[1], [0], [0], [1], [0, 0, 1, 1], [], []>} : vector<8x32xf32>, vector<32x32xf32>, vector<8x32xf32> -> vector<8x32xf32>
    %283 = arith.addf %282, %43 : vector<8x32xf32>
    %284 = arith.addf %275, %280 : vector<8x32xf32>
    %285 = arith.negf %284 : vector<8x32xf32>
    %286 = math.exp %285 : vector<8x32xf32>
    %cst_124 = arith.constant 1.000000e+00 : f32
    %287 = vector.broadcast %cst_124 : f32 to vector<8x32xf32>
    %288 = arith.addf %287, %286 : vector<8x32xf32>
    %289 = arith.divf %287, %288 : vector<8x32xf32>
    %290 = arith.addf %277, %281 : vector<8x32xf32>
    %291 = arith.negf %290 : vector<8x32xf32>
    %292 = math.exp %291 : vector<8x32xf32>
    %cst_125 = arith.constant 1.000000e+00 : f32
    %293 = vector.broadcast %cst_125 : f32 to vector<8x32xf32>
    %294 = arith.addf %293, %292 : vector<8x32xf32>
    %295 = arith.divf %293, %294 : vector<8x32xf32>
    %296 = arith.mulf %289, %283 : vector<8x32xf32>
    %297 = arith.addf %279, %296 : vector<8x32xf32>
    %298 = math.tanh %297 : vector<8x32xf32>
    %cst_126 = arith.constant 1.000000e+00 : f32
    %299 = vector.broadcast %cst_126 : f32 to vector<8x32xf32>
    %300 = arith.subf %299, %295 : vector<8x32xf32>
    %301 = arith.mulf %300, %298 : vector<8x32xf32>
    %302 = arith.mulf %295, %245 : vector<8x32xf32>
    %303 = arith.addf %301, %302 : vector<8x32xf32>
    %c24_127 = arith.constant 24 : index
    %c0_128 = arith.constant 0 : index
    %304 = vector.load %arg4[%c24_127, %c0_128] : memref<64x32xf32, #tpu.memory_space<vmem>>, vector<8x32xf32>
    tpu.vector_store %arg4[%c24_127, %c0_128], %303 {strides = array<i32>} : memref<64x32xf32, #tpu.memory_space<vmem>>, vector<8x32xf32>,
    %c40 = arith.constant 40 : index
    %c0_129 = arith.constant 0 : index
    %305 = vector.load %arg3[%c40, %c0_129] : memref<192x32xf32, #tpu.memory_space<vmem>>, vector<8x32xf32>
    %c104 = arith.constant 104 : index
    %c0_130 = arith.constant 0 : index
    %306 = vector.load %arg3[%c104, %c0_130] : memref<192x32xf32, #tpu.memory_space<vmem>>, vector<8x32xf32>
    %c168 = arith.constant 168 : index
    %c0_131 = arith.constant 0 : index
    %307 = vector.load %arg3[%c168, %c0_131] : memref<192x32xf32, #tpu.memory_space<vmem>>, vector<8x32xf32>
    %cst_132 = arith.constant dense<0.000000e+00> : vector<8x32xf32>
    %308 = tpu.matmul %273, %20, %cst_132 {dimension_numbers = #tpu.dot_dimension_numbers<[1], [0], [0], [1], [0, 0, 1, 1], [], []>} : vector<8x32xf32>, vector<32x32xf32>, vector<8x32xf32> -> vector<8x32xf32>
    %cst_133 = arith.constant dense<0.000000e+00> : vector<8x32xf32>
    %309 = tpu.matmul %273, %21, %cst_133 {dimension_numbers = #tpu.dot_dimension_numbers<[1], [0], [0], [1], [0, 0, 1, 1], [], []>} : vector<8x32xf32>, vector<32x32xf32>, vector<8x32xf32> -> vector<8x32xf32>
    %cst_134 = arith.constant dense<0.000000e+00> : vector<8x32xf32>
    %310 = tpu.matmul %273, %22, %cst_134 {dimension_numbers = #tpu.dot_dimension_numbers<[1], [0], [0], [1], [0, 0, 1, 1], [], []>} : vector<8x32xf32>, vector<32x32xf32>, vector<8x32xf32> -> vector<8x32xf32>
    %311 = arith.addf %310, %31 : vector<8x32xf32>
    %312 = arith.addf %305, %308 : vector<8x32xf32>
    %313 = arith.negf %312 : vector<8x32xf32>
    %314 = math.exp %313 : vector<8x32xf32>
    %cst_135 = arith.constant 1.000000e+00 : f32
    %315 = vector.broadcast %cst_135 : f32 to vector<8x32xf32>
    %316 = arith.addf %315, %314 : vector<8x32xf32>
    %317 = arith.divf %315, %316 : vector<8x32xf32>
    %318 = arith.addf %306, %309 : vector<8x32xf32>
    %319 = arith.negf %318 : vector<8x32xf32>
    %320 = math.exp %319 : vector<8x32xf32>
    %cst_136 = arith.constant 1.000000e+00 : f32
    %321 = vector.broadcast %cst_136 : f32 to vector<8x32xf32>
    %322 = arith.addf %321, %320 : vector<8x32xf32>
    %323 = arith.divf %321, %322 : vector<8x32xf32>
    %324 = arith.mulf %317, %311 : vector<8x32xf32>
    %325 = arith.addf %307, %324 : vector<8x32xf32>
    %326 = math.tanh %325 : vector<8x32xf32>
    %cst_137 = arith.constant 1.000000e+00 : f32
    %327 = vector.broadcast %cst_137 : f32 to vector<8x32xf32>
    %328 = arith.subf %327, %323 : vector<8x32xf32>
    %329 = arith.mulf %328, %326 : vector<8x32xf32>
    %330 = arith.mulf %323, %273 : vector<8x32xf32>
    %331 = arith.addf %329, %330 : vector<8x32xf32>
    %cst_138 = arith.constant dense<0.000000e+00> : vector<8x32xf32>
    %332 = tpu.matmul %273, %23, %cst_138 {dimension_numbers = #tpu.dot_dimension_numbers<[1], [0], [0], [1], [0, 0, 1, 1], [], []>} : vector<8x32xf32>, vector<32x32xf32>, vector<8x32xf32> -> vector<8x32xf32>
    %333 = arith.addf %332, %34 : vector<8x32xf32>
    %cst_139 = arith.constant dense<0.000000e+00> : vector<8x32xf32>
    %334 = tpu.matmul %273, %24, %cst_139 {dimension_numbers = #tpu.dot_dimension_numbers<[1], [0], [0], [1], [0, 0, 1, 1], [], []>} : vector<8x32xf32>, vector<32x32xf32>, vector<8x32xf32> -> vector<8x32xf32>
    %335 = arith.addf %334, %37 : vector<8x32xf32>
    %cst_140 = arith.constant dense<0.000000e+00> : vector<8x32xf32>
    %336 = tpu.matmul %273, %25, %cst_140 {dimension_numbers = #tpu.dot_dimension_numbers<[1], [0], [0], [1], [0, 0, 1, 1], [], []>} : vector<8x32xf32>, vector<32x32xf32>, vector<8x32xf32> -> vector<8x32xf32>
    %337 = arith.addf %336, %40 : vector<8x32xf32>
    %cst_141 = arith.constant dense<0.000000e+00> : vector<8x32xf32>
    %338 = tpu.matmul %303, %26, %cst_141 {dimension_numbers = #tpu.dot_dimension_numbers<[1], [0], [0], [1], [0, 0, 1, 1], [], []>} : vector<8x32xf32>, vector<32x32xf32>, vector<8x32xf32> -> vector<8x32xf32>
    %cst_142 = arith.constant dense<0.000000e+00> : vector<8x32xf32>
    %339 = tpu.matmul %303, %27, %cst_142 {dimension_numbers = #tpu.dot_dimension_numbers<[1], [0], [0], [1], [0, 0, 1, 1], [], []>} : vector<8x32xf32>, vector<32x32xf32>, vector<8x32xf32> -> vector<8x32xf32>
    %cst_143 = arith.constant dense<0.000000e+00> : vector<8x32xf32>
    %340 = tpu.matmul %303, %28, %cst_143 {dimension_numbers = #tpu.dot_dimension_numbers<[1], [0], [0], [1], [0, 0, 1, 1], [], []>} : vector<8x32xf32>, vector<32x32xf32>, vector<8x32xf32> -> vector<8x32xf32>
    %341 = arith.addf %340, %43 : vector<8x32xf32>
    %342 = arith.addf %333, %338 : vector<8x32xf32>
    %343 = arith.negf %342 : vector<8x32xf32>
    %344 = math.exp %343 : vector<8x32xf32>
    %cst_144 = arith.constant 1.000000e+00 : f32
    %345 = vector.broadcast %cst_144 : f32 to vector<8x32xf32>
    %346 = arith.addf %345, %344 : vector<8x32xf32>
    %347 = arith.divf %345, %346 : vector<8x32xf32>
    %348 = arith.addf %335, %339 : vector<8x32xf32>
    %349 = arith.negf %348 : vector<8x32xf32>
    %350 = math.exp %349 : vector<8x32xf32>
    %cst_145 = arith.constant 1.000000e+00 : f32
    %351 = vector.broadcast %cst_145 : f32 to vector<8x32xf32>
    %352 = arith.addf %351, %350 : vector<8x32xf32>
    %353 = arith.divf %351, %352 : vector<8x32xf32>
    %354 = arith.mulf %347, %341 : vector<8x32xf32>
    %355 = arith.addf %337, %354 : vector<8x32xf32>
    %356 = math.tanh %355 : vector<8x32xf32>
    %cst_146 = arith.constant 1.000000e+00 : f32
    %357 = vector.broadcast %cst_146 : f32 to vector<8x32xf32>
    %358 = arith.subf %357, %353 : vector<8x32xf32>
    %359 = arith.mulf %358, %356 : vector<8x32xf32>
    %360 = arith.mulf %353, %303 : vector<8x32xf32>
    %361 = arith.addf %359, %360 : vector<8x32xf32>
    %c32_147 = arith.constant 32 : index
    %c0_148 = arith.constant 0 : index
    %362 = vector.load %arg4[%c32_147, %c0_148] : memref<64x32xf32, #tpu.memory_space<vmem>>, vector<8x32xf32>
    tpu.vector_store %arg4[%c32_147, %c0_148], %361 {strides = array<i32>} : memref<64x32xf32, #tpu.memory_space<vmem>>, vector<8x32xf32>,
    %c48 = arith.constant 48 : index
    %c0_149 = arith.constant 0 : index
    %363 = vector.load %arg3[%c48, %c0_149] : memref<192x32xf32, #tpu.memory_space<vmem>>, vector<8x32xf32>
    %c112 = arith.constant 112 : index
    %c0_150 = arith.constant 0 : index
    %364 = vector.load %arg3[%c112, %c0_150] : memref<192x32xf32, #tpu.memory_space<vmem>>, vector<8x32xf32>
    %c176 = arith.constant 176 : index
    %c0_151 = arith.constant 0 : index
    %365 = vector.load %arg3[%c176, %c0_151] : memref<192x32xf32, #tpu.memory_space<vmem>>, vector<8x32xf32>
    %cst_152 = arith.constant dense<0.000000e+00> : vector<8x32xf32>
    %366 = tpu.matmul %331, %20, %cst_152 {dimension_numbers = #tpu.dot_dimension_numbers<[1], [0], [0], [1], [0, 0, 1, 1], [], []>} : vector<8x32xf32>, vector<32x32xf32>, vector<8x32xf32> -> vector<8x32xf32>
    %cst_153 = arith.constant dense<0.000000e+00> : vector<8x32xf32>
    %367 = tpu.matmul %331, %21, %cst_153 {dimension_numbers = #tpu.dot_dimension_numbers<[1], [0], [0], [1], [0, 0, 1, 1], [], []>} : vector<8x32xf32>, vector<32x32xf32>, vector<8x32xf32> -> vector<8x32xf32>
    %cst_154 = arith.constant dense<0.000000e+00> : vector<8x32xf32>
    %368 = tpu.matmul %331, %22, %cst_154 {dimension_numbers = #tpu.dot_dimension_numbers<[1], [0], [0], [1], [0, 0, 1, 1], [], []>} : vector<8x32xf32>, vector<32x32xf32>, vector<8x32xf32> -> vector<8x32xf32>
    %369 = arith.addf %368, %31 : vector<8x32xf32>
    %370 = arith.addf %363, %366 : vector<8x32xf32>
    %371 = arith.negf %370 : vector<8x32xf32>
    %372 = math.exp %371 : vector<8x32xf32>
    %cst_155 = arith.constant 1.000000e+00 : f32
    %373 = vector.broadcast %cst_155 : f32 to vector<8x32xf32>
    %374 = arith.addf %373, %372 : vector<8x32xf32>
    %375 = arith.divf %373, %374 : vector<8x32xf32>
    %376 = arith.addf %364, %367 : vector<8x32xf32>
    %377 = arith.negf %376 : vector<8x32xf32>
    %378 = math.exp %377 : vector<8x32xf32>
    %cst_156 = arith.constant 1.000000e+00 : f32
    %379 = vector.broadcast %cst_156 : f32 to vector<8x32xf32>
    %380 = arith.addf %379, %378 : vector<8x32xf32>
    %381 = arith.divf %379, %380 : vector<8x32xf32>
    %382 = arith.mulf %375, %369 : vector<8x32xf32>
    %383 = arith.addf %365, %382 : vector<8x32xf32>
    %384 = math.tanh %383 : vector<8x32xf32>
    %cst_157 = arith.constant 1.000000e+00 : f32
    %385 = vector.broadcast %cst_157 : f32 to vector<8x32xf32>
    %386 = arith.subf %385, %381 : vector<8x32xf32>
    %387 = arith.mulf %386, %384 : vector<8x32xf32>
    %388 = arith.mulf %381, %331 : vector<8x32xf32>
    %389 = arith.addf %387, %388 : vector<8x32xf32>
    %cst_158 = arith.constant dense<0.000000e+00> : vector<8x32xf32>
    %390 = tpu.matmul %331, %23, %cst_158 {dimension_numbers = #tpu.dot_dimension_numbers<[1], [0], [0], [1], [0, 0, 1, 1], [], []>} : vector<8x32xf32>, vector<32x32xf32>, vector<8x32xf32> -> vector<8x32xf32>
    %391 = arith.addf %390, %34 : vector<8x32xf32>
    %cst_159 = arith.constant dense<0.000000e+00> : vector<8x32xf32>
    %392 = tpu.matmul %331, %24, %cst_159 {dimension_numbers = #tpu.dot_dimension_numbers<[1], [0], [0], [1], [0, 0, 1, 1], [], []>} : vector<8x32xf32>, vector<32x32xf32>, vector<8x32xf32> -> vector<8x32xf32>
    %393 = arith.addf %392, %37 : vector<8x32xf32>
    %cst_160 = arith.constant dense<0.000000e+00> : vector<8x32xf32>
    %394 = tpu.matmul %331, %25, %cst_160 {dimension_numbers = #tpu.dot_dimension_numbers<[1], [0], [0], [1], [0, 0, 1, 1], [], []>} : vector<8x32xf32>, vector<32x32xf32>, vector<8x32xf32> -> vector<8x32xf32>
    %395 = arith.addf %394, %40 : vector<8x32xf32>
    %cst_161 = arith.constant dense<0.000000e+00> : vector<8x32xf32>
    %396 = tpu.matmul %361, %26, %cst_161 {dimension_numbers = #tpu.dot_dimension_numbers<[1], [0], [0], [1], [0, 0, 1, 1], [], []>} : vector<8x32xf32>, vector<32x32xf32>, vector<8x32xf32> -> vector<8x32xf32>
    %cst_162 = arith.constant dense<0.000000e+00> : vector<8x32xf32>
    %397 = tpu.matmul %361, %27, %cst_162 {dimension_numbers = #tpu.dot_dimension_numbers<[1], [0], [0], [1], [0, 0, 1, 1], [], []>} : vector<8x32xf32>, vector<32x32xf32>, vector<8x32xf32> -> vector<8x32xf32>
    %cst_163 = arith.constant dense<0.000000e+00> : vector<8x32xf32>
    %398 = tpu.matmul %361, %28, %cst_163 {dimension_numbers = #tpu.dot_dimension_numbers<[1], [0], [0], [1], [0, 0, 1, 1], [], []>} : vector<8x32xf32>, vector<32x32xf32>, vector<8x32xf32> -> vector<8x32xf32>
    %399 = arith.addf %398, %43 : vector<8x32xf32>
    %400 = arith.addf %391, %396 : vector<8x32xf32>
    %401 = arith.negf %400 : vector<8x32xf32>
    %402 = math.exp %401 : vector<8x32xf32>
    %cst_164 = arith.constant 1.000000e+00 : f32
    %403 = vector.broadcast %cst_164 : f32 to vector<8x32xf32>
    %404 = arith.addf %403, %402 : vector<8x32xf32>
    %405 = arith.divf %403, %404 : vector<8x32xf32>
    %406 = arith.addf %393, %397 : vector<8x32xf32>
    %407 = arith.negf %406 : vector<8x32xf32>
    %408 = math.exp %407 : vector<8x32xf32>
    %cst_165 = arith.constant 1.000000e+00 : f32
    %409 = vector.broadcast %cst_165 : f32 to vector<8x32xf32>
    %410 = arith.addf %409, %408 : vector<8x32xf32>
    %411 = arith.divf %409, %410 : vector<8x32xf32>
    %412 = arith.mulf %405, %399 : vector<8x32xf32>
    %413 = arith.addf %395, %412 : vector<8x32xf32>
    %414 = math.tanh %413 : vector<8x32xf32>
    %cst_166 = arith.constant 1.000000e+00 : f32
    %415 = vector.broadcast %cst_166 : f32 to vector<8x32xf32>
    %416 = arith.subf %415, %411 : vector<8x32xf32>
    %417 = arith.mulf %416, %414 : vector<8x32xf32>
    %418 = arith.mulf %411, %361 : vector<8x32xf32>
    %419 = arith.addf %417, %418 : vector<8x32xf32>
    %c40_167 = arith.constant 40 : index
    %c0_168 = arith.constant 0 : index
    %420 = vector.load %arg4[%c40_167, %c0_168] : memref<64x32xf32, #tpu.memory_space<vmem>>, vector<8x32xf32>
    tpu.vector_store %arg4[%c40_167, %c0_168], %419 {strides = array<i32>} : memref<64x32xf32, #tpu.memory_space<vmem>>, vector<8x32xf32>,
    %c56 = arith.constant 56 : index
    %c0_169 = arith.constant 0 : index
    %421 = vector.load %arg3[%c56, %c0_169] : memref<192x32xf32, #tpu.memory_space<vmem>>, vector<8x32xf32>
    %c120 = arith.constant 120 : index
    %c0_170 = arith.constant 0 : index
    %422 = vector.load %arg3[%c120, %c0_170] : memref<192x32xf32, #tpu.memory_space<vmem>>, vector<8x32xf32>
    %c184 = arith.constant 184 : index
    %c0_171 = arith.constant 0 : index
    %423 = vector.load %arg3[%c184, %c0_171] : memref<192x32xf32, #tpu.memory_space<vmem>>, vector<8x32xf32>
    %cst_172 = arith.constant dense<0.000000e+00> : vector<8x32xf32>
    %424 = tpu.matmul %389, %20, %cst_172 {dimension_numbers = #tpu.dot_dimension_numbers<[1], [0], [0], [1], [0, 0, 1, 1], [], []>} : vector<8x32xf32>, vector<32x32xf32>, vector<8x32xf32> -> vector<8x32xf32>
    %cst_173 = arith.constant dense<0.000000e+00> : vector<8x32xf32>
    %425 = tpu.matmul %389, %21, %cst_173 {dimension_numbers = #tpu.dot_dimension_numbers<[1], [0], [0], [1], [0, 0, 1, 1], [], []>} : vector<8x32xf32>, vector<32x32xf32>, vector<8x32xf32> -> vector<8x32xf32>
    %cst_174 = arith.constant dense<0.000000e+00> : vector<8x32xf32>
    %426 = tpu.matmul %389, %22, %cst_174 {dimension_numbers = #tpu.dot_dimension_numbers<[1], [0], [0], [1], [0, 0, 1, 1], [], []>} : vector<8x32xf32>, vector<32x32xf32>, vector<8x32xf32> -> vector<8x32xf32>
    %427 = arith.addf %426, %31 : vector<8x32xf32>
    %428 = arith.addf %421, %424 : vector<8x32xf32>
    %429 = arith.negf %428 : vector<8x32xf32>
    %430 = math.exp %429 : vector<8x32xf32>
    %cst_175 = arith.constant 1.000000e+00 : f32
    %431 = vector.broadcast %cst_175 : f32 to vector<8x32xf32>
    %432 = arith.addf %431, %430 : vector<8x32xf32>
    %433 = arith.divf %431, %432 : vector<8x32xf32>
    %434 = arith.addf %422, %425 : vector<8x32xf32>
    %435 = arith.negf %434 : vector<8x32xf32>
    %436 = math.exp %435 : vector<8x32xf32>
    %cst_176 = arith.constant 1.000000e+00 : f32
    %437 = vector.broadcast %cst_176 : f32 to vector<8x32xf32>
    %438 = arith.addf %437, %436 : vector<8x32xf32>
    %439 = arith.divf %437, %438 : vector<8x32xf32>
    %440 = arith.mulf %433, %427 : vector<8x32xf32>
    %441 = arith.addf %423, %440 : vector<8x32xf32>
    %442 = math.tanh %441 : vector<8x32xf32>
    %cst_177 = arith.constant 1.000000e+00 : f32
    %443 = vector.broadcast %cst_177 : f32 to vector<8x32xf32>
    %444 = arith.subf %443, %439 : vector<8x32xf32>
    %445 = arith.mulf %444, %442 : vector<8x32xf32>
    %446 = arith.mulf %439, %389 : vector<8x32xf32>
    %447 = arith.addf %445, %446 : vector<8x32xf32>
    %cst_178 = arith.constant dense<0.000000e+00> : vector<8x32xf32>
    %448 = tpu.matmul %389, %23, %cst_178 {dimension_numbers = #tpu.dot_dimension_numbers<[1], [0], [0], [1], [0, 0, 1, 1], [], []>} : vector<8x32xf32>, vector<32x32xf32>, vector<8x32xf32> -> vector<8x32xf32>
    %449 = arith.addf %448, %34 : vector<8x32xf32>
    %cst_179 = arith.constant dense<0.000000e+00> : vector<8x32xf32>
    %450 = tpu.matmul %389, %24, %cst_179 {dimension_numbers = #tpu.dot_dimension_numbers<[1], [0], [0], [1], [0, 0, 1, 1], [], []>} : vector<8x32xf32>, vector<32x32xf32>, vector<8x32xf32> -> vector<8x32xf32>
    %451 = arith.addf %450, %37 : vector<8x32xf32>
    %cst_180 = arith.constant dense<0.000000e+00> : vector<8x32xf32>
    %452 = tpu.matmul %389, %25, %cst_180 {dimension_numbers = #tpu.dot_dimension_numbers<[1], [0], [0], [1], [0, 0, 1, 1], [], []>} : vector<8x32xf32>, vector<32x32xf32>, vector<8x32xf32> -> vector<8x32xf32>
    %453 = arith.addf %452, %40 : vector<8x32xf32>
    %cst_181 = arith.constant dense<0.000000e+00> : vector<8x32xf32>
    %454 = tpu.matmul %419, %26, %cst_181 {dimension_numbers = #tpu.dot_dimension_numbers<[1], [0], [0], [1], [0, 0, 1, 1], [], []>} : vector<8x32xf32>, vector<32x32xf32>, vector<8x32xf32> -> vector<8x32xf32>
    %cst_182 = arith.constant dense<0.000000e+00> : vector<8x32xf32>
    %455 = tpu.matmul %419, %27, %cst_182 {dimension_numbers = #tpu.dot_dimension_numbers<[1], [0], [0], [1], [0, 0, 1, 1], [], []>} : vector<8x32xf32>, vector<32x32xf32>, vector<8x32xf32> -> vector<8x32xf32>
    %cst_183 = arith.constant dense<0.000000e+00> : vector<8x32xf32>
    %456 = tpu.matmul %419, %28, %cst_183 {dimension_numbers = #tpu.dot_dimension_numbers<[1], [0], [0], [1], [0, 0, 1, 1], [], []>} : vector<8x32xf32>, vector<32x32xf32>, vector<8x32xf32> -> vector<8x32xf32>
    %457 = arith.addf %456, %43 : vector<8x32xf32>
    %458 = arith.addf %449, %454 : vector<8x32xf32>
    %459 = arith.negf %458 : vector<8x32xf32>
    %460 = math.exp %459 : vector<8x32xf32>
    %cst_184 = arith.constant 1.000000e+00 : f32
    %461 = vector.broadcast %cst_184 : f32 to vector<8x32xf32>
    %462 = arith.addf %461, %460 : vector<8x32xf32>
    %463 = arith.divf %461, %462 : vector<8x32xf32>
    %464 = arith.addf %451, %455 : vector<8x32xf32>
    %465 = arith.negf %464 : vector<8x32xf32>
    %466 = math.exp %465 : vector<8x32xf32>
    %cst_185 = arith.constant 1.000000e+00 : f32
    %467 = vector.broadcast %cst_185 : f32 to vector<8x32xf32>
    %468 = arith.addf %467, %466 : vector<8x32xf32>
    %469 = arith.divf %467, %468 : vector<8x32xf32>
    %470 = arith.mulf %463, %457 : vector<8x32xf32>
    %471 = arith.addf %453, %470 : vector<8x32xf32>
    %472 = math.tanh %471 : vector<8x32xf32>
    %cst_186 = arith.constant 1.000000e+00 : f32
    %473 = vector.broadcast %cst_186 : f32 to vector<8x32xf32>
    %474 = arith.subf %473, %469 : vector<8x32xf32>
    %475 = arith.mulf %474, %472 : vector<8x32xf32>
    %476 = arith.mulf %469, %419 : vector<8x32xf32>
    %477 = arith.addf %475, %476 : vector<8x32xf32>
    %c48_187 = arith.constant 48 : index
    %c0_188 = arith.constant 0 : index
    %478 = vector.load %arg4[%c48_187, %c0_188] : memref<64x32xf32, #tpu.memory_space<vmem>>, vector<8x32xf32>
    tpu.vector_store %arg4[%c48_187, %c0_188], %477 {strides = array<i32>} : memref<64x32xf32, #tpu.memory_space<vmem>>, vector<8x32xf32>,
    %cst_189 = arith.constant dense<0.000000e+00> : vector<8x32xf32>
    %479 = tpu.matmul %447, %23, %cst_189 {dimension_numbers = #tpu.dot_dimension_numbers<[1], [0], [0], [1], [0, 0, 1, 1], [], []>} : vector<8x32xf32>, vector<32x32xf32>, vector<8x32xf32> -> vector<8x32xf32>
    %480 = arith.addf %479, %34 : vector<8x32xf32>
    %cst_190 = arith.constant dense<0.000000e+00> : vector<8x32xf32>
    %481 = tpu.matmul %447, %24, %cst_190 {dimension_numbers = #tpu.dot_dimension_numbers<[1], [0], [0], [1], [0, 0, 1, 1], [], []>} : vector<8x32xf32>, vector<32x32xf32>, vector<8x32xf32> -> vector<8x32xf32>
    %482 = arith.addf %481, %37 : vector<8x32xf32>
    %cst_191 = arith.constant dense<0.000000e+00> : vector<8x32xf32>
    %483 = tpu.matmul %447, %25, %cst_191 {dimension_numbers = #tpu.dot_dimension_numbers<[1], [0], [0], [1], [0, 0, 1, 1], [], []>} : vector<8x32xf32>, vector<32x32xf32>, vector<8x32xf32> -> vector<8x32xf32>
    %484 = arith.addf %483, %40 : vector<8x32xf32>
    %cst_192 = arith.constant dense<0.000000e+00> : vector<8x32xf32>
    %485 = tpu.matmul %477, %26, %cst_192 {dimension_numbers = #tpu.dot_dimension_numbers<[1], [0], [0], [1], [0, 0, 1, 1], [], []>} : vector<8x32xf32>, vector<32x32xf32>, vector<8x32xf32> -> vector<8x32xf32>
    %cst_193 = arith.constant dense<0.000000e+00> : vector<8x32xf32>
    %486 = tpu.matmul %477, %27, %cst_193 {dimension_numbers = #tpu.dot_dimension_numbers<[1], [0], [0], [1], [0, 0, 1, 1], [], []>} : vector<8x32xf32>, vector<32x32xf32>, vector<8x32xf32> -> vector<8x32xf32>
    %cst_194 = arith.constant dense<0.000000e+00> : vector<8x32xf32>
    %487 = tpu.matmul %477, %28, %cst_194 {dimension_numbers = #tpu.dot_dimension_numbers<[1], [0], [0], [1], [0, 0, 1, 1], [], []>} : vector<8x32xf32>, vector<32x32xf32>, vector<8x32xf32> -> vector<8x32xf32>
    %488 = arith.addf %487, %43 : vector<8x32xf32>
    %489 = arith.addf %480, %485 : vector<8x32xf32>
    %490 = arith.negf %489 : vector<8x32xf32>
    %491 = math.exp %490 : vector<8x32xf32>
    %cst_195 = arith.constant 1.000000e+00 : f32
    %492 = vector.broadcast %cst_195 : f32 to vector<8x32xf32>
    %493 = arith.addf %492, %491 : vector<8x32xf32>
    %494 = arith.divf %492, %493 : vector<8x32xf32>
    %495 = arith.addf %482, %486 : vector<8x32xf32>
    %496 = arith.negf %495 : vector<8x32xf32>
    %497 = math.exp %496 : vector<8x32xf32>
    %cst_196 = arith.constant 1.000000e+00 : f32
    %498 = vector.broadcast %cst_196 : f32 to vector<8x32xf32>
    %499 = arith.addf %498, %497 : vector<8x32xf32>
    %500 = arith.divf %498, %499 : vector<8x32xf32>
    %501 = arith.mulf %494, %488 : vector<8x32xf32>
    %502 = arith.addf %484, %501 : vector<8x32xf32>
    %503 = math.tanh %502 : vector<8x32xf32>
    %cst_197 = arith.constant 1.000000e+00 : f32
    %504 = vector.broadcast %cst_197 : f32 to vector<8x32xf32>
    %505 = arith.subf %504, %500 : vector<8x32xf32>
    %506 = arith.mulf %505, %503 : vector<8x32xf32>
    %507 = arith.mulf %500, %477 : vector<8x32xf32>
    %508 = arith.addf %506, %507 : vector<8x32xf32>
    %c56_198 = arith.constant 56 : index
    %c0_199 = arith.constant 0 : index
    %509 = vector.load %arg4[%c56_198, %c0_199] : memref<64x32xf32, #tpu.memory_space<vmem>>, vector<8x32xf32>
    tpu.vector_store %arg4[%c56_198, %c0_199], %508 {strides = array<i32>} : memref<64x32xf32, #tpu.memory_space<vmem>>, vector<8x32xf32>,
    %c0_200 = arith.constant 0 : index
    %c0_201 = arith.constant 0 : index
    %510 = vector.load %arg4[%c0_200, %c0_201] : memref<64x32xf32, #tpu.memory_space<vmem>>, vector<64x32xf32>
    %c384 = arith.constant 384 : index
    %c0_202 = arith.constant 0 : index
    %511 = vector.load %arg1[%c384, %c0_202] : memref<624x32xf32, #tpu.memory_space<vmem>>, vector<32x32xf32>
    %cst_203 = arith.constant dense<0.000000e+00> : vector<64x32xf32>
    %512 = tpu.matmul %510, %511, %cst_203 {dimension_numbers = #tpu.dot_dimension_numbers<[1], [0], [0], [1], [0, 0, 1, 1], [], []>} : vector<64x32xf32>, vector<32x32xf32>, vector<64x32xf32> -> vector<64x32xf32>
    %c616 = arith.constant 616 : index
    %c0_204 = arith.constant 0 : index
    %513 = vector.load %arg1[%c616, %c0_204] : memref<624x32xf32, #tpu.memory_space<vmem>>, vector<1x32xf32>
    %514 = vector.broadcast %513 : vector<1x32xf32> to vector<64x32xf32>
    %515 = arith.addf %512, %514 : vector<64x32xf32>
    %cst_205 = arith.constant 0.000000e+00 : f32
    %516 = vector.broadcast %cst_205 : f32 to vector<64x32xf32>
    %517 = arith.cmpf oge, %515, %516 : vector<64x32xf32>
    %cst_206 = arith.constant 2.500000e-01 : f32
    %518 = vector.broadcast %cst_206 : f32 to vector<64x32xf32>
    %519 = arith.mulf %518, %515 : vector<64x32xf32>
    %520 = arith.select %517, %515, %519 : vector<64x32xi1>, vector<64x32xf32>
    %c416 = arith.constant 416 : index
    %c0_207 = arith.constant 0 : index
    %521 = vector.load %arg1[%c416, %c0_207] : memref<624x32xf32, #tpu.memory_space<vmem>>, vector<32x32xf32>
    %cst_208 = arith.constant dense<0.000000e+00> : vector<64x32xf32>
    %522 = tpu.matmul %520, %521, %cst_208 {dimension_numbers = #tpu.dot_dimension_numbers<[1], [0], [0], [1], [0, 0, 1, 1], [], []>} : vector<64x32xf32>, vector<32x32xf32>, vector<64x32xf32> -> vector<64x32xf32>
    %c617 = arith.constant 617 : index
    %c0_209 = arith.constant 0 : index
    %523 = vector.load %arg1[%c617, %c0_209] : memref<624x32xf32, #tpu.memory_space<vmem>>, vector<1x32xf32>
    %524 = vector.broadcast %523 : vector<1x32xf32> to vector<64x32xf32>
    %525 = arith.addf %522, %524 : vector<64x32xf32>
    %cst_210 = arith.constant 0.000000e+00 : f32
    %526 = vector.broadcast %cst_210 : f32 to vector<64x32xf32>
    %527 = arith.cmpf oge, %525, %526 : vector<64x32xf32>
    %cst_211 = arith.constant 2.500000e-01 : f32
    %528 = vector.broadcast %cst_211 : f32 to vector<64x32xf32>
    %529 = arith.mulf %528, %525 : vector<64x32xf32>
    %530 = arith.select %527, %525, %529 : vector<64x32xi1>, vector<64x32xf32>
    %c448 = arith.constant 448 : index
    %c0_212 = arith.constant 0 : index
    %531 = vector.load %arg1[%c448, %c0_212] : memref<624x32xf32, #tpu.memory_space<vmem>>, vector<32x32xf32>
    %cst_213 = arith.constant dense<0.000000e+00> : vector<64x32xf32>
    %532 = tpu.matmul %530, %531, %cst_213 {dimension_numbers = #tpu.dot_dimension_numbers<[1], [0], [0], [1], [0, 0, 1, 1], [], []>} : vector<64x32xf32>, vector<32x32xf32>, vector<64x32xf32> -> vector<64x32xf32>
    %c618 = arith.constant 618 : index
    %c0_214 = arith.constant 0 : index
    %533 = vector.load %arg1[%c618, %c0_214] : memref<624x32xf32, #tpu.memory_space<vmem>>, vector<1x32xf32>
    %534 = vector.broadcast %533 : vector<1x32xf32> to vector<64x32xf32>
    %535 = arith.addf %532, %534 : vector<64x32xf32>
    %c480 = arith.constant 480 : index
    %c0_215 = arith.constant 0 : index
    %536 = vector.load %arg1[%c480, %c0_215] : memref<624x32xf32, #tpu.memory_space<vmem>>, vector<32x32xf32>
    %cst_216 = arith.constant dense<0.000000e+00> : vector<64x32xf32>
    %537 = tpu.matmul %530, %536, %cst_216 {dimension_numbers = #tpu.dot_dimension_numbers<[1], [0], [0], [1], [0, 0, 1, 1], [], []>} : vector<64x32xf32>, vector<32x32xf32>, vector<64x32xf32> -> vector<64x32xf32>
    %c619 = arith.constant 619 : index
    %c0_217 = arith.constant 0 : index
    %538 = vector.load %arg1[%c619, %c0_217] : memref<624x32xf32, #tpu.memory_space<vmem>>, vector<1x32xf32>
    %539 = vector.broadcast %538 : vector<1x32xf32> to vector<64x32xf32>
    %540 = arith.addf %537, %539 : vector<64x32xf32>
    %cst_218 = arith.constant 5.000000e-01 : f32
    %541 = vector.broadcast %cst_218 : f32 to vector<64x32xf32>
    %542 = arith.mulf %541, %540 : vector<64x32xf32>
    %543 = math.exp %542 : vector<64x32xf32>
    %544 = arith.mulf %1, %543 : vector<64x32xf32>
    %545 = arith.addf %535, %544 : vector<64x32xf32>
    %c512 = arith.constant 512 : index
    %c0_219 = arith.constant 0 : index
    %546 = vector.load %arg1[%c512, %c0_219] : memref<624x32xf32, #tpu.memory_space<vmem>>, vector<32x32xf32>
    %cst_220 = arith.constant dense<0.000000e+00> : vector<64x32xf32>
    %547 = tpu.matmul %545, %546, %cst_220 {dimension_numbers = #tpu.dot_dimension_numbers<[1], [0], [0], [1], [0, 0, 1, 1], [], []>} : vector<64x32xf32>, vector<32x32xf32>, vector<64x32xf32> -> vector<64x32xf32>
    %c620 = arith.constant 620 : index
    %c0_221 = arith.constant 0 : index
    %548 = vector.load %arg1[%c620, %c0_221] : memref<624x32xf32, #tpu.memory_space<vmem>>, vector<1x32xf32>
    %549 = vector.broadcast %548 : vector<1x32xf32> to vector<64x32xf32>
    %550 = arith.addf %547, %549 : vector<64x32xf32>
    %cst_222 = arith.constant 0.000000e+00 : f32
    %551 = vector.broadcast %cst_222 : f32 to vector<64x32xf32>
    %552 = arith.cmpf oge, %550, %551 : vector<64x32xf32>
    %cst_223 = arith.constant 2.500000e-01 : f32
    %553 = vector.broadcast %cst_223 : f32 to vector<64x32xf32>
    %554 = arith.mulf %553, %550 : vector<64x32xf32>
    %555 = arith.select %552, %550, %554 : vector<64x32xi1>, vector<64x32xf32>
    %c544 = arith.constant 544 : index
    %c0_224 = arith.constant 0 : index
    %556 = vector.load %arg1[%c544, %c0_224] : memref<624x32xf32, #tpu.memory_space<vmem>>, vector<32x32xf32>
    %cst_225 = arith.constant dense<0.000000e+00> : vector<64x32xf32>
    %557 = tpu.matmul %555, %556, %cst_225 {dimension_numbers = #tpu.dot_dimension_numbers<[1], [0], [0], [1], [0, 0, 1, 1], [], []>} : vector<64x32xf32>, vector<32x32xf32>, vector<64x32xf32> -> vector<64x32xf32>
    %c621 = arith.constant 621 : index
    %c0_226 = arith.constant 0 : index
    %558 = vector.load %arg1[%c621, %c0_226] : memref<624x32xf32, #tpu.memory_space<vmem>>, vector<1x32xf32>
    %559 = vector.broadcast %558 : vector<1x32xf32> to vector<64x32xf32>
    %560 = arith.addf %557, %559 : vector<64x32xf32>
    %cst_227 = arith.constant 0.000000e+00 : f32
    %561 = vector.broadcast %cst_227 : f32 to vector<64x32xf32>
    %562 = arith.cmpf oge, %560, %561 : vector<64x32xf32>
    %cst_228 = arith.constant 2.500000e-01 : f32
    %563 = vector.broadcast %cst_228 : f32 to vector<64x32xf32>
    %564 = arith.mulf %563, %560 : vector<64x32xf32>
    %565 = arith.select %562, %560, %564 : vector<64x32xi1>, vector<64x32xf32>
    %c576 = arith.constant 576 : index
    %c0_229 = arith.constant 0 : index
    %566 = vector.load %arg1[%c576, %c0_229] : memref<624x32xf32, #tpu.memory_space<vmem>>, vector<32x32xf32>
    %cst_230 = arith.constant dense<0.000000e+00> : vector<64x32xf32>
    %567 = tpu.matmul %565, %566, %cst_230 {dimension_numbers = #tpu.dot_dimension_numbers<[1], [0], [0], [1], [0, 0, 1, 1], [], []>} : vector<64x32xf32>, vector<32x32xf32>, vector<64x32xf32> -> vector<64x32xf32>
    %c622 = arith.constant 622 : index
    %c0_231 = arith.constant 0 : index
    %568 = vector.load %arg1[%c622, %c0_231] : memref<624x32xf32, #tpu.memory_space<vmem>>, vector<1x32xf32>
    %569 = vector.broadcast %568 : vector<1x32xf32> to vector<64x32xf32>
    %570 = arith.addf %567, %569 : vector<64x32xf32>
    %571 = arith.negf %570 : vector<64x32xf32>
    %572 = math.exp %571 : vector<64x32xf32>
    %cst_232 = arith.constant 1.000000e+00 : f32
    %573 = vector.broadcast %cst_232 : f32 to vector<64x32xf32>
    %574 = arith.addf %573, %572 : vector<64x32xf32>
    %575 = arith.divf %573, %574 : vector<64x32xf32>
    %c0_233 = arith.constant 0 : index
    %c0_234 = arith.constant 0 : index
    %576 = vector.load %arg2[%c0_233, %c0_234] : memref<208x32xf32, #tpu.memory_space<vmem>>, vector<64x32xf32>
    tpu.vector_store %arg2[%c0_233, %c0_234], %575 {strides = array<i32>} : memref<208x32xf32, #tpu.memory_space<vmem>>, vector<64x32xf32>,
    %c64_235 = arith.constant 64 : index
    %c0_236 = arith.constant 0 : index
    %577 = vector.load %arg2[%c64_235, %c0_236] : memref<208x32xf32, #tpu.memory_space<vmem>>, vector<64x32xf32>
    tpu.vector_store %arg2[%c64_235, %c0_236], %535 {strides = array<i32>} : memref<208x32xf32, #tpu.memory_space<vmem>>, vector<64x32xf32>,
    %c128_237 = arith.constant 128 : index
    %c0_238 = arith.constant 0 : index
    %578 = vector.load %arg2[%c128_237, %c0_238] : memref<208x32xf32, #tpu.memory_space<vmem>>, vector<64x32xf32>
    tpu.vector_store %arg2[%c128_237, %c0_238], %540 {strides = array<i32>} : memref<208x32xf32, #tpu.memory_space<vmem>>, vector<64x32xf32>,
    %c192_239 = arith.constant 192 : index
    %c0_240 = arith.constant 0 : index
    %579 = vector.load %arg2[%c192_239, %c0_240] : memref<208x32xf32, #tpu.memory_space<vmem>>, vector<8x32xf32>
    tpu.vector_store %arg2[%c192_239, %c0_240], %447 {strides = array<i32>} : memref<208x32xf32, #tpu.memory_space<vmem>>, vector<8x32xf32>,
    %c200 = arith.constant 200 : index
    %c0_241 = arith.constant 0 : index
    %580 = vector.load %arg2[%c200, %c0_241] : memref<208x32xf32, #tpu.memory_space<vmem>>, vector<8x32xf32>
    tpu.vector_store %arg2[%c200, %c0_241], %508 {strides = array<i32>} : memref<208x32xf32, #tpu.memory_space<vmem>>, vector<8x32xf32>,
    return
  }
}

</mosaic_0001>

<bundles_post_ra>
// kernel: omni_anomaly_forward.1
= control target key start
LH: loop header
LB: loop body
LE: loop exit
PB: predicated region body
PF: predicated region fallthrough
CT: control target
= control target key end

     0   :  { %vm33_vm0 = vcmask 261120   ;;  %v3798_v24 = vmov 0.0   ;;  %s5297_s1 = inlined_call_operand.vmem [shape: f32[624,32], index: 1, kind: input, shape index: {}]   ;;  %s5298_s0 = inlined_call_operand.vmem [shape: f32[128,32], index: 0, kind: input, shape index: {}]   ;;  %s5299_s2 = inlined_call_operand.vmem [shape: f32[208,32], index: 2, kind: output, shape index: {}]  }
   0x1   :  { %v30_v0 = vld [vmem:[%s5297_s1 + $0x18] sm:$0xff]  ;;  %v29_v1 = vld [vmem:[%s5297_s1 + $0x10] sm:$0xff]  ;;  %v28_v3 = vld [vmem:[%s5297_s1 + $0x8] sm:$0xff] }
   0x2   :  { %3520 = vmatpush.msra.mxu3 %v30_v0  ;;  %v110_v2 = vld [vmem:[%s5297_s1 + $0x38] sm:$0xff]  ;;  %70 = vmatpush.msra.mxu0 %v30_v0  ;;  %v27_v4 = vld [vmem:[%s5297_s1] sm:$0xff]  ;;  %v17_v5 = vld [vmem:[%s5298_s0 + $0x30] sm:$0xff] }
   0x3   :  { %125 = vmatpush.msra.mxu1 %v110_v2  ;;  %v109_v6 = vld [vmem:[%s5297_s1 + $0x30] sm:$0xff]  ;;  %v165_v7 = vld [vmem:[%s5297_s1 + $0x58] sm:$0xff]  ;;  %v108_v8 = vld [vmem:[%s5297_s1 + $0x28] sm:$0xff] }
   0x4   :  { %3521 = vmatpush.msra.mxu3 %v29_v1  ;;  %71 = vmatpush.msra.mxu0 %v29_v1  ;;  %v164_v9 = vld [vmem:[%s5297_s1 + $0x50] sm:$0xff]  ;;  %v107_v10 = vld [vmem:[%s5297_s1 + $0x20] sm:$0xff]  ;;  %v163_v11 = vld [vmem:[%s5297_s1 + $0x48] sm:$0xff] }
   0x5   :  { %126 = vmatpush.msra.mxu1 %v109_v6  ;;  %180 = vmatpush.msra.mxu2 %v165_v7  ;;  %v162_v12 = vld [vmem:[%s5297_s1 + $0x40] sm:$0xff]  ;;  %v18_v13 = vld [vmem:[%s5298_s0 + $0x38] sm:$0xff]  ;;  %v3873_v16 = vld [vmem:[%s5297_s1 + $0x70] sm:$0xff] }
   0x6   :  { %3522 = vmatpush.msra.mxu3 %v28_v3  ;;  %72 = vmatpush.msra.mxu0 %v28_v3  ;;  %v11_v14 = vld [vmem:[%s5298_s0] sm:$0xff]  ;;  %v3867_v15 = vld [vmem:[%s5297_s1 + $0x78] sm:$0xff]  ;;  %v3879_v17 = vld [vmem:[%s5297_s1 + $0x68] sm:$0xff] }
   0x7   :  { %127 = vmatpush.msra.mxu1 %v108_v8  ;;  %181 = vmatpush.msra.mxu2 %v164_v9  ;;  %v3885_v18 = vld [vmem:[%s5297_s1 + $0x60] sm:$0xff]  ;;  %v3893_v19 = vld [vmem:[%s5297_s1 + $0x98] sm:$0xff]  ;;  %v3899_v20 = vld [vmem:[%s5297_s1 + $0x90] sm:$0xff] }
   0x8   :  { %3523 = vmatpush.msra.mxu3 %v27_v4  ;;  %73 = vmatpush.msra.mxu0 %v27_v4  ;;  %v3905_v21 = vld [vmem:[%s5297_s1 + $0x88] sm:$0xff]  ;;  %v3911_v22 = vld [vmem:[%s5297_s1 + $0x80] sm:$0xff]  ;;  %v3919_v23 = vld [vmem:[%s5297_s1 + $0xb8] sm:$0xff] }
   0x9   :  { %3340 = vmatmul.msk.f32.vlgmr.msra.gmra.mxu3 %vm33_vm0, %v17_v5  ;;  %128 = vmatpush.msra.mxu1 %v107_v10  ;;  %v3925_v25 = vld [vmem:[%s5297_s1 + $0xb0] sm:$0xff]  ;;  %v3931_v26 = vld [vmem:[%s5297_s1 + $0xa8] sm:$0xff]  ;;  %v3937_v27 = vld [vmem:[%s5297_s1 + $0xa0] sm:$0xff] }
   0xa   :  { %3524 = vmatpush.msrb.mxu3 %v110_v2  ;;  %182 = vmatpush.msra.mxu2 %v163_v11  ;;  %v3954_v28 = vld [vmem:[%s5297_s1 + $0x260] ss:$0 sm:$0xff]  ;;  %v3964_v35 = vld [vmem:[%s5297_s1 + $0x261] ss:$0 sm:$0xff]  ;;  %v12_v40 = vld [vmem:[%s5298_s0 + $0x8] sm:$0xff] }
   0xb   :  { %3334 = vmatmul.msk.f32.vlgmr.msra.gmra.mxu0 %vm33_vm0, %v11_v14  ;;  %3342 = vmatmul.msk.f32.vlgmr.msra.gmra.mxu1 %vm33_vm0, %v11_v14  ;;  %v3982_v43 = vld [vmem:[%s5297_s1 + $0x262] ss:$0 sm:$0xff]  ;;  %v13_v44 = vld [vmem:[%s5298_s0 + $0x10] sm:$0xff]  ;;  %v14_v47 = vld [vmem:[%s5298_s0 + $0x18] sm:$0xff] }
   0xc   :  { %3525 = vmatpush.msrb.mxu3 %v109_v6  ;;  %183 = vmatpush.msra.mxu2 %v162_v12  ;;  %v15_v52 = vld [vmem:[%s5298_s0 + $0x20] sm:$0xff]  ;;  %v16_v57 = vld [vmem:[%s5298_s0 + $0x28] sm:$0xff]  ;;  %v4015_v59 = vld [vmem:[%s5297_s1 + $0x118] sm:$0xff] }
   0xd   :  { %3350 = vmatmul.msk.f32.vlgmr.msra.gmra.mxu2 %vm33_vm0, %v11_v14  ;;  %541 = vmatpush.msrb.mxu0 %v4015_v59  ;;  %v4023_v61 = vld [vmem:[%s5297_s1 + $0x110] sm:$0xff]  ;;  %v4029_v63 = vld [vmem:[%s5297_s1 + $0x108] sm:$0xff]  ;;  %v4035_v3 = vld [vmem:[%s5297_s1 + $0x138] sm:$0xff] }
   0xe   :  { %3526 = vmatpush.msrb.mxu3 %v108_v8  ;;  %v4040_v4 = vld [vmem:[%s5297_s1 + $0x158] sm:$0xff]  ;;  %561 = vmatpush.msrb.mxu1 %v4035_v3  ;;  %v4052_v6 = vld [vmem:[%s5297_s1 + $0x100] sm:$0xff] }
   0xf   :  { %542 = vmatpush.msrb.mxu0 %v4023_v61  ;;  %581 = vmatpush.msrb.mxu2 %v4040_v4  ;;  %v4079_v14 = vld [vmem:[%s5297_s1 + $0x263] ss:$0 sm:$0xff] }
  0x10   :  { %3527 = vmatpush.msrb.mxu3 %v107_v10 }
  0x11   :  { %3341 = vmatmul.msk.f32.gmra.mxu3 %vm33_vm0, %v18_v13  ;;  %543 = vmatpush.msrb.mxu0 %v4029_v63 }
  0x12   :  { %3528 = vmatpush.msra.mxu3 %v165_v7  ;;  %v4057_v7 = vld [vmem:[%s5297_s1 + $0x150] sm:$0xff] }
  0x13   :  { %3335 = vmatmul.msk.f32.gmra.mxu0 %vm33_vm0, %v12_v40  ;;  %3343 = vmatmul.msk.f32.gmra.mxu1 %vm33_vm0, %v12_v40 }
  0x14   :  { %3529 = vmatpush.msra.mxu3 %v164_v9  ;;  %544 = vmatpush.msrb.mxu0 %v4052_v6 }
  0x15   :  { %3351 = vmatmul.msk.f32.gmra.mxu2 %vm33_vm0, %v12_v40 }
  0x16   :  { %3530 = vmatpush.msra.mxu3 %v163_v11  ;;  %582 = vmatpush.msrb.mxu2 %v4057_v7 }
  0x17   :  { %675 = vmatpush.msra.mxu0 %v3867_v15 }
  0x18   :  { %3531 = vmatpush.msra.mxu3 %v162_v12  ;;  %v4068_v12 = vld [vmem:[%s5297_s1 + $0x128] sm:$0xff] }
  0x19   :  { %3348 = vmatmul.msk.f32.vlgmr.msrb.gmra.mxu3 %vm33_vm0, %v17_v5  ;;  %676 = vmatpush.msra.mxu0 %v3873_v16 }
  0x1a   :  { %281 = vmatpush.msrb.mxu3 %v3867_v15 }
  0x1b   :  { %3336 = vmatmul.msk.f32.gmra.mxu0 %vm33_vm0, %v13_v44  ;;  %3344 = vmatmul.msk.f32.gmra.mxu1 %vm33_vm0, %v13_v44 }
  0x1c   :  { %282 = vmatpush.msrb.mxu3 %v3873_v16  ;;  %677 = vmatpush.msra.mxu0 %v3879_v17 }
  0x1d   :  { %3352 = vmatmul.msk.f32.gmra.mxu2 %vm33_vm0, %v13_v44 }
  0x1e   :  { %283 = vmatpush.msrb.mxu3 %v3879_v17  ;;  %678 = vmatpush.msra.mxu0 %v3885_v18 }
  0x20   :  { %284 = vmatpush.msrb.mxu3 %v3885_v18 }
  0x21   :  { %3349 = vmatmul.msk.f32.gmra.mxu3 %vm33_vm0, %v18_v13 }
  0x23   :  { %3337 = vmatmul.msk.f32.gmra.mxu0 %vm33_vm0, %v14_v47  ;;  %3345 = vmatmul.msk.f32.gmra.mxu1 %vm33_vm0, %v14_v47 }
  0x25   :  { %3353 = vmatmul.msk.f32.gmra.mxu2 %vm33_vm0, %v14_v47 }
  0x29   :  { %3356 = vmatmul.msk.f32.vlgmr.msra.gmra.mxu3 %vm33_vm0, %v17_v5  ;;  %v4045_v5 = vld [vmem:[%s5297_s1 + $0x130] sm:$0xff] }
  0x2a   :  { %301 = vmatpush.msra.mxu3 %v3893_v19  ;;  %562 = vmatpush.msrb.mxu1 %v4045_v5 }
  0x2b   :  { %3338 = vmatmul.msk.f32.gmra.mxu0 %vm33_vm0, %v15_v52  ;;  %3346 = vmatmul.msk.f32.gmra.mxu1 %vm33_vm0, %v15_v52 }
  0x2c   :  { %302 = vmatpush.msra.mxu3 %v3899_v20  ;;  %563 = vmatpush.msrb.mxu1 %v4068_v12 }
  0x2d   :  { %3354 = vmatmul.msk.f32.gmra.mxu2 %vm33_vm0, %v15_v52 }
  0x2e   :  { %303 = vmatpush.msra.mxu3 %v3905_v21 }
  0x30   :  { %304 = vmatpush.msra.mxu3 %v3911_v22 }
  0x31   :  { %3357 = vmatmul.msk.f32.gmra.mxu3 %vm33_vm0, %v18_v13  ;;  %v4073_v13 = vld [vmem:[%s5297_s1 + $0x148] sm:$0xff] }
  0x32   :  { %583 = vmatpush.msrb.mxu2 %v4073_v13 }
  0x33   :  { %3339 = vmatmul.msk.f32.gmra.mxu0 %vm33_vm0, %v16_v57  ;;  %3347 = vmatmul.msk.f32.gmra.mxu1 %vm33_vm0, %v16_v57 }
  0x35   :  { %3355 = vmatmul.msk.f32.gmra.mxu2 %vm33_vm0, %v16_v57 }
  0x39   :  { %285 = vmatmul.f32.vlgmr.msrb.gmra.mxu3 %v3798_v24 }
  0x3a   :  { %321 = vmatpush.msrb.mxu3 %v3919_v23 }
  0x3c   :  { %322 = vmatpush.msrb.mxu3 %v3925_v25 }
  0x3e   :  { %323 = vmatpush.msrb.mxu3 %v3931_v26 }
  0x40   :  { %324 = vmatpush.msrb.mxu3 %v3937_v27 }
  0x41   :  { %305 = vmatmul.f32.vlgmr.msra.gmra.mxu3 %v3798_v24 }
  0x42   :  { %394 = vmatpush.msra.mxu3 %v3867_v15 }
  0x44   :  { %395 = vmatpush.msra.mxu3 %v3873_v16 }
  0x46   :  { %396 = vmatpush.msra.mxu3 %v3879_v17 }
  0x48   :  { %397 = vmatpush.msra.mxu3 %v3885_v18 }
  0x49   :  { %325 = vmatmul.f32.vlgmr.msrb.gmra.mxu3 %v3798_v24 }
  0x4a   :  { %414 = vmatpush.msrb.mxu3 %v3893_v19 }
  0x4c   :  { %415 = vmatpush.msrb.mxu3 %v3899_v20 }
  0x4e   :  { %416 = vmatpush.msrb.mxu3 %v3905_v21 }
  0x50   :  { %417 = vmatpush.msrb.mxu3 %v3911_v22 }
  0x88   :  { %v75_v31 = vpop.f32.mrf.mxu0  ;;  %v130_v36 = vpop.f32.mrf.mxu1 }
  0x89   :  { %v76_v32 = vadd.f32 %v3954_v28, %v75_v31  ;;  %v131_v37 = vadd.f32 %v3964_v35, %v130_v36 }
  0x8b   :  { %99 = vst.msk [vmem:[#allocation2] sm:$0xff] %vm33_vm0, %v76_v32 }
  0x8c   :  { %v93_v29 = vpop.f32.mrf.mxu3  ;;  %154 = vst.msk [vmem:[#allocation2 + $0x40] sm:$0xff] %vm33_vm0, %v131_v37 }
  0x8d   :  { %v94_v30 = vadd.f32 %v3954_v28, %v93_v29 }
  0x8f   :  { %105 = vst.msk [vmem:[#allocation2 + $0x30] sm:$0xff] %vm33_vm0, %v94_v30 }
  0x90   :  { %v185_v48 = vpop.f32.mrf.mxu2 }
  0x91   :  { %v186_v49 = vadd.f32 %v3982_v43, %v185_v48  ;;  %v4093_v48 = vld [vmem:[%s5297_s1 + $0x140] sm:$0xff] }
  0x92   :  { %v263_v53 = vld [vmem:[#allocation2] sm:$0xff]  ;;  %584 = vmatpush.msrb.mxu2 %v4093_v48 }
  0x93   :  { %209 = vst.msk [vmem:[#allocation2 + $0x80] sm:$0xff] %vm33_vm0, %v186_v49  ;;  %v264_v58 = vld [vmem:[#allocation2 + $0x40] sm:$0xff]  ;;  %585 = vmatmul.f32.vlgmr.msrb.gmra.mxu2 %v3798_v24 }
  0x94   :  { %v96_v33 = vpop.f32.mrf.mxu3  ;;  %715 = vmatpush.msra.mxu2 %v3919_v23 }
  0x95   :  { %v97_v34 = vadd.f32 %v3954_v28, %v96_v33 }
  0x96   :  { %716 = vmatpush.msra.mxu2 %v3925_v25 }
  0x97   :  { %106 = vst.msk [vmem:[#allocation2 + $0x38] sm:$0xff] %vm33_vm0, %v97_v34 }
  0x98   :  { %717 = vmatpush.msra.mxu2 %v3931_v26 }
  0x9a   :  { %718 = vmatpush.msra.mxu2 %v3937_v27 }
  0x9c   :  { %v148_v38 = vpop.f32.mrf.mxu3  ;;  %845 = vmatpush.msrb.mxu2 %v4035_v3 }
  0x9d   :  { %v149_v39 = vadd.f32 %v3964_v35, %v148_v38 }
  0x9e   :  { %846 = vmatpush.msrb.mxu2 %v4045_v5 }
  0x9f   :  { %160 = vst.msk [vmem:[#allocation2 + $0x70] sm:$0xff] %vm33_vm0, %v149_v39 }
  0xa0   :  { %847 = vmatpush.msrb.mxu2 %v4068_v12 }
  0xa4   :  { %v151_v41 = vpop.f32.mrf.mxu3 }
  0xa5   :  { %v152_v42 = vadd.f32 %v3964_v35, %v151_v41  ;;  %v265_v41 = vld [vmem:[#allocation2 + $0x80] sm:$0xff] }
  0xa7   :  { %161 = vst.msk [vmem:[#allocation2 + $0x78] sm:$0xff] %vm33_vm0, %v152_v42 }
  0xac   :  { %v203_v45 = vpop.f32.mrf.mxu3 }
  0xad   :  { %v204_v46 = vadd.f32 %v3982_v43, %v203_v45 }
  0xaf   :  { %215 = vst.msk [vmem:[#allocation2 + $0xb0] sm:$0xff] %vm33_vm0, %v204_v46  ;;  %v4087_v46 = vld [vmem:[%s5297_s1 + $0x120] sm:$0xff] }
  0xb0   :  { %564 = vmatpush.msrb.mxu1 %v4087_v46  ;;  %848 = vmatpush.msrb.mxu2 %v4087_v46 }
  0xb1   :  { %565 = vmatmul.f32.vlgmr.msrb.gmra.mxu1 %v3798_v24 }
  0xb2   :  { %695 = vmatpush.msra.mxu1 %v3893_v19 }
  0xb4   :  { %v206_v50 = vpop.f32.mrf.mxu3  ;;  %696 = vmatpush.msra.mxu1 %v3899_v20 }
  0xb5   :  { %v207_v51 = vadd.f32 %v3982_v43, %v206_v50 }
  0xb6   :  { %697 = vmatpush.msra.mxu1 %v3905_v21 }
  0xb7   :  { %216 = vst.msk [vmem:[#allocation2 + $0xb8] sm:$0xff] %vm33_vm0, %v207_v51 }
  0xb8   :  { %698 = vmatpush.msra.mxu1 %v3911_v22 }
  0xba   :  { %822 = vmatpush.msrb.mxu1 %v4015_v59 }
  0xbc   :  { %v286_v54 = vpop.f32.mrf.mxu3  ;;  %823 = vmatpush.msrb.mxu1 %v4023_v61 }
  0xbd   :  { %v329_v55 = vadd.f32 %v286_v54, %v263_v53 }
  0xbe   :  { %824 = vmatpush.msrb.mxu1 %v4029_v63 }
  0xbf   :  { %v3358_v56 = vmul.f32 -1.442695, %v329_v55 }
  0xc0   :  { %825 = vmatpush.msrb.mxu1 %v4052_v6 }
  0xc1   :  { %3548 = vpow2.f32 %v3358_v56 }
  0xc4   :  { %v306_v60 = vpop.f32.mrf.mxu3 }
  0xc5   :  { %v349_v62 = vadd.f32 %v306_v60, %v264_v58 }
  0xc7   :  { %v3549_v0 = vpop.eup %3548  ;;  %v3359_v1 = vmul.f32 -1.442695, %v349_v62 }
  0xc8   :  { %v333_v2 = vadd.f32 1.0, %v3549_v0  ;;  %v4120_v0 = vld [vmem:[%s5297_s1 + $0xf8] sm:$0xff] }
  0xc9   :  { %3550 = vpow2.f32 %v3359_v1  ;;  %v4127_v1 = vld [vmem:[%s5297_s1 + $0xf0] sm:$0xff] }
  0xca   :  { %3552 = vrcp.f32 %v333_v2  ;;  %v345_v31 = vand.u32 2147483648, %v333_v2  ;;  %v343_v33 = vand.u32 2147483647, %v333_v2  ;;  %vm339_vm2 = vweird.f32 %v333_v2 }
  0xcc   :  { %v326_v30 = vpop.f32.mrf.mxu3  ;;  %v346_v38 = vor.u32 1.1754944e-38, %v345_v31  ;;  %vm344_vm4 = vcmp.eq.f32.partialorder %v343_v33, 8.507059e+37  ;;  %v4190_v31 = vld [vmem:[%s5297_s1 + $0x170] sm:$0xff]  ;;  %v4202_v33 = vld [vmem:[%s5297_s1 + $0x160] sm:$0xff] }
  0xcd   :  { %v327_v34 = vadd.f32 %v4079_v14, %v326_v30  ;;  %v4182_v30 = vld [vmem:[%s5297_s1 + $0x178] sm:$0xff] }
  0xcf   :  { %v3551_v8 = vpop.eup %3550 }
  0xd0   :  { %v3553_v9 = vpop.eup %3552  ;;  %v353_v10 = vadd.f32 1.0, %v3551_v8  ;;  %v4144_v8 = vld [vmem:[%s5297_s1 + $0xd8] sm:$0xff] }
  0xd1   :  { %v335_v11 = vmul.f32 %v3553_v9, %v333_v2  ;;  %vm340_vm1 = vweird.f32 %v3553_v9  ;;  %v4136_v2 = vld [vmem:[%s5297_s1 + $0xe8] sm:$0xff] }
  0xd2   :  { %3554 = vrcp.f32 %v353_v10  ;;  %vm341_vm3 = vmor %vm339_vm2, %vm340_vm1  ;;  %v365_v47 = vand.u32 2147483648, %v353_v10  ;;  %v363_v50 = vand.u32 2147483647, %v353_v10  ;;  %vm359_vm6 = vweird.f32 %v353_v10 }
  0xd3   :  { %v336_v29 = vsub.f32 1.0, %v335_v11  ;;  %v4164_v11 = vld [vmem:[%s5297_s1 + $0xc8] sm:$0xff] }
  0xd4   :  { %v366_v53 = vor.u32 1.1754944e-38, %v365_v47  ;;  %vm364_vm8 = vcmp.eq.f32.partialorder %v363_v50, 8.507059e+37 }
  0xd5   :  { %v337_v32 = vmul.f32 %v3553_v9, %v336_v29  ;;  %v4170_v29 = vld [vmem:[%s5297_s1 + $0xc0] sm:$0xff] }
  0xd7   :  { %v338_v36 = vadd.f32 %v3553_v9, %v337_v32  ;;  %v4196_v32 = vld [vmem:[%s5297_s1 + $0x168] sm:$0xff] }
  0xd8   :  { %v3555_v37 = vpop.eup %3554 }
  0xd9   :  { %v355_v39 = vmul.f32 %v3555_v37, %v353_v10  ;;  %v342_v40 = vsel %vm341_vm3, %v3553_v9, %v338_v36  ;;  %vm360_vm5 = vweird.f32 %v3555_v37  ;;  %v4149_v9 = vld [vmem:[%s5297_s1 + $0xe0] sm:$0xff]  ;;  %v4158_v10 = vld [vmem:[%s5297_s1 + $0xd0] sm:$0xff] }
  0xda   :  { %v347_v42 = vsel %vm344_vm4, %v346_v38, %v342_v40  ;;  %vm361_vm7 = vmor %vm359_vm6, %vm360_vm5 }
  0xdb   :  { %v356_v44 = vsub.f32 1.0, %v355_v39  ;;  %v369_v45 = vmul.f32 %v347_v42, %v327_v34  ;;  %v78_v34 = vpop.f32.mrf.mxu0  ;;  %v188_v39 = vpop.f32.mrf.mxu2 }
  0xdc   :  { %v79_v36 = vadd.f32 %v3954_v28, %v78_v34  ;;  %v189_v40 = vadd.f32 %v3982_v43, %v188_v39 }
  0xdd   :  { %v357_v49 = vmul.f32 %v3555_v37, %v356_v44  ;;  %v370_v51 = vadd.f32 %v369_v45, %v265_v41 }
  0xde   :  { %100 = vst.msk [vmem:[#allocation2 + $0x8] sm:$0xff] %vm33_vm0, %v79_v36 }
  0xdf   :  { %v358_v52 = vadd.f32 %v3555_v37, %v357_v49  ;;  %3556 = vtanh.f32 %v370_v51  ;;  %210 = vst.msk [vmem:[#allocation2 + $0x88] sm:$0xff] %vm33_vm0, %v189_v40 }
  0xe1   :  { %v362_v54 = vsel %vm361_vm7, %v3555_v37, %v358_v52  ;;  %v133_v37 = vpop.f32.mrf.mxu1 }
  0xe2   :  { %v367_v55 = vsel %vm364_vm8, %v366_v53, %v362_v54  ;;  %v134_v38 = vadd.f32 %v3964_v35, %v133_v37 }
  0xe3   :  { %v372_v56 = vsub.f32 1.0, %v367_v55  ;;  %v374_v60 = vmul.f32 0.0, %v367_v55  ;;  %v191_v54 = vpop.f32.mrf.mxu2 }
  0xe4   :  { %155 = vst.msk [vmem:[#allocation2 + $0x48] sm:$0xff] %vm33_vm0, %v134_v38 }
  0xe5   :  { %v3557_v57 = vpop.eup %3556  ;;  %v376_v40 = vld [vmem:[#allocation2 + $0x8] sm:$0xff] }
  0xe6   :  { %v373_v58 = vmul.f32 %v3557_v57, %v372_v56  ;;  %v192_v56 = vadd.f32 %v3982_v43, %v191_v54 }
  0xe8   :  { %v4109_v62 = vadd.f32 %v374_v60, %v373_v58  ;;  %211 = vst.msk [vmem:[#allocation2 + $0x90] sm:$0xff] %vm33_vm0, %v192_v56  ;;  %v4250_v56 = vld [vmem:[%s5297_s1 + $0x264] ss:$0 sm:$0xff] }
  0xe9   :  { %v136_v42 = vpop.f32.mrf.mxu1 }
  0xea   :  { %3360 = vmatmul.msk.f32.vlgmr.msra.gmra.mxu3 %vm33_vm0, %v4109_v62  ;;  %3367 = vmatmul.msk.f32.vlgmr.msrb.gmra.mxu0 %vm33_vm0, %v4109_v62  ;;  %v137_v44 = vadd.f32 %v3964_v35, %v136_v42 }
  0xeb   :  { %434 = vmatpush.msra.mxu3 %v3919_v23  ;;  %802 = vmatpush.msrb.mxu0 %v4120_v0  ;;  %v194_v58 = vpop.f32.mrf.mxu2 }
  0xec   :  { %156 = vst.msk [vmem:[#allocation2 + $0x50] sm:$0xff] %vm33_vm0, %v137_v44  ;;  %v195_v34 = vadd.f32 %v3982_v43, %v194_v58 }
  0xed   :  { %435 = vmatpush.msra.mxu3 %v3925_v25  ;;  %803 = vmatpush.msrb.mxu0 %v4127_v1 }
  0xee   :  { %212 = vst.msk [vmem:[#allocation2 + $0x98] sm:$0xff] %vm33_vm0, %v195_v34 }
  0xef   :  { %436 = vmatpush.msra.mxu3 %v3931_v26  ;;  %804 = vmatpush.msrb.mxu0 %v4136_v2 }
  0xf1   :  { %437 = vmatpush.msra.mxu3 %v3937_v27  ;;  %805 = vmatpush.msrb.mxu0 %v4149_v9  ;;  %v139_v53 = vpop.f32.mrf.mxu1 }
  0xf2   :  { %3361 = vmatmul.msk.f32.vlgmr.msrb.gmra.mxu3 %vm33_vm0, %v4109_v62  ;;  %v140_v55 = vadd.f32 %v3964_v35, %v139_v53 }
  0xf3   :  { %501 = vmatpush.msrb.mxu3 %v4144_v8  ;;  %v197_v36 = vpop.f32.mrf.mxu2 }
  0xf4   :  { %157 = vst.msk [vmem:[#allocation2 + $0x58] sm:$0xff] %vm33_vm0, %v140_v55  ;;  %v198_v38 = vadd.f32 %v3982_v43, %v197_v36 }
  0xf5   :  { %502 = vmatpush.msrb.mxu3 %v4158_v10 }
  0xf6   :  { %213 = vst.msk [vmem:[#allocation2 + $0xa0] sm:$0xff] %vm33_vm0, %v198_v38 }
  0xf7   :  { %503 = vmatpush.msrb.mxu3 %v4164_v11 }
  0xf9   :  { %504 = vmatpush.msrb.mxu3 %v4170_v29  ;;  %v142_v57 = vpop.f32.mrf.mxu1 }
  0xfa   :  { %3362 = vmatmul.msk.f32.vlgmr.msra.gmra.mxu3 %vm33_vm0, %v4109_v62  ;;  %v143_v60 = vadd.f32 %v3964_v35, %v142_v57 }
  0xfb   :  { %521 = vmatpush.msra.mxu3 %v4120_v0  ;;  %v200_v39 = vpop.f32.mrf.mxu2 }
  0xfc   :  { %158 = vst.msk [vmem:[#allocation2 + $0x60] sm:$0xff] %vm33_vm0, %v143_v60 }
  0xfd   :  { %522 = vmatpush.msra.mxu3 %v4127_v1 }
  0xff   :  { %523 = vmatpush.msra.mxu3 %v4136_v2 }
 0x101   :  { %524 = vmatpush.msra.mxu3 %v4149_v9 }
 0x102   :  { %3365 = vmatmul.msk.f32.vlgmr.msrb.gmra.mxu3 %vm33_vm0, %v4109_v62 }
 0x103   :  { %601 = vmatpush.msrb.mxu3 %v4182_v30 }
 0x105   :  { %602 = vmatpush.msrb.mxu3 %v4190_v31 }
 0x107   :  { %603 = vmatpush.msrb.mxu3 %v4196_v32 }
 0x109   :  { %604 = vmatpush.msrb.mxu3 %v4202_v33 }
 0x10a   :  { %3366 = vmatmul.msk.f32.vlgmr.msra.gmra.mxu3 %vm33_vm0, %v4109_v62 }
 0x10b   :  { %782 = vmatpush.msra.mxu3 %v4144_v8 }
 0x10d   :  { %783 = vmatpush.msra.mxu3 %v4158_v10 }
 0x10f   :  { %784 = vmatpush.msra.mxu3 %v4164_v11 }
 0x111   :  { %785 = vmatpush.msra.mxu3 %v4170_v29 }
 0x112   :  { %605 = vmatmul.f32.vlgmr.msrb.gmra.mxu3 %v3798_v24  ;;  %v81_v24 = vpop.f32.mrf.mxu0 }
 0x113   :  { %865 = vmatpush.msrb.mxu3 %v4040_v4  ;;  %v82_v41 = vadd.f32 %v3954_v28, %v81_v24  ;;  %v201_v24 = vadd.f32 %v3982_v43, %v200_v39 }
 0x115   :  { %866 = vmatpush.msrb.mxu3 %v4057_v7  ;;  %101 = vst.msk [vmem:[#allocation2 + $0x10] sm:$0xff] %vm33_vm0, %v82_v41 }
 0x116   :  { %214 = vst.msk [vmem:[#allocation2 + $0xa8] sm:$0xff] %vm33_vm0, %v201_v24 }
 0x117   :  { %867 = vmatpush.msrb.mxu3 %v4073_v13 }
 0x119   :  { %868 = vmatpush.msrb.mxu3 %v4093_v48 }
 0x11a   :  { %v84_v45 = vpop.f32.mrf.mxu0 }
 0x11b   :  { %v85_v47 = vadd.f32 %v3954_v28, %v84_v45  ;;  %v377_v45 = vld [vmem:[#allocation2 + $0x48] sm:$0xff] }
 0x11d   :  { %102 = vst.msk [vmem:[#allocation2 + $0x18] sm:$0xff] %vm33_vm0, %v85_v47 }
 0x122   :  { %v87_v49 = vpop.f32.mrf.mxu0 }
 0x123   :  { %v88_v50 = vadd.f32 %v3954_v28, %v87_v49 }
 0x125   :  { %103 = vst.msk [vmem:[#allocation2 + $0x20] sm:$0xff] %vm33_vm0, %v88_v50 }
 0x12a   :  { %v90_v51 = vpop.f32.mrf.mxu0 }
 0x12b   :  { %v91_v52 = vadd.f32 %v3954_v28, %v90_v51  ;;  %v145_v28 = vpop.f32.mrf.mxu1 }
 0x12c   :  { %v146_v37 = vadd.f32 %v3964_v35, %v145_v28 }
 0x12d   :  { %104 = vst.msk [vmem:[#allocation2 + $0x28] sm:$0xff] %vm33_vm0, %v91_v52 }
 0x12e   :  { %159 = vst.msk [vmem:[#allocation2 + $0x68] sm:$0xff] %vm33_vm0, %v146_v37 }
 0x133   :  { %v566_v28 = vpop.f32.mrf.mxu1 }
 0x16d   :  { %v399_v41 = vpop.f32.mrf.mxu3 }
 0x16e   :  { %v442_v42 = vadd.f32 %v399_v41, %v376_v40 }
 0x170   :  { %v3363_v44 = vmul.f32 -1.442695, %v442_v42 }
 0x172   :  { %3558 = vpow2.f32 %v3363_v44 }
 0x175   :  { %v419_v47 = vpop.f32.mrf.mxu3 }
 0x176   :  { %v462_v49 = vadd.f32 %v419_v47, %v377_v45  ;;  %v4257_v47 = vld [vmem:[%s5297_s1 + $0x265] ss:$0 sm:$0xff] }
 0x178   :  { %v3559_v35 = vpop.eup %3558  ;;  %v3364_v50 = vmul.f32 -1.442695, %v462_v49 }
 0x179   :  { %v446_v51 = vadd.f32 1.0, %v3559_v35 }
 0x17a   :  { %3560 = vpow2.f32 %v3364_v50 }
 0x17b   :  { %3562 = vrcp.f32 %v446_v51  ;;  %v456_v58 = vand.u32 2147483647, %v446_v51  ;;  %v458_v60 = vand.u32 2147483648, %v446_v51  ;;  %vm452_vm10 = vweird.f32 %v446_v51 }
 0x17d   :  { %v439_v52 = vpop.f32.mrf.mxu3  ;;  %vm457_vm12 = vcmp.eq.f32.partialorder %v456_v58, 8.507059e+37  ;;  %v459_v40 = vor.u32 1.1754944e-38, %v458_v60  ;;  %v586_v58 = vpop.f32.mrf.mxu2 }
 0x17e   :  { %v440_v42 = vadd.f32 %v4079_v14, %v439_v52 }
 0x180   :  { %v3561_v53 = vpop.eup %3560 }
 0x181   :  { %v3563_v54 = vpop.eup %3562  ;;  %v466_v55 = vadd.f32 1.0, %v3561_v53 }
 0x182   :  { %v448_v43 = vmul.f32 %v3563_v54, %v446_v51  ;;  %vm453_vm9 = vweird.f32 %v3563_v54 }
 0x183   :  { %3564 = vrcp.f32 %v466_v55  ;;  %vm454_vm11 = vmor %vm452_vm10, %vm453_vm9  ;;  %v476_v51 = vand.u32 2147483647, %v466_v55  ;;  %v478_v53 = vand.u32 2147483648, %v466_v55  ;;  %vm472_vm14 = vweird.f32 %v466_v55 }
 0x184   :  { %v449_v57 = vsub.f32 1.0, %v448_v43  ;;  %v378_v43 = vld [vmem:[#allocation2 + $0x88] sm:$0xff] }
 0x185   :  { %v506_v34 = vpop.f32.mrf.mxu3  ;;  %vm477_vm1 = vcmp.eq.f32.partialorder %v476_v51, 8.507059e+37 }
 0x186   :  { %v450_v36 = vmul.f32 %v3563_v54, %v449_v57  ;;  %v507_v37 = vadd.f32 %v4250_v56, %v506_v34 }
 0x188   :  { %v451_v38 = vadd.f32 %v3563_v54, %v450_v36  ;;  %v609_v39 = vadd.f32 %v566_v28, %v507_v37  ;;  %v479_v36 = vor.u32 1.1754944e-38, %v478_v53 }
 0x189   :  { %v3565_v24 = vpop.eup %3564 }
 0x18a   :  { %v468_v41 = vmul.f32 %v3565_v24, %v466_v55  ;;  %v455_v44 = vsel %vm454_vm11, %v3563_v54, %v451_v38  ;;  %v3368_v45 = vmul.f32 -1.442695, %v609_v39  ;;  %vm473_vm13 = vweird.f32 %v3565_v24 }
 0x18b   :  { %v460_v49 = vsel %vm457_vm12, %v459_v40, %v455_v44  ;;  %vm474_vm15 = vmor %vm472_vm14, %vm473_vm13 }
 0x18c   :  { %v469_v35 = vsub.f32 1.0, %v468_v41  ;;  %v482_v50 = vmul.f32 %v460_v49, %v440_v42  ;;  %3566 = vpow2.f32 %v3368_v45 }
 0x18d   :  { %v526_v57 = vpop.f32.mrf.mxu3 }
 0x18e   :  { %v470_v60 = vmul.f32 %v3565_v24, %v469_v35  ;;  %v483_v34 = vadd.f32 %v482_v50, %v378_v43  ;;  %v527_v52 = vadd.f32 %v4257_v47, %v526_v57 }
 0x190   :  { %v471_v54 = vadd.f32 %v3565_v24, %v470_v60  ;;  %3568 = vtanh.f32 %v483_v34  ;;  %v629_v28 = vadd.f32 %v586_v58, %v527_v52 }
 0x192   :  { %v3567_v37 = vpop.eup %3566  ;;  %v475_v38 = vsel %vm474_vm15, %v3565_v24, %v471_v54  ;;  %v3369_v39 = vmul.f32 -1.442695, %v629_v28 }
 0x193   :  { %v480_v40 = vsel %vm477_vm1, %v479_v36, %v475_v38  ;;  %v613_v41 = vadd.f32 1.0, %v3567_v37 }
 0x194   :  { %v485_v42 = vsub.f32 1.0, %v480_v40  ;;  %3570 = vpow2.f32 %v3369_v39  ;;  %v487_v49 = vmul.f32 %v480_v40, %v4109_v62  ;;  %v4279_v62 = vld [vmem:[%s5297_s1 + $0x267] ss:$0 sm:$0xff] }
 0x195   :  { %3572 = vrcp.f32 %v613_v41  ;;  %v606_v53 = vpop.f32.mrf.mxu3  ;;  %v625_v57 = vand.u32 2147483648, %v613_v41  ;;  %v623_v60 = vand.u32 2147483647, %v613_v41  ;;  %vm619_vm3 = vweird.f32 %v613_v41 }
 0x196   :  { %v3569_v44 = vpop.eup %3568 }
 0x197   :  { %v486_v45 = vmul.f32 %v3569_v44, %v485_v42  ;;  %v626_v52 = vor.u32 1.1754944e-38, %v625_v57  ;;  %vm624_vm5 = vcmp.eq.f32.partialorder %v623_v60, 8.507059e+37 }
 0x199   :  { %v4261_v35 = vadd.f32 %v487_v49, %v486_v45 }
 0x19a   :  { %v3571_v55 = vpop.eup %3570 }
 0x19b   :  { %v3573_v50 = vpop.eup %3572  ;;  %v4263_v43 = vadd.f32 1.0, %v3571_v55  ;;  %3370 = vmatmul.msk.f32.vlgmr.msra.gmra.mxu0 %vm33_vm0, %v4261_v35  ;;  %3371 = vmatmul.msk.f32.vlgmr.msra.gmra.mxu1 %vm33_vm0, %v4261_v35 }
 0x19c   :  { %3372 = vmatmul.msk.f32.vlgmr.msra.gmra.mxu2 %vm33_vm0, %v4261_v35  ;;  %3375 = vmatmul.msk.f32.vlgmr.msra.gmra.mxu3 %vm33_vm0, %v4261_v35  ;;  %v615_v24 = vmul.f32 %v3573_v50, %v613_v41  ;;  %vm620_vm2 = vweird.f32 %v3573_v50 }
 0x19d   :  { %3574 = vrcp.f32 %v4263_v43  ;;  %885 = vmatpush.msra.mxu0 %v4182_v30  ;;  %959 = vmatpush.msra.mxu1 %v3867_v15  ;;  %v4292_v15 = vld [vmem:[%s5297_s1 + $0x266] ss:$0 sm:$0xff]  ;;  %vm621_vm4 = vmor %vm619_vm3, %vm620_vm2  ;;  %v645_v37 = vand.u32 2147483648, %v4263_v43  ;;  %vm639_vm7 = vweird.f32 %v4263_v43 }
 0x19e   :  { %v616_v51 = vsub.f32 1.0, %v615_v24  ;;  %979 = vmatpush.msra.mxu2 %v3893_v19  ;;  %999 = vmatpush.msra.mxu3 %v3919_v23  ;;  %v607_v19 = vadd.f32 %v4279_v62, %v606_v53  ;;  %v658_v24 = vld [vmem:[#allocation2 + $0x50] sm:$0xff] }
 0x19f   :  { %886 = vmatpush.msra.mxu0 %v4190_v31  ;;  %960 = vmatpush.msra.mxu1 %v3873_v16 }
 0x1a0   :  { %v617_v58 = vmul.f32 %v3573_v50, %v616_v51  ;;  %980 = vmatpush.msra.mxu2 %v3899_v20  ;;  %1000 = vmatpush.msra.mxu3 %v3925_v25  ;;  %v546_v20 = vpop.f32.mrf.mxu0 }
 0x1a1   :  { %887 = vmatpush.msra.mxu0 %v4196_v32  ;;  %961 = vmatpush.msra.mxu1 %v3879_v17 }
 0x1a2   :  { %v618_v34 = vadd.f32 %v3573_v50, %v617_v58  ;;  %981 = vmatpush.msra.mxu2 %v3905_v21  ;;  %1001 = vmatpush.msra.mxu3 %v3931_v26  ;;  %v547_v26 = vadd.f32 %v4292_v15, %v546_v20 }
 0x1a3   :  { %v3575_v16 = vpop.eup %3574  ;;  %3376 = vmatmul.msk.f32.vlgmr.msrb.gmra.mxu0 %vm33_vm0, %v4261_v35  ;;  %3377 = vmatmul.msk.f32.vlgmr.msrb.gmra.mxu1 %vm33_vm0, %v4261_v35 }
 0x1a4   :  { %v635_v17 = vmul.f32 %v3575_v16, %v4263_v43  ;;  %v622_v54 = vsel %vm621_vm4, %v3573_v50, %v618_v34  ;;  %888 = vmatpush.msra.mxu0 %v4202_v33  ;;  %962 = vmatpush.msra.mxu1 %v3885_v18  ;;  %vm640_vm6 = vweird.f32 %v3575_v16  ;;  %v643_v18 = vand.u32 2147483647, %v4263_v43  ;;  %v657_v50 = vld [vmem:[#allocation2 + $0x10] sm:$0xff] }
 0x1a5   :  { %v627_v21 = vsel %vm624_vm5, %v626_v52, %v622_v54  ;;  %982 = vmatpush.msra.mxu2 %v3911_v22  ;;  %1002 = vmatpush.msra.mxu3 %v3937_v27  ;;  %vm641_vm8 = vmor %vm639_vm7, %vm640_vm6  ;;  %v646_v27 = vor.u32 1.1754944e-38, %v645_v37 }
 0x1a6   :  { %1066 = vmatpush.msrb.mxu0 %v4144_v8  ;;  %v636_v28 = vsub.f32 1.0, %v635_v17  ;;  %v649_v36 = vmul.f32 %v627_v21, %v607_v19  ;;  %1086 = vmatpush.msrb.mxu1 %v4120_v0  ;;  %vm644_vm9 = vcmp.eq.f32.partialorder %v643_v18, 8.507059e+37 }
 0x1a8   :  { %1067 = vmatpush.msrb.mxu0 %v4158_v10  ;;  %v637_v38 = vmul.f32 %v3575_v16, %v636_v28  ;;  %v650_v39 = vadd.f32 %v649_v36, %v547_v26  ;;  %1087 = vmatpush.msrb.mxu1 %v4127_v1 }
 0x1aa   :  { %1068 = vmatpush.msrb.mxu0 %v4164_v11  ;;  %v638_v22 = vadd.f32 %v3575_v16, %v637_v38  ;;  %3576 = vtanh.f32 %v650_v39  ;;  %1088 = vmatpush.msrb.mxu1 %v4136_v2 }
 0x1ac   :  { %1069 = vmatpush.msrb.mxu0 %v4170_v29  ;;  %v642_v40 = vsel %vm641_vm8, %v3575_v16, %v638_v22  ;;  %1089 = vmatpush.msrb.mxu1 %v4149_v9 }
 0x1ad   :  { %v647_v41 = vsel %vm644_vm9, %v646_v27, %v642_v40 }
 0x1ae   :  { %v652_v42 = vsub.f32 1.0, %v647_v41  ;;  %v654_v49 = vmul.f32 0.0, %v647_v41 }
 0x1b0   :  { %v3577_v44 = vpop.eup %3576 }
 0x1b1   :  { %v653_v45 = vmul.f32 %v3577_v44, %v652_v42 }
 0x1b3   :  { %v4318_v55 = vadd.f32 %v654_v49, %v653_v45 }
 0x1b5   :  { %656 = vst.msk [vmem:[#allocation3] sm:$0xff] %vm33_vm0, %v4318_v55  ;;  %3378 = vmatmul.msk.f32.vlgmr.msrb.gmra.mxu2 %vm33_vm0, %v4318_v55  ;;  %3379 = vmatmul.msk.f32.vlgmr.msrb.gmra.mxu3 %vm33_vm0, %v4318_v55 }
 0x1b6   :  { %3380 = vmatmul.msk.f32.vlgmr.msra.gmra.mxu0 %vm33_vm0, %v4318_v55  ;;  %1106 = vmatpush.msrb.mxu2 %v4015_v59 }
 0x1b7   :  { %1129 = vmatpush.msrb.mxu3 %v4035_v3  ;;  %1149 = vmatpush.msra.mxu0 %v4040_v4 }
 0x1b8   :  { %1107 = vmatpush.msrb.mxu2 %v4023_v61 }
 0x1b9   :  { %1130 = vmatpush.msrb.mxu3 %v4045_v5  ;;  %1150 = vmatpush.msra.mxu0 %v4057_v7 }
 0x1ba   :  { %1108 = vmatpush.msrb.mxu2 %v4029_v63 }
 0x1bb   :  { %1131 = vmatpush.msrb.mxu3 %v4068_v12  ;;  %1151 = vmatpush.msra.mxu0 %v4073_v13 }
 0x1bc   :  { %1109 = vmatpush.msrb.mxu2 %v4052_v6 }
 0x1bd   :  { %1132 = vmatpush.msrb.mxu3 %v4087_v46  ;;  %1152 = vmatpush.msra.mxu0 %v4093_v48 }
 0x218   :  { %v680_v43 = vpop.f32.mrf.mxu0  ;;  %v700_v51 = vpop.f32.mrf.mxu1 }
 0x219   :  { %v723_v53 = vadd.f32 %v680_v43, %v657_v50  ;;  %v743_v57 = vadd.f32 %v700_v51, %v658_v24 }
 0x21b   :  { %v3373_v58 = vmul.f32 -1.442695, %v723_v53  ;;  %v3374_v60 = vmul.f32 -1.442695, %v743_v57  ;;  %v659_v57 = vld [vmem:[#allocation2 + $0x90] sm:$0xff] }
 0x21d   :  { %3578 = vpow2.f32 %v3373_v58 }
 0x21e   :  { %3580 = vpow2.f32 %v3374_v60 }
 0x21f   :  { %v720_v36 = vpop.f32.mrf.mxu2  ;;  %v787_v38 = vpop.f32.mrf.mxu3 }
 0x220   :  { %v807_v41 = vpop.f32.mrf.mxu0  ;;  %v721_v42 = vadd.f32 %v4079_v14, %v720_v36  ;;  %v788_v24 = vadd.f32 %v4250_v56, %v787_v38 }
 0x221   :  { %v808_v51 = vadd.f32 %v4257_v47, %v807_v41  ;;  %v4375_v41 = vld [vmem:[%s5297_s1 + $0x70] sm:$0xff] }
 0x223   :  { %v3579_v19 = vpop.eup %3578 }
 0x224   :  { %v3581_v34 = vpop.eup %3580  ;;  %v727_v16 = vadd.f32 1.0, %v3579_v19 }
 0x225   :  { %v747_v20 = vadd.f32 1.0, %v3581_v34 }
 0x226   :  { %3582 = vrcp.f32 %v727_v16  ;;  %v739_v37 = vand.u32 2147483648, %v727_v16  ;;  %v737_v39 = vand.u32 2147483647, %v727_v16  ;;  %vm733_vm11 = vweird.f32 %v727_v16 }
 0x227   :  { %3584 = vrcp.f32 %v747_v20  ;;  %v759_v50 = vand.u32 2147483648, %v747_v20  ;;  %vm753_vm15 = vweird.f32 %v747_v20  ;;  %v757_v53 = vand.u32 2147483647, %v747_v20 }
 0x228   :  { %v740_v40 = vor.u32 1.1754944e-38, %v739_v37  ;;  %vm738_vm13 = vcmp.eq.f32.partialorder %v737_v39, 8.507059e+37 }
 0x229   :  { %vm758_vm2 = vcmp.eq.f32.partialorder %v757_v53, 8.507059e+37 }
 0x22c   :  { %v3583_v52 = vpop.eup %3582 }
 0x22d   :  { %v3585_v17 = vpop.eup %3584  ;;  %v729_v54 = vmul.f32 %v3583_v52, %v727_v16  ;;  %vm734_vm10 = vweird.f32 %v3583_v52 }
 0x22e   :  { %v749_v21 = vmul.f32 %v3585_v17, %v747_v20  ;;  %vm735_vm12 = vmor %vm733_vm11, %vm734_vm10  ;;  %vm754_vm14 = vweird.f32 %v3585_v17 }
 0x22f   :  { %v730_v26 = vsub.f32 1.0, %v729_v54  ;;  %vm755_vm1 = vmor %vm753_vm15, %vm754_vm14  ;;  %v760_v54 = vor.u32 1.1754944e-38, %v759_v50  ;;  %v4395_v50 = vld [vmem:[%s5297_s1 + $0x88] sm:$0xff] }
 0x230   :  { %v750_v28 = vsub.f32 1.0, %v749_v21 }
 0x231   :  { %v731_v18 = vmul.f32 %v3583_v52, %v730_v26 }
 0x232   :  { %v751_v22 = vmul.f32 %v3585_v17, %v750_v28 }
 0x233   :  { %v732_v27 = vadd.f32 %v3583_v52, %v731_v18 }
 0x234   :  { %v752_v45 = vadd.f32 %v3585_v17, %v751_v22 }
 0x235   :  { %v736_v44 = vsel %vm735_vm12, %v3583_v52, %v732_v27 }
 0x236   :  { %v741_v49 = vsel %vm738_vm13, %v740_v40, %v736_v44  ;;  %v756_v52 = vsel %vm755_vm1, %v3585_v17, %v752_v45  ;;  %v4367_v17 = vld [vmem:[%s5297_s1 + $0x98] sm:$0xff] }
 0x237   :  { %v763_v43 = vmul.f32 %v741_v49, %v721_v42  ;;  %v761_v28 = vsel %vm758_vm2, %v760_v54, %v756_v52  ;;  %v4381_v42 = vld [vmem:[%s5297_s1 + $0x90] sm:$0xff] }
 0x238   :  { %v850_v58 = vpop.f32.mrf.mxu2  ;;  %v870_v60 = vpop.f32.mrf.mxu3  ;;  %v766_v36 = vsub.f32 1.0, %v761_v28  ;;  %v768_v20 = vmul.f32 %v761_v28, %v4261_v35  ;;  %v4361_v35 = vld [vmem:[%s5297_s1 + $0x78] sm:$0xff] }
 0x239   :  { %v764_v19 = vadd.f32 %v763_v43, %v659_v57  ;;  %v893_v34 = vadd.f32 %v850_v58, %v788_v24  ;;  %v913_v16 = vadd.f32 %v870_v60, %v808_v51  ;;  %v4413_v51 = vld [vmem:[%s5297_s1 + $0x60] sm:$0xff] }
 0x23a   :  { %v4420_v58 = vld [vmem:[%s5297_s1 + $0x80] sm:$0xff] }
 0x23b   :  { %3586 = vtanh.f32 %v764_v19  ;;  %v3381_v21 = vmul.f32 -1.442695, %v893_v34  ;;  %v3382_v26 = vmul.f32 -1.442695, %v913_v16  ;;  %v4426_v34 = vld [vmem:[%s5297_s1 + $0xa0] sm:$0xff]  ;;  %v890_v16 = vpop.f32.mrf.mxu0 }
 0x23c   :  { %v891_v28 = vadd.f32 %v4279_v62, %v890_v16 }
 0x23d   :  { %3588 = vpow2.f32 %v3381_v21  ;;  %v827_v21 = vpop.f32.mrf.mxu1 }
 0x23e   :  { %3590 = vpow2.f32 %v3382_v26 }
 0x241   :  { %v3587_v37 = vpop.eup %3586 }
 0x242   :  { %v767_v38 = vmul.f32 %v3587_v37, %v766_v36 }
 0x243   :  { %v3589_v18 = vpop.eup %3588 }
 0x244   :  { %v3591_v39 = vpop.eup %3590  ;;  %v4344_v22 = vadd.f32 %v768_v20, %v767_v38  ;;  %v897_v27 = vadd.f32 1.0, %v3589_v18  ;;  %v828_v38 = vadd.f32 %v4292_v15, %v827_v21 }
 0x245   :  { %v4346_v40 = vadd.f32 1.0, %v3591_v39 }
 0x246   :  { %3592 = vrcp.f32 %v897_v27  ;;  %3383 = vmatmul.msk.f32.vlgmr.msra.gmra.mxu1 %vm33_vm0, %v4344_v22  ;;  %3384 = vmatmul.msk.f32.vlgmr.msra.gmra.mxu2 %vm33_vm0, %v4344_v22  ;;  %v909_v53 = vand.u32 2147483648, %v897_v27  ;;  %v907_v19 = vand.u32 2147483647, %v897_v27  ;;  %vm903_vm4 = vweird.f32 %v897_v27 }
 0x247   :  { %3594 = vrcp.f32 %v4346_v40  ;;  %3385 = vmatmul.msk.f32.vlgmr.msra.gmra.mxu3 %vm33_vm0, %v4344_v22  ;;  %3388 = vmatmul.msk.f32.vlgmr.msrb.gmra.mxu0 %vm33_vm0, %v4344_v22  ;;  %vm923_vm8 = vweird.f32 %v4346_v40  ;;  %v927_v18 = vand.u32 2147483647, %v4346_v40 }
 0x248   :  { %1169 = vmatpush.msra.mxu1 %v4182_v30  ;;  %1243 = vmatpush.msra.mxu2 %v4361_v35  ;;  %v910_v26 = vor.u32 1.1754944e-38, %v909_v53  ;;  %vm908_vm6 = vcmp.eq.f32.partialorder %v907_v19, 8.507059e+37 }
 0x249   :  { %1263 = vmatpush.msra.mxu3 %v4367_v17  ;;  %1283 = vmatpush.msrb.mxu0 %v3919_v23  ;;  %v4389_v23 = vld [vmem:[%s5297_s1 + $0x68] sm:$0xff]  ;;  %vm928_vm10 = vcmp.eq.f32.partialorder %v927_v18, 8.507059e+37 }
 0x24a   :  { %1170 = vmatpush.msra.mxu1 %v4190_v31  ;;  %1244 = vmatpush.msra.mxu2 %v4375_v41 }
 0x24b   :  { %1264 = vmatpush.msra.mxu3 %v4381_v42  ;;  %1284 = vmatpush.msrb.mxu0 %v3925_v25  ;;  %v4401_v25 = vld [vmem:[%s5297_s1 + $0xa8] sm:$0xff] }
 0x24c   :  { %v3593_v44 = vpop.eup %3592  ;;  %1171 = vmatpush.msra.mxu1 %v4196_v32  ;;  %1245 = vmatpush.msra.mxu2 %v4389_v23 }
 0x24d   :  { %v3595_v45 = vpop.eup %3594  ;;  %v899_v49 = vmul.f32 %v3593_v44, %v897_v27  ;;  %1265 = vmatpush.msra.mxu3 %v4395_v50  ;;  %1285 = vmatpush.msrb.mxu0 %v4401_v25  ;;  %vm904_vm3 = vweird.f32 %v3593_v44 }
 0x24e   :  { %v919_v43 = vmul.f32 %v3595_v45, %v4346_v40  ;;  %3389 = vmatmul.msk.f32.vlgmr.msrb.gmra.mxu1 %vm33_vm0, %v4344_v22  ;;  %3390 = vmatmul.msk.f32.vlgmr.msrb.gmra.mxu2 %vm33_vm0, %v4344_v22  ;;  %vm905_vm5 = vmor %vm903_vm4, %vm904_vm3  ;;  %vm924_vm7 = vweird.f32 %v3595_v45 }
 0x24f   :  { %v900_v24 = vsub.f32 1.0, %v899_v49  ;;  %1172 = vmatpush.msra.mxu1 %v4202_v33  ;;  %1246 = vmatpush.msra.mxu2 %v4413_v51  ;;  %vm925_vm9 = vmor %vm923_vm8, %vm924_vm7 }
 0x250   :  { %v920_v57 = vsub.f32 1.0, %v919_v43  ;;  %1266 = vmatpush.msra.mxu3 %v4420_v58  ;;  %1286 = vmatpush.msrb.mxu0 %v4426_v34 }
 0x251   :  { %1350 = vmatpush.msrb.mxu1 %v4144_v8  ;;  %v901_v60 = vmul.f32 %v3593_v44, %v900_v24  ;;  %1370 = vmatpush.msrb.mxu2 %v4120_v0 }
 0x252   :  { %v921_v52 = vmul.f32 %v3595_v45, %v920_v57 }
 0x253   :  { %1351 = vmatpush.msrb.mxu1 %v4158_v10  ;;  %v902_v54 = vadd.f32 %v3593_v44, %v901_v60  ;;  %1371 = vmatpush.msrb.mxu2 %v4127_v1  ;;  %v929_v1 = vand.u32 2147483648, %v4346_v40 }
 0x254   :  { %v922_v37 = vadd.f32 %v3595_v45, %v921_v52 }
 0x255   :  { %1352 = vmatpush.msrb.mxu1 %v4164_v11  ;;  %v906_v36 = vsel %vm905_vm5, %v3593_v44, %v902_v54  ;;  %1372 = vmatpush.msrb.mxu2 %v4136_v2  ;;  %v930_v2 = vor.u32 1.1754944e-38, %v929_v1 }
 0x256   :  { %v911_v0 = vsel %vm908_vm6, %v910_v26, %v906_v36  ;;  %v926_v27 = vsel %vm925_vm9, %v3595_v45, %v922_v37 }
 0x257   :  { %1353 = vmatpush.msrb.mxu1 %v4170_v29  ;;  %v933_v20 = vmul.f32 %v911_v0, %v891_v28  ;;  %1373 = vmatpush.msrb.mxu2 %v4149_v9  ;;  %v931_v44 = vsel %vm928_vm10, %v930_v2, %v926_v27 }
 0x258   :  { %v936_v49 = vsub.f32 1.0, %v931_v44  ;;  %v938_v53 = vmul.f32 %v931_v44, %v4318_v55  ;;  %v943_v44 = vld [vmem:[#allocation2 + $0x98] sm:$0xff] }
 0x259   :  { %v934_v39 = vadd.f32 %v933_v20, %v828_v38 }
 0x25b   :  { %3596 = vtanh.f32 %v934_v39 }
 0x261   :  { %v3597_v43 = vpop.eup %3596 }
 0x262   :  { %v937_v24 = vmul.f32 %v3597_v43, %v936_v49 }
 0x264   :  { %v4442_v57 = vadd.f32 %v938_v53, %v937_v24 }
 0x266   :  { %940 = vst.msk [vmem:[#allocation3 + $0x8] sm:$0xff] %vm33_vm0, %v4442_v57  ;;  %3391 = vmatmul.msk.f32.vlgmr.msrb.gmra.mxu3 %vm33_vm0, %v4442_v57  ;;  %3392 = vmatmul.msk.f32.vlgmr.msra.gmra.mxu0 %vm33_vm0, %v4442_v57 }
 0x267   :  { %3393 = vmatmul.msk.f32.vlgmr.msra.gmra.mxu1 %vm33_vm0, %v4442_v57  ;;  %1390 = vmatpush.msrb.mxu3 %v4015_v59  ;;  %v941_v59 = vld [vmem:[#allocation2 + $0x18] sm:$0xff] }
 0x268   :  { %1413 = vmatpush.msra.mxu0 %v4035_v3  ;;  %1433 = vmatpush.msra.mxu1 %v4040_v4 }
 0x269   :  { %1391 = vmatpush.msrb.mxu3 %v4023_v61 }
 0x26a   :  { %1414 = vmatpush.msra.mxu0 %v4045_v5  ;;  %1434 = vmatpush.msra.mxu1 %v4057_v7  ;;  %v942_v5 = vld [vmem:[#allocation2 + $0x58] sm:$0xff] }
 0x26b   :  { %1392 = vmatpush.msrb.mxu3 %v4029_v63 }
 0x26c   :  { %1415 = vmatpush.msra.mxu0 %v4068_v12  ;;  %1435 = vmatpush.msra.mxu1 %v4073_v13 }
 0x26d   :  { %1393 = vmatpush.msrb.mxu3 %v4052_v6 }
 0x26e   :  { %1416 = vmatpush.msra.mxu0 %v4087_v46  ;;  %1436 = vmatpush.msra.mxu1 %v4093_v48 }
 0x2c3   :  { %v964_v3 = vpop.f32.mrf.mxu1 }
 0x2c4   :  { %v1007_v4 = vadd.f32 %v964_v3, %v941_v59  ;;  %v1071_v48 = vpop.f32.mrf.mxu0 }
 0x2c6   :  { %v3386_v61 = vmul.f32 -1.442695, %v1007_v4  ;;  %v1072_v4 = vadd.f32 %v4250_v56, %v1071_v48 }
 0x2c8   :  { %3598 = vpow2.f32 %v3386_v61 }
 0x2c9   :  { %v984_v9 = vpop.f32.mrf.mxu2 }
 0x2ca   :  { %v1027_v7 = vadd.f32 %v984_v9, %v942_v5  ;;  %v1004_v54 = vpop.f32.mrf.mxu3 }
 0x2cb   :  { %v1091_v28 = vpop.f32.mrf.mxu1  ;;  %v1005_v37 = vadd.f32 %v4079_v14, %v1004_v54  ;;  %v4530_v54 = vld [vmem:[%s5297_s1 + $0xe8] sm:$0xff] }
 0x2cc   :  { %v3387_v55 = vmul.f32 -1.442695, %v1027_v7  ;;  %v1092_v1 = vadd.f32 %v4257_v47, %v1091_v28  ;;  %v4537_v28 = vld [vmem:[%s5297_s1 + $0xe0] sm:$0xff] }
 0x2ce   :  { %v3599_v63 = vpop.eup %3598  ;;  %3600 = vpow2.f32 %v3387_v55 }
 0x2cf   :  { %v1011_v12 = vadd.f32 1.0, %v3599_v63 }
 0x2d1   :  { %3602 = vrcp.f32 %v1011_v12  ;;  %v1023_v60 = vand.u32 2147483648, %v1011_v12  ;;  %v1021_v16 = vand.u32 2147483647, %v1011_v12  ;;  %vm1017_vm12 = vweird.f32 %v1011_v12 }
 0x2d3   :  { %v1024_v36 = vor.u32 1.1754944e-38, %v1023_v60  ;;  %vm1022_vm14 = vcmp.eq.f32.partialorder %v1021_v16, 8.507059e+37  ;;  %v4523_v16 = vld [vmem:[%s5297_s1 + $0xf0] sm:$0xff] }
 0x2d4   :  { %v3601_v13 = vpop.eup %3600 }
 0x2d5   :  { %v1031_v40 = vadd.f32 1.0, %v3601_v13 }
 0x2d7   :  { %v3603_v6 = vpop.eup %3602  ;;  %3604 = vrcp.f32 %v1031_v40  ;;  %v1043_v39 = vand.u32 2147483648, %v1031_v40  ;;  %v1041_v2 = vand.u32 2147483647, %v1031_v40  ;;  %vm1037_vm1 = vweird.f32 %v1031_v40 }
 0x2d8   :  { %v1013_v46 = vmul.f32 %v3603_v6, %v1011_v12  ;;  %vm1018_vm11 = vweird.f32 %v3603_v6 }
 0x2d9   :  { %vm1019_vm13 = vmor %vm1017_vm12, %vm1018_vm11  ;;  %v1044_v59 = vor.u32 1.1754944e-38, %v1043_v39  ;;  %vm1042_vm3 = vcmp.eq.f32.partialorder %v1041_v2, 8.507059e+37 }
 0x2da   :  { %v1014_v45 = vsub.f32 1.0, %v1013_v46 }
 0x2dc   :  { %v1015_v19 = vmul.f32 %v3603_v6, %v1014_v45  ;;  %v4487_v45 = vld [vmem:[%s5297_s1 + $0xb8] sm:$0xff] }
 0x2dd   :  { %v3605_v52 = vpop.eup %3604 }
 0x2de   :  { %v1033_v21 = vmul.f32 %v3605_v52, %v1031_v40  ;;  %v1016_v26 = vadd.f32 %v3603_v6, %v1015_v19  ;;  %vm1038_vm15 = vweird.f32 %v3605_v52 }
 0x2df   :  { %vm1039_vm2 = vmor %vm1037_vm1, %vm1038_vm15 }
 0x2e0   :  { %v1034_v0 = vsub.f32 1.0, %v1033_v21  ;;  %v1020_v38 = vsel %vm1019_vm13, %v3603_v6, %v1016_v26 }
 0x2e1   :  { %v1025_v20 = vsel %vm1022_vm14, %v1024_v36, %v1020_v38 }
 0x2e2   :  { %v1035_v18 = vmul.f32 %v3605_v52, %v1034_v0  ;;  %v1047_v27 = vmul.f32 %v1025_v20, %v1005_v37  ;;  %v1111_v37 = vpop.f32.mrf.mxu2 }
 0x2e3   :  { %v1154_v49 = vpop.f32.mrf.mxu0  ;;  %v1112_v39 = vadd.f32 %v4292_v15, %v1111_v37 }
 0x2e4   :  { %v1036_v43 = vadd.f32 %v3605_v52, %v1035_v18  ;;  %v1048_v24 = vadd.f32 %v1047_v27, %v943_v44  ;;  %v1197_v53 = vadd.f32 %v1154_v49, %v1092_v1  ;;  %v1174_v36 = vpop.f32.mrf.mxu1 }
 0x2e5   :  { %v1175_v20 = vadd.f32 %v4279_v62, %v1174_v36 }
 0x2e6   :  { %v1040_v3 = vsel %vm1039_vm2, %v3605_v52, %v1036_v43  ;;  %3606 = vtanh.f32 %v1048_v24  ;;  %v3395_v14 = vmul.f32 -1.442695, %v1197_v53 }
 0x2e7   :  { %v1045_v61 = vsel %vm1042_vm3, %v1044_v59, %v1040_v3 }
 0x2e8   :  { %3608 = vpow2.f32 %v3395_v14  ;;  %v1050_v7 = vsub.f32 1.0, %v1045_v61  ;;  %v1052_v13 = vmul.f32 %v1045_v61, %v4344_v22  ;;  %v4559_v61 = vld [vmem:[%s5297_s1 + $0x118] sm:$0xff] }
 0x2e9   :  { %v1134_v5 = vpop.f32.mrf.mxu3 }
 0x2ea   :  { %v1177_v9 = vadd.f32 %v1134_v5, %v1072_v4  ;;  %v4571_v5 = vld [vmem:[%s5297_s1 + $0x158] sm:$0xff] }
 0x2ec   :  { %v3607_v55 = vpop.eup %3606  ;;  %v3394_v63 = vmul.f32 -1.442695, %v1177_v9  ;;  %v4577_v9 = vld [vmem:[%s5297_s1 + $0x110] sm:$0xff] }
 0x2ed   :  { %v1051_v12 = vmul.f32 %v3607_v55, %v1050_v7  ;;  %v4583_v7 = vld [vmem:[%s5297_s1 + $0x130] sm:$0xff] }
 0x2ee   :  { %v3609_v40 = vpop.eup %3608  ;;  %3610 = vpow2.f32 %v3394_v63  ;;  %v4589_v55 = vld [vmem:[%s5297_s1 + $0x150] sm:$0xff]  ;;  %v4595_v63 = vld [vmem:[%s5297_s1 + $0x108] sm:$0xff] }
 0x2ef   :  { %v4468_v6 = vadd.f32 %v1052_v13, %v1051_v12  ;;  %v4470_v46 = vadd.f32 1.0, %v3609_v40  ;;  %v4601_v12 = vld [vmem:[%s5297_s1 + $0x128] sm:$0xff]  ;;  %v4613_v40 = vld [vmem:[%s5297_s1 + $0x100] sm:$0xff] }
 0x2f0   :  { %v4607_v13 = vld [vmem:[%s5297_s1 + $0x148] sm:$0xff] }
 0x2f1   :  { %3396 = vmatmul.msk.f32.vlgmr.msra.gmra.mxu2 %vm33_vm0, %v4468_v6  ;;  %3397 = vmatmul.msk.f32.vlgmr.msra.gmra.mxu3 %vm33_vm0, %v4468_v6  ;;  %3612 = vrcp.f32 %v4470_v46  ;;  %v1213_v27 = vand.u32 2147483648, %v4470_v46  ;;  %vm1207_vm9 = vweird.f32 %v4470_v46  ;;  %v1211_v44 = vand.u32 2147483647, %v4470_v46 }
 0x2f2   :  { %3398 = vmatmul.msk.f32.vlgmr.msrb.gmra.mxu0 %vm33_vm0, %v4468_v6  ;;  %3401 = vmatmul.msk.f32.vlgmr.msrb.gmra.mxu1 %vm33_vm0, %v4468_v6 }
 0x2f3   :  { %1453 = vmatpush.msra.mxu2 %v4182_v30  ;;  %1527 = vmatpush.msra.mxu3 %v4361_v35  ;;  %v4496_v30 = vld [vmem:[%s5297_s1 + $0xb0] sm:$0xff]  ;;  %v1214_v24 = vor.u32 1.1754944e-38, %v1213_v27  ;;  %vm1212_vm11 = vcmp.eq.f32.partialorder %v1211_v44, 8.507059e+37 }
 0x2f4   :  { %v3611_v22 = vpop.eup %3610  ;;  %1547 = vmatpush.msrb.mxu0 %v4367_v17  ;;  %1567 = vmatpush.msrb.mxu1 %v4487_v45 }
 0x2f5   :  { %v1181_v48 = vadd.f32 1.0, %v3611_v22  ;;  %1454 = vmatpush.msra.mxu2 %v4190_v31  ;;  %1528 = vmatpush.msra.mxu3 %v4375_v41  ;;  %v4625_v22 = vld [vmem:[%s5297_s1 + $0x140] sm:$0xff] }
 0x2f6   :  { %1548 = vmatpush.msrb.mxu0 %v4381_v42  ;;  %1568 = vmatpush.msrb.mxu1 %v4496_v30  ;;  %5302 = vst [vmem:[#allocation4_spill] sm:$0xff] %v4625_v22 }
 0x2f7   :  { %3614 = vrcp.f32 %v1181_v48  ;;  %1455 = vmatpush.msra.mxu2 %v4196_v32  ;;  %1529 = vmatpush.msra.mxu3 %v4389_v23  ;;  %v3613_v60 = vpop.eup %3612  ;;  %v4516_v32 = vld [vmem:[%s5297_s1 + $0xf8] sm:$0xff]  ;;  %v1191_v26 = vand.u32 2147483647, %v1181_v48  ;;  %vm1187_vm5 = vweird.f32 %v1181_v48 }
 0x2f8   :  { %1549 = vmatpush.msrb.mxu0 %v4395_v50  ;;  %1569 = vmatpush.msrb.mxu1 %v4401_v25  ;;  %v1203_v31 = vmul.f32 %v3613_v60, %v4470_v46  ;;  %vm1208_vm8 = vweird.f32 %v3613_v60  ;;  %v4619_v46 = vld [vmem:[%s5297_s1 + $0x120] sm:$0xff] }
 0x2f9   :  { %3402 = vmatmul.msk.f32.vlgmr.msrb.gmra.mxu2 %vm33_vm0, %v4468_v6  ;;  %3403 = vmatmul.msk.f32.vlgmr.msrb.gmra.mxu3 %vm33_vm0, %v4468_v6  ;;  %vm1192_vm7 = vcmp.eq.f32.partialorder %v1191_v26, 8.507059e+37  ;;  %vm1209_vm10 = vmor %vm1207_vm9, %vm1208_vm8 }
 0x2fa   :  { %1456 = vmatpush.msra.mxu2 %v4202_v33  ;;  %1530 = vmatpush.msra.mxu3 %v4413_v51 }
 0x2fb   :  { %1550 = vmatpush.msrb.mxu0 %v4420_v58  ;;  %1570 = vmatpush.msrb.mxu1 %v4426_v34 }
 0x2fc   :  { %1634 = vmatpush.msrb.mxu2 %v4144_v8  ;;  %1654 = vmatpush.msrb.mxu3 %v4516_v32  ;;  %v1204_v8 = vsub.f32 1.0, %v1203_v31  ;;  %v1226_v31 = vld [vmem:[#allocation2 + $0x60] sm:$0xff] }
 0x2fd   :  { %v3615_v19 = vpop.eup %3614 }
 0x2fe   :  { %1635 = vmatpush.msrb.mxu2 %v4158_v10  ;;  %v1183_v33 = vmul.f32 %v3615_v19, %v1181_v48  ;;  %1655 = vmatpush.msrb.mxu3 %v4523_v16  ;;  %v1193_v10 = vand.u32 2147483648, %v1181_v48  ;;  %vm1188_vm4 = vweird.f32 %v3615_v19  ;;  %v1225_v48 = vld [vmem:[#allocation2 + $0x20] sm:$0xff] }
 0x2ff   :  { %vm1189_vm6 = vmor %vm1187_vm5, %vm1188_vm4 }
 0x300   :  { %1636 = vmatpush.msrb.mxu2 %v4164_v11  ;;  %v1184_v52 = vsub.f32 1.0, %v1183_v33  ;;  %1656 = vmatpush.msrb.mxu3 %v4530_v54  ;;  %v1205_v11 = vmul.f32 %v3613_v60, %v1204_v8  ;;  %v1194_v38 = vor.u32 1.1754944e-38, %v1193_v10 }
 0x302   :  { %1637 = vmatpush.msrb.mxu2 %v4170_v29  ;;  %v1185_v21 = vmul.f32 %v3615_v19, %v1184_v52  ;;  %1657 = vmatpush.msrb.mxu3 %v4537_v28  ;;  %v1206_v1 = vadd.f32 %v3613_v60, %v1205_v11 }
 0x304   :  { %v1186_v0 = vadd.f32 %v3615_v19, %v1185_v21  ;;  %v1210_v43 = vsel %vm1209_vm10, %v3613_v60, %v1206_v1 }
 0x305   :  { %v1215_v62 = vsel %vm1212_vm11, %v1214_v24, %v1210_v43 }
 0x306   :  { %v1190_v29 = vsel %vm1189_vm6, %v3615_v19, %v1186_v0  ;;  %v1220_v53 = vsub.f32 1.0, %v1215_v62  ;;  %v1222_v14 = vmul.f32 %v1215_v62, %v4442_v57  ;;  %v4565_v57 = vld [vmem:[%s5297_s1 + $0x138] sm:$0xff] }
 0x307   :  { %v1195_v18 = vsel %vm1192_vm7, %v1194_v38, %v1190_v29 }
 0x308   :  { %v1217_v2 = vmul.f32 %v1195_v18, %v1175_v20 }
 0x30a   :  { %v1218_v49 = vadd.f32 %v1217_v2, %v1112_v39 }
 0x30c   :  { %3616 = vtanh.f32 %v1218_v49 }
 0x312   :  { %v3617_v59 = vpop.eup %3616 }
 0x313   :  { %v1221_v3 = vmul.f32 %v3617_v59, %v1220_v53  ;;  %v4631_v53 = vld [vmem:[%s5297_s1 + $0x263] ss:$0 sm:$0xff] }
 0x315   :  { %v4546_v4 = vadd.f32 %v1222_v14, %v1221_v3 }
 0x317   :  { %1224 = vst.msk [vmem:[#allocation3 + $0x10] sm:$0xff] %vm33_vm0, %v4546_v4  ;;  %3404 = vmatmul.msk.f32.vlgmr.msra.gmra.mxu0 %vm33_vm0, %v4546_v4  ;;  %3405 = vmatmul.msk.f32.vlgmr.msra.gmra.mxu1 %vm33_vm0, %v4546_v4 }
 0x318   :  { %3406 = vmatmul.msk.f32.vlgmr.msra.gmra.mxu2 %vm33_vm0, %v4546_v4  ;;  %1674 = vmatpush.msra.mxu0 %v4559_v61 }
 0x319   :  { %1697 = vmatpush.msra.mxu1 %v4565_v57  ;;  %1717 = vmatpush.msra.mxu2 %v4571_v5 }
 0x31a   :  { %1675 = vmatpush.msra.mxu0 %v4577_v9 }
 0x31b   :  { %1698 = vmatpush.msra.mxu1 %v4583_v7  ;;  %1718 = vmatpush.msra.mxu2 %v4589_v55 }
 0x31c   :  { %1676 = vmatpush.msra.mxu0 %v4595_v63 }
 0x31d   :  { %1699 = vmatpush.msra.mxu1 %v4601_v12  ;;  %1719 = vmatpush.msra.mxu2 %v4607_v13 }
 0x31e   :  { %1677 = vmatpush.msra.mxu0 %v4613_v40 }
 0x31f   :  { %1700 = vmatpush.msra.mxu1 %v4619_v46  ;;  %1720 = vmatpush.msra.mxu2 %v4625_v22 }
 0x36f   :  { %v1288_v1 = vpop.f32.mrf.mxu0  ;;  %v1355_v18 = vpop.f32.mrf.mxu1 }
 0x370   :  { %v1289_v59 = vadd.f32 %v4631_v53, %v1288_v1 }
 0x374   :  { %v1248_v60 = vpop.f32.mrf.mxu2  ;;  %v1268_v19 = vpop.f32.mrf.mxu3 }
 0x375   :  { %v1291_v33 = vadd.f32 %v1248_v60, %v1225_v48  ;;  %v1311_v8 = vadd.f32 %v1268_v19, %v1226_v31  ;;  %v1356_v60 = vadd.f32 %v4250_v56, %v1355_v18 }
 0x377   :  { %v3399_v52 = vmul.f32 -1.442695, %v1291_v33  ;;  %v3400_v10 = vmul.f32 -1.442695, %v1311_v8  ;;  %v1227_v8 = vld [vmem:[#allocation2 + $0xa0] sm:$0xff] }
 0x379   :  { %3618 = vpow2.f32 %v3399_v52 }
 0x37a   :  { %3620 = vpow2.f32 %v3400_v10 }
 0x37c   :  { %v1375_v62 = vpop.f32.mrf.mxu2 }
 0x37d   :  { %v1376_v33 = vadd.f32 %v4257_v47, %v1375_v62  ;;  %v4671_v62 = vld [vmem:[%s5297_s1 + $0x168] sm:$0xff] }
 0x37f   :  { %v3619_v21 = vpop.eup %3618 }
 0x380   :  { %v3621_v26 = vpop.eup %3620  ;;  %v1295_v11 = vadd.f32 1.0, %v3619_v21 }
 0x381   :  { %v1315_v36 = vadd.f32 1.0, %v3621_v26 }
 0x382   :  { %3622 = vrcp.f32 %v1295_v11  ;;  %v1307_v39 = vand.u32 2147483648, %v1295_v11  ;;  %v1305_v44 = vand.u32 2147483647, %v1295_v11  ;;  %vm1301_vm13 = vweird.f32 %v1295_v11 }
 0x383   :  { %3624 = vrcp.f32 %v1315_v36  ;;  %v1327_v19 = vand.u32 2147483648, %v1315_v36  ;;  %vm1321_vm2 = vweird.f32 %v1315_v36  ;;  %v1325_v52 = vand.u32 2147483647, %v1315_v36 }
 0x384   :  { %v1308_v24 = vor.u32 1.1754944e-38, %v1307_v39  ;;  %vm1306_vm15 = vcmp.eq.f32.partialorder %v1305_v44, 8.507059e+37 }
 0x385   :  { %vm1326_vm4 = vcmp.eq.f32.partialorder %v1325_v52, 8.507059e+37 }
 0x388   :  { %v3623_v0 = vpop.eup %3622 }
 0x389   :  { %v3625_v37 = vpop.eup %3624  ;;  %v1297_v38 = vmul.f32 %v3623_v0, %v1295_v11  ;;  %vm1302_vm12 = vweird.f32 %v3623_v0 }
 0x38a   :  { %v1317_v20 = vmul.f32 %v3625_v37, %v1315_v36  ;;  %vm1303_vm14 = vmor %vm1301_vm13, %vm1302_vm12  ;;  %vm1322_vm1 = vweird.f32 %v3625_v37 }
 0x38b   :  { %v1298_v29 = vsub.f32 1.0, %v1297_v38  ;;  %vm1323_vm3 = vmor %vm1321_vm2, %vm1322_vm1 }
 0x38c   :  { %v1318_v27 = vsub.f32 1.0, %v1317_v20  ;;  %v1328_v20 = vor.u32 1.1754944e-38, %v1327_v19 }
 0x38d   :  { %v1299_v2 = vmul.f32 %v3623_v0, %v1298_v29 }
 0x38e   :  { %v1319_v49 = vmul.f32 %v3625_v37, %v1318_v27 }
 0x38f   :  { %v1300_v43 = vadd.f32 %v3623_v0, %v1299_v2 }
 0x390   :  { %v1320_v48 = vadd.f32 %v3625_v37, %v1319_v49 }
 0x391   :  { %v1304_v3 = vsel %vm1303_vm14, %v3623_v0, %v1300_v43 }
 0x392   :  { %v1309_v14 = vsel %vm1306_vm15, %v1308_v24, %v1304_v3  ;;  %v1324_v0 = vsel %vm1323_vm3, %v3625_v37, %v1320_v48  ;;  %v4662_v37 = vld [vmem:[%s5297_s1 + $0x170] sm:$0xff] }
 0x393   :  { %v1331_v31 = vmul.f32 %v1309_v14, %v1289_v59  ;;  %v1329_v56 = vsel %vm1326_vm4, %v1328_v20, %v1324_v0  ;;  %v4708_v20 = vld [vmem:[%s5297_s1 + $0xc8] sm:$0xff] }
 0x394   :  { %v1418_v10 = vpop.f32.mrf.mxu0  ;;  %v1438_v21 = vpop.f32.mrf.mxu1  ;;  %v1334_v18 = vsub.f32 1.0, %v1329_v56  ;;  %v1336_v36 = vmul.f32 %v1329_v56, %v4468_v6  ;;  %v4653_v6 = vld [vmem:[%s5297_s1 + $0x178] sm:$0xff] }
 0x395   :  { %v1332_v26 = vadd.f32 %v1331_v31, %v1227_v8  ;;  %v1461_v11 = vadd.f32 %v1418_v10, %v1356_v60  ;;  %v1481_v38 = vadd.f32 %v1438_v21, %v1376_v33  ;;  %v4685_v60 = vld [vmem:[%s5297_s1 + $0x160] sm:$0xff]  ;;  %v4692_v33 = vld [vmem:[%s5297_s1 + $0xd8] sm:$0xff] }
 0x397   :  { %3626 = vtanh.f32 %v1332_v26  ;;  %v3407_v29 = vmul.f32 -1.442695, %v1461_v11  ;;  %v3408_v1 = vmul.f32 -1.442695, %v1481_v38  ;;  %v4701_v26 = vld [vmem:[%s5297_s1 + $0xd0] sm:$0xff]  ;;  %v1395_v38 = vpop.f32.mrf.mxu3 }
 0x399   :  { %3628 = vpow2.f32 %v3407_v29  ;;  %v4714_v29 = vld [vmem:[%s5297_s1 + $0x267] ss:$0 sm:$0xff] }
 0x39a   :  { %3630 = vpow2.f32 %v3408_v1 }
 0x39b   :  { %v1458_v21 = vpop.f32.mrf.mxu2 }
 0x39c   :  { %v1459_v1 = vadd.f32 %v4714_v29, %v1458_v21  ;;  %v1509_v21 = vld [vmem:[#allocation2 + $0x28] sm:$0xff] }
 0x39d   :  { %v3627_v47 = vpop.eup %3626 }
 0x39e   :  { %v1335_v39 = vmul.f32 %v3627_v47, %v1334_v18 }
 0x39f   :  { %v3629_v27 = vpop.eup %3628 }
 0x3a0   :  { %v3631_v2 = vpop.eup %3630  ;;  %v4637_v44 = vadd.f32 %v1336_v36, %v1335_v39  ;;  %v1465_v49 = vadd.f32 1.0, %v3629_v27  ;;  %v4721_v39 = vld [vmem:[%s5297_s1 + $0xc0] sm:$0xff]  ;;  %v1396_v36 = vadd.f32 %v4292_v15, %v1395_v38 }
 0x3a1   :  { %v4639_v43 = vadd.f32 1.0, %v3631_v2 }
 0x3a2   :  { %3632 = vrcp.f32 %v1465_v49  ;;  %3409 = vmatmul.msk.f32.vlgmr.msra.gmra.mxu3 %vm33_vm0, %v4637_v44  ;;  %3410 = vmatmul.msk.f32.vlgmr.msrb.gmra.mxu0 %vm33_vm0, %v4637_v44  ;;  %v1477_v19 = vand.u32 2147483648, %v1465_v49  ;;  %v1475_v52 = vand.u32 2147483647, %v1465_v49  ;;  %vm1471_vm6 = vweird.f32 %v1465_v49 }
 0x3a3   :  { %3634 = vrcp.f32 %v4639_v43  ;;  %3411 = vmatmul.msk.f32.vlgmr.msrb.gmra.mxu1 %vm33_vm0, %v4637_v44  ;;  %3414 = vmatmul.msk.f32.vlgmr.msrb.gmra.mxu2 %vm33_vm0, %v4637_v44  ;;  %v1497_v27 = vand.u32 2147483648, %v4639_v43  ;;  %vm1491_vm10 = vweird.f32 %v4639_v43 }
 0x3a4   :  { %1737 = vmatpush.msra.mxu3 %v4653_v6  ;;  %1811 = vmatpush.msrb.mxu0 %v4361_v35  ;;  %v1478_v0 = vor.u32 1.1754944e-38, %v1477_v19  ;;  %vm1476_vm8 = vcmp.eq.f32.partialorder %v1475_v52, 8.507059e+37 }
 0x3a5   :  { %1831 = vmatpush.msrb.mxu1 %v4367_v17  ;;  %1851 = vmatpush.msrb.mxu2 %v4487_v45 }
 0x3a6   :  { %1738 = vmatpush.msra.mxu3 %v4662_v37  ;;  %1812 = vmatpush.msrb.mxu0 %v4375_v41 }
 0x3a7   :  { %1832 = vmatpush.msrb.mxu1 %v4381_v42  ;;  %1852 = vmatpush.msrb.mxu2 %v4496_v30 }
 0x3a8   :  { %v3633_v24 = vpop.eup %3632  ;;  %1739 = vmatpush.msra.mxu3 %v4671_v62  ;;  %1813 = vmatpush.msrb.mxu0 %v4389_v23 }
 0x3a9   :  { %v3635_v59 = vpop.eup %3634  ;;  %v1467_v3 = vmul.f32 %v3633_v24, %v1465_v49  ;;  %1833 = vmatpush.msrb.mxu1 %v4395_v50  ;;  %1853 = vmatpush.msrb.mxu2 %v4401_v25  ;;  %vm1472_vm5 = vweird.f32 %v3633_v24  ;;  %v1495_v49 = vand.u32 2147483647, %v4639_v43 }
 0x3aa   :  { %v1487_v14 = vmul.f32 %v3635_v59, %v4639_v43  ;;  %3415 = vmatmul.msk.f32.vlgmr.msrb.gmra.mxu3 %vm33_vm0, %v4637_v44  ;;  %3416 = vmatmul.msk.f32.vlgmr.msra.gmra.mxu0 %vm33_vm0, %v4637_v44  ;;  %vm1473_vm7 = vmor %vm1471_vm6, %vm1472_vm5  ;;  %vm1492_vm9 = vweird.f32 %v3635_v59 }
 0x3ab   :  { %v1468_v48 = vsub.f32 1.0, %v1467_v3  ;;  %1740 = vmatpush.msra.mxu3 %v4685_v60  ;;  %1814 = vmatpush.msrb.mxu0 %v4413_v51  ;;  %vm1493_vm11 = vmor %vm1491_vm10, %vm1492_vm9  ;;  %vm1496_vm12 = vcmp.eq.f32.partialorder %v1495_v49, 8.507059e+37 }
 0x3ac   :  { %v1488_v31 = vsub.f32 1.0, %v1487_v14  ;;  %1834 = vmatpush.msrb.mxu1 %v4420_v58  ;;  %1854 = vmatpush.msrb.mxu2 %v4426_v34  ;;  %v1498_v14 = vor.u32 1.1754944e-38, %v1497_v27 }
 0x3ad   :  { %1918 = vmatpush.msrb.mxu3 %v4692_v33  ;;  %v1469_v8 = vmul.f32 %v3633_v24, %v1468_v48  ;;  %1938 = vmatpush.msra.mxu0 %v4516_v32 }
 0x3ae   :  { %v1489_v10 = vmul.f32 %v3635_v59, %v1488_v31 }
 0x3af   :  { %1919 = vmatpush.msrb.mxu3 %v4701_v26  ;;  %v1470_v11 = vadd.f32 %v3633_v24, %v1469_v8  ;;  %1939 = vmatpush.msra.mxu0 %v4523_v16 }
 0x3b0   :  { %v1490_v18 = vadd.f32 %v3635_v59, %v1489_v10 }
 0x3b1   :  { %1920 = vmatpush.msrb.mxu3 %v4708_v20  ;;  %v1474_v56 = vsel %vm1473_vm7, %v3633_v24, %v1470_v11  ;;  %1940 = vmatpush.msra.mxu0 %v4530_v54 }
 0x3b2   :  { %v1479_v47 = vsel %vm1476_vm8, %v1478_v0, %v1474_v56  ;;  %v1494_v3 = vsel %vm1493_vm11, %v3635_v59, %v1490_v18 }
 0x3b3   :  { %1921 = vmatpush.msrb.mxu3 %v4721_v39  ;;  %v1501_v2 = vmul.f32 %v1479_v47, %v1459_v1  ;;  %1941 = vmatpush.msra.mxu0 %v4537_v28  ;;  %v1499_v48 = vsel %vm1496_vm12, %v1498_v14, %v1494_v3 }
 0x3b4   :  { %v1504_v31 = vsub.f32 1.0, %v1499_v48  ;;  %v1506_v15 = vmul.f32 %v1499_v48, %v4546_v4  ;;  %v1510_v4 = vld [vmem:[#allocation2 + $0x68] sm:$0xff] }
 0x3b5   :  { %v1502_v24 = vadd.f32 %v1501_v2, %v1396_v36 }
 0x3b7   :  { %3636 = vtanh.f32 %v1502_v24 }
 0x3bd   :  { %v3637_v19 = vpop.eup %3636 }
 0x3be   :  { %v1505_v8 = vmul.f32 %v3637_v19, %v1504_v31 }
 0x3c0   :  { %v4730_v52 = vadd.f32 %v1506_v15, %v1505_v8  ;;  %v4755_v15 = vld [vmem:[%s5297_s1 + $0x264] ss:$0 sm:$0xff] }
 0x3c2   :  { %1508 = vst.msk [vmem:[#allocation3 + $0x18] sm:$0xff] %vm33_vm0, %v4730_v52  ;;  %3417 = vmatmul.msk.f32.vlgmr.msra.gmra.mxu1 %vm33_vm0, %v4730_v52  ;;  %3418 = vmatmul.msk.f32.vlgmr.msra.gmra.mxu2 %vm33_vm0, %v4730_v52 }
 0x3c3   :  { %3419 = vmatmul.msk.f32.vlgmr.msra.gmra.mxu3 %vm33_vm0, %v4730_v52  ;;  %1958 = vmatpush.msra.mxu1 %v4559_v61 }
 0x3c4   :  { %1981 = vmatpush.msra.mxu2 %v4565_v57  ;;  %2001 = vmatpush.msra.mxu3 %v4571_v5 }
 0x3c5   :  { %1959 = vmatpush.msra.mxu1 %v4577_v9 }
 0x3c6   :  { %1982 = vmatpush.msra.mxu2 %v4583_v7  ;;  %2002 = vmatpush.msra.mxu3 %v4589_v55 }
 0x3c7   :  { %1960 = vmatpush.msra.mxu1 %v4595_v63 }
 0x3c8   :  { %1983 = vmatpush.msra.mxu2 %v4601_v12  ;;  %2003 = vmatpush.msra.mxu3 %v4607_v13 }
 0x3c9   :  { %1961 = vmatpush.msra.mxu1 %v4613_v40 }
 0x3ca   :  { %1984 = vmatpush.msra.mxu2 %v4619_v46  ;;  %2004 = vmatpush.msra.mxu3 %v4625_v22 }
 0x41f   :  { %v1552_v43 = vpop.f32.mrf.mxu0 }
 0x420   :  { %v1595_v59 = vadd.f32 %v1552_v43, %v1510_v4  ;;  %v1572_v2 = vpop.f32.mrf.mxu1 }
 0x422   :  { %v3413_v10 = vmul.f32 -1.442695, %v1595_v59 }
 0x424   :  { %3638 = vpow2.f32 %v3413_v10 }
 0x425   :  { %v1532_v11 = vpop.f32.mrf.mxu3 }
 0x426   :  { %v1575_v38 = vadd.f32 %v1532_v11, %v1509_v21  ;;  %v1639_v14 = vpop.f32.mrf.mxu2 }
 0x427   :  { %v1640_v4 = vadd.f32 %v4755_v15, %v1639_v14 }
 0x428   :  { %v3412_v0 = vmul.f32 -1.442695, %v1575_v38 }
 0x42a   :  { %v3639_v1 = vpop.eup %3638  ;;  %3640 = vpow2.f32 %v3412_v0  ;;  %v1573_v0 = vadd.f32 %v4631_v53, %v1572_v2 }
 0x42b   :  { %v1599_v56 = vadd.f32 1.0, %v3639_v1 }
 0x42d   :  { %3642 = vrcp.f32 %v1599_v56  ;;  %v1659_v38 = vpop.f32.mrf.mxu3  ;;  %vm1605_vm3 = vweird.f32 %v1599_v56  ;;  %v1609_v14 = vand.u32 2147483647, %v1599_v56 }
 0x42f   :  { %vm1610_vm5 = vcmp.eq.f32.partialorder %v1609_v14, 8.507059e+37 }
 0x430   :  { %v3641_v18 = vpop.eup %3640 }
 0x431   :  { %v1579_v47 = vadd.f32 1.0, %v3641_v18 }
 0x433   :  { %3644 = vrcp.f32 %v1579_v47  ;;  %v3643_v36 = vpop.eup %3642  ;;  %v1591_v31 = vand.u32 2147483648, %v1579_v47  ;;  %v1589_v8 = vand.u32 2147483647, %v1579_v47  ;;  %vm1585_vm14 = vweird.f32 %v1579_v47 }
 0x434   :  { %v1601_v27 = vmul.f32 %v3643_v36, %v1599_v56  ;;  %vm1606_vm2 = vweird.f32 %v3643_v36 }
 0x435   :  { %v1592_v11 = vor.u32 1.1754944e-38, %v1591_v31  ;;  %vm1590_vm1 = vcmp.eq.f32.partialorder %v1589_v8, 8.507059e+37  ;;  %v1511_v31 = vld [vmem:[#allocation2 + $0xa8] sm:$0xff]  ;;  %vm1607_vm4 = vmor %vm1605_vm3, %vm1606_vm2 }
 0x436   :  { %v1602_v3 = vsub.f32 1.0, %v1601_v27 }
 0x438   :  { %v1603_v43 = vmul.f32 %v3643_v36, %v1602_v3  ;;  %v4762_v3 = vld [vmem:[%s5297_s1 + $0x265] ss:$0 sm:$0xff] }
 0x439   :  { %v3645_v49 = vpop.eup %3644 }
 0x43a   :  { %v1581_v24 = vmul.f32 %v3645_v49, %v1579_v47  ;;  %vm1586_vm13 = vweird.f32 %v3645_v49  ;;  %v1604_v27 = vadd.f32 %v3643_v36, %v1603_v43  ;;  %v1660_v47 = vadd.f32 %v4762_v3, %v1659_v38 }
 0x43b   :  { %vm1587_vm15 = vmor %vm1585_vm14, %vm1586_vm13 }
 0x43c   :  { %v1582_v48 = vsub.f32 1.0, %v1581_v24  ;;  %v1608_v8 = vsel %vm1607_vm4, %v3643_v36, %v1604_v27 }
 0x43e   :  { %v1583_v19 = vmul.f32 %v3645_v49, %v1582_v48  ;;  %v1611_v48 = vand.u32 2147483648, %v1599_v56 }
 0x43f   :  { %v1702_v59 = vpop.f32.mrf.mxu1 }
 0x440   :  { %v1584_v10 = vadd.f32 %v3645_v49, %v1583_v19  ;;  %v1745_v21 = vadd.f32 %v1702_v59, %v1640_v4  ;;  %v1612_v4 = vor.u32 1.1754944e-38, %v1611_v48 }
 0x442   :  { %v1588_v1 = vsel %vm1587_vm15, %v3645_v49, %v1584_v10  ;;  %v3420_v18 = vmul.f32 -1.442695, %v1745_v21  ;;  %v1613_v10 = vsel %vm1610_vm5, %v1612_v4, %v1608_v8 }
 0x443   :  { %v1593_v24 = vsel %vm1590_vm1, %v1592_v11, %v1588_v1  ;;  %v1618_v11 = vsub.f32 1.0, %v1613_v10 }
 0x444   :  { %v1615_v22 = vmul.f32 %v1593_v24, %v1573_v0  ;;  %3646 = vpow2.f32 %v3420_v18  ;;  %v1620_v0 = vmul.f32 %v1613_v10, %v4637_v44 }
 0x445   :  { %v1722_v2 = vpop.f32.mrf.mxu2 }
 0x446   :  { %v1616_v49 = vadd.f32 %v1615_v22, %v1511_v31  ;;  %v1765_v19 = vadd.f32 %v1722_v2, %v1660_v47  ;;  %v1742_v31 = vpop.f32.mrf.mxu3 }
 0x448   :  { %3648 = vtanh.f32 %v1616_v49  ;;  %v3421_v43 = vmul.f32 -1.442695, %v1765_v19 }
 0x44a   :  { %v3647_v59 = vpop.eup %3646  ;;  %3650 = vpow2.f32 %v3421_v43 }
 0x44b   :  { %v1749_v21 = vadd.f32 1.0, %v3647_v59 }
 0x44d   :  { %3652 = vrcp.f32 %v1749_v21  ;;  %v1761_v24 = vand.u32 2147483648, %v1749_v21  ;;  %v1759_v47 = vand.u32 2147483647, %v1749_v21  ;;  %vm1755_vm7 = vweird.f32 %v1749_v21 }
 0x44e   :  { %v3649_v38 = vpop.eup %3648 }
 0x44f   :  { %v1619_v56 = vmul.f32 %v3649_v38, %v1618_v11  ;;  %vm1760_vm9 = vcmp.eq.f32.partialorder %v1759_v47, 8.507059e+37 }
 0x450   :  { %v3651_v1 = vpop.eup %3650 }
 0x451   :  { %v4766_v18 = vadd.f32 1.0, %v3651_v1  ;;  %v4768_v22 = vadd.f32 %v1620_v0, %v1619_v56  ;;  %v1793_v56 = vld [vmem:[#allocation2 + $0x30] sm:$0xff] }
 0x453   :  { %v3653_v36 = vpop.eup %3652  ;;  %3654 = vrcp.f32 %v4766_v18  ;;  %3422 = vmatmul.msk.f32.vlgmr.msrb.gmra.mxu0 %vm33_vm0, %v4768_v22  ;;  %3423 = vmatmul.msk.f32.vlgmr.msrb.gmra.mxu1 %vm33_vm0, %v4768_v22  ;;  %v1781_v19 = vand.u32 2147483648, %v4766_v18  ;;  %vm1775_vm11 = vweird.f32 %v4766_v18 }
 0x454   :  { %v1751_v27 = vmul.f32 %v3653_v36, %v1749_v21  ;;  %3424 = vmatmul.msk.f32.vlgmr.msrb.gmra.mxu2 %vm33_vm0, %v4768_v22  ;;  %3427 = vmatmul.msk.f32.vlgmr.msrb.gmra.mxu3 %vm33_vm0, %v4768_v22  ;;  %vm1756_vm6 = vweird.f32 %v3653_v36 }
 0x455   :  { %2021 = vmatpush.msrb.mxu0 %v4653_v6  ;;  %2095 = vmatpush.msrb.mxu1 %v4361_v35  ;;  %v1679_v35 = vpop.f32.mrf.mxu0  ;;  %vm1757_vm8 = vmor %vm1755_vm7, %vm1756_vm6 }
 0x456   :  { %v1752_v44 = vsub.f32 1.0, %v1751_v27  ;;  %2115 = vmatpush.msrb.mxu2 %v4367_v17  ;;  %2135 = vmatpush.msrb.mxu3 %v4487_v45 }
 0x457   :  { %2022 = vmatpush.msrb.mxu0 %v4662_v37  ;;  %2096 = vmatpush.msrb.mxu1 %v4375_v41  ;;  %v1762_v41 = vor.u32 1.1754944e-38, %v1761_v24 }
 0x458   :  { %v1753_v48 = vmul.f32 %v3653_v36, %v1752_v44  ;;  %2116 = vmatpush.msrb.mxu2 %v4381_v42  ;;  %2136 = vmatpush.msrb.mxu3 %v4496_v30 }
 0x459   :  { %v3655_v14 = vpop.eup %3654  ;;  %2023 = vmatpush.msrb.mxu0 %v4671_v62  ;;  %2097 = vmatpush.msrb.mxu1 %v4389_v23  ;;  %v1743_v23 = vadd.f32 %v4714_v29, %v1742_v31 }
 0x45a   :  { %v1771_v17 = vmul.f32 %v3655_v14, %v4766_v18  ;;  %v1754_v45 = vadd.f32 %v3653_v36, %v1753_v48  ;;  %2117 = vmatpush.msrb.mxu2 %v4395_v50  ;;  %2137 = vmatpush.msrb.mxu3 %v4401_v25  ;;  %v4802_v50 = vld [vmem:[%s5297_s1 + $0x266] ss:$0 sm:$0xff]  ;;  %vm1776_vm10 = vweird.f32 %v3655_v14 }
 0x45b   :  { %3428 = vmatmul.msk.f32.vlgmr.msra.gmra.mxu0 %vm33_vm0, %v4768_v22  ;;  %3429 = vmatmul.msk.f32.vlgmr.msra.gmra.mxu1 %vm33_vm0, %v4768_v22  ;;  %v1680_v25 = vadd.f32 %v4802_v50, %v1679_v35  ;;  %vm1777_vm12 = vmor %vm1775_vm11, %vm1776_vm10 }
 0x45c   :  { %v1772_v42 = vsub.f32 1.0, %v1771_v17  ;;  %v1758_v30 = vsel %vm1757_vm8, %v3653_v36, %v1754_v45  ;;  %2024 = vmatpush.msrb.mxu0 %v4685_v60  ;;  %2098 = vmatpush.msrb.mxu1 %v4413_v51  ;;  %v1779_v51 = vand.u32 2147483647, %v4766_v18  ;;  %v1794_v18 = vld [vmem:[#allocation2 + $0x70] sm:$0xff] }
 0x45d   :  { %v1763_v2 = vsel %vm1760_vm9, %v1762_v41, %v1758_v30  ;;  %2118 = vmatpush.msrb.mxu2 %v4420_v58  ;;  %2138 = vmatpush.msrb.mxu3 %v4426_v34  ;;  %v1782_v58 = vor.u32 1.1754944e-38, %v1781_v19 }
 0x45e   :  { %2202 = vmatpush.msra.mxu0 %v4692_v33  ;;  %v1773_v49 = vmul.f32 %v3655_v14, %v1772_v42  ;;  %v1785_v8 = vmul.f32 %v1763_v2, %v1743_v23  ;;  %2222 = vmatpush.msra.mxu1 %v4516_v32  ;;  %vm1780_vm13 = vcmp.eq.f32.partialorder %v1779_v51, 8.507059e+37 }
 0x460   :  { %2203 = vmatpush.msra.mxu0 %v4701_v26  ;;  %v1774_v4 = vadd.f32 %v3655_v14, %v1773_v49  ;;  %v1786_v43 = vadd.f32 %v1785_v8, %v1680_v25  ;;  %2223 = vmatpush.msra.mxu1 %v4523_v16 }
 0x462   :  { %2204 = vmatpush.msra.mxu0 %v4708_v20  ;;  %v1778_v59 = vsel %vm1777_vm12, %v3655_v14, %v1774_v4  ;;  %3656 = vtanh.f32 %v1786_v43  ;;  %2224 = vmatpush.msra.mxu1 %v4530_v54 }
 0x463   :  { %v1783_v34 = vsel %vm1780_vm13, %v1782_v58, %v1778_v59 }
 0x464   :  { %2205 = vmatpush.msra.mxu0 %v4721_v39  ;;  %2225 = vmatpush.msra.mxu1 %v4537_v28  ;;  %v1788_v10 = vsub.f32 1.0, %v1783_v34  ;;  %v1790_v38 = vmul.f32 %v1783_v34, %v4730_v52  ;;  %v5303_v52 = vld [vmem:[#allocation4_spill] sm:$0xff] }
 0x468   :  { %v3657_v21 = vpop.eup %3656 }
 0x469   :  { %v1789_v11 = vmul.f32 %v3657_v21, %v1788_v10 }
 0x46b   :  { %v4819_v0 = vadd.f32 %v1790_v38, %v1789_v11 }
 0x46d   :  { %1792 = vst.msk [vmem:[#allocation3 + $0x20] sm:$0xff] %vm33_vm0, %v4819_v0  ;;  %3430 = vmatmul.msk.f32.vlgmr.msra.gmra.mxu2 %vm33_vm0, %v4819_v0  ;;  %3431 = vmatmul.msk.f32.vlgmr.msra.gmra.mxu3 %vm33_vm0, %v4819_v0 }
 0x46e   :  { %3432 = vmatmul.msk.f32.vlgmr.msrb.gmra.mxu0 %vm33_vm0, %v4819_v0  ;;  %2242 = vmatpush.msra.mxu2 %v4559_v61 }
 0x46f   :  { %2265 = vmatpush.msra.mxu3 %v4565_v57  ;;  %2285 = vmatpush.msrb.mxu0 %v4571_v5 }
 0x470   :  { %2243 = vmatpush.msra.mxu2 %v4577_v9 }
 0x471   :  { %2266 = vmatpush.msra.mxu3 %v4583_v7  ;;  %2286 = vmatpush.msrb.mxu0 %v4589_v55 }
 0x472   :  { %2244 = vmatpush.msra.mxu2 %v4595_v63 }
 0x473   :  { %2267 = vmatpush.msra.mxu3 %v4601_v12  ;;  %2287 = vmatpush.msrb.mxu0 %v4607_v13 }
 0x474   :  { %2245 = vmatpush.msra.mxu2 %v4613_v40 }
 0x475   :  { %2268 = vmatpush.msra.mxu3 %v4619_v46  ;;  %2288 = vmatpush.msrb.mxu0 %v5303_v52 }
 0x4d0   :  { %v1816_v1 = vpop.f32.mrf.mxu0  ;;  %v1836_v36 = vpop.f32.mrf.mxu1 }
 0x4d1   :  { %v1859_v27 = vadd.f32 %v1816_v1, %v1793_v56  ;;  %v1879_v44 = vadd.f32 %v1836_v36, %v1794_v18  ;;  %v1795_v36 = vld [vmem:[#allocation2 + $0xb0] sm:$0xff] }
 0x4d3   :  { %v3425_v24 = vmul.f32 -1.442695, %v1859_v27  ;;  %v3426_v48 = vmul.f32 -1.442695, %v1879_v44 }
 0x4d5   :  { %3658 = vpow2.f32 %v3425_v24 }
 0x4d6   :  { %3660 = vpow2.f32 %v3426_v48 }
 0x4d7   :  { %v1856_v25 = vpop.f32.mrf.mxu2  ;;  %v1923_v49 = vpop.f32.mrf.mxu3 }
 0x4d8   :  { %v1943_v58 = vpop.f32.mrf.mxu0  ;;  %v1857_v59 = vadd.f32 %v4631_v53, %v1856_v25  ;;  %v1924_v56 = vadd.f32 %v4755_v15, %v1923_v49 }
 0x4d9   :  { %v1944_v1 = vadd.f32 %v4762_v3, %v1943_v58 }
 0x4db   :  { %v3659_v47 = vpop.eup %3658 }
 0x4dc   :  { %v3661_v14 = vpop.eup %3660  ;;  %v1863_v31 = vadd.f32 1.0, %v3659_v47 }
 0x4dd   :  { %v1883_v35 = vadd.f32 1.0, %v3661_v14 }
 0x4de   :  { %3662 = vrcp.f32 %v1863_v31  ;;  %v1875_v2 = vand.u32 2147483648, %v1863_v31  ;;  %v1873_v8 = vand.u32 2147483647, %v1863_v31  ;;  %vm1869_vm15 = vweird.f32 %v1863_v31 }
 0x4df   :  { %3664 = vrcp.f32 %v1883_v35  ;;  %v1895_v11 = vand.u32 2147483648, %v1883_v35  ;;  %vm1889_vm4 = vweird.f32 %v1883_v35  ;;  %v1893_v18 = vand.u32 2147483647, %v1883_v35 }
 0x4e0   :  { %v1876_v43 = vor.u32 1.1754944e-38, %v1875_v2  ;;  %vm1874_vm2 = vcmp.eq.f32.partialorder %v1873_v8, 8.507059e+37 }
 0x4e1   :  { %vm1894_vm6 = vcmp.eq.f32.partialorder %v1893_v18, 8.507059e+37 }
 0x4e4   :  { %v3663_v17 = vpop.eup %3662 }
 0x4e5   :  { %v3665_v45 = vpop.eup %3664  ;;  %v1865_v41 = vmul.f32 %v3663_v17, %v1863_v31  ;;  %vm1870_vm14 = vweird.f32 %v3663_v17  ;;  %v1896_v31 = vor.u32 1.1754944e-38, %v1895_v11 }
 0x4e6   :  { %v1885_v42 = vmul.f32 %v3665_v45, %v1883_v35  ;;  %vm1871_vm1 = vmor %vm1869_vm15, %vm1870_vm14  ;;  %vm1890_vm3 = vweird.f32 %v3665_v45 }
 0x4e7   :  { %v1866_v23 = vsub.f32 1.0, %v1865_v41  ;;  %vm1891_vm5 = vmor %vm1889_vm4, %vm1890_vm3 }
 0x4e8   :  { %v1886_v30 = vsub.f32 1.0, %v1885_v42 }
 0x4e9   :  { %v1867_v19 = vmul.f32 %v3663_v17, %v1866_v23 }
 0x4ea   :  { %v1887_v51 = vmul.f32 %v3665_v45, %v1886_v30 }
 0x4eb   :  { %v1868_v4 = vadd.f32 %v3663_v17, %v1867_v19 }
 0x4ec   :  { %v1888_v10 = vadd.f32 %v3665_v45, %v1887_v51 }
 0x4ed   :  { %v1872_v34 = vsel %vm1871_vm1, %v3663_v17, %v1868_v4 }
 0x4ee   :  { %v1877_v21 = vsel %vm1874_vm2, %v1876_v43, %v1872_v34  ;;  %v1892_v14 = vsel %vm1891_vm5, %v3665_v45, %v1888_v10 }
 0x4ef   :  { %v1899_v38 = vmul.f32 %v1877_v21, %v1857_v59  ;;  %v1897_v42 = vsel %vm1894_vm6, %v1896_v31, %v1892_v14  ;;  %v2544_v14 = vld [vmem:[%s5297_s1 + $0x188] sm:$0xff] }
 0x4f0   :  { %v1986_v27 = vpop.f32.mrf.mxu2  ;;  %v2006_v44 = vpop.f32.mrf.mxu3  ;;  %v1902_v23 = vsub.f32 1.0, %v1897_v42  ;;  %v1904_v35 = vmul.f32 %v1897_v42, %v4768_v22 }
 0x4f1   :  { %v1900_v24 = vadd.f32 %v1899_v38, %v1795_v36  ;;  %v2029_v48 = vadd.f32 %v1986_v27, %v1924_v56  ;;  %v2049_v47 = vadd.f32 %v2006_v44, %v1944_v1  ;;  %v2078_v36 = vld [vmem:[#allocation2 + $0x78] sm:$0xff] }
 0x4f3   :  { %3666 = vtanh.f32 %v1900_v24  ;;  %v3433_v17 = vmul.f32 -1.442695, %v2029_v48  ;;  %v3434_v41 = vmul.f32 -1.442695, %v2049_v47 }
 0x4f5   :  { %3668 = vpow2.f32 %v3433_v17 }
 0x4f6   :  { %3670 = vpow2.f32 %v3434_v41  ;;  %v2543_v41 = vld [vmem:[%s5297_s1 + $0x180] sm:$0xff] }
 0x4f9   :  { %v3667_v30 = vpop.eup %3666 }
 0x4fa   :  { %v1903_v25 = vmul.f32 %v3667_v30, %v1902_v23 }
 0x4fb   :  { %v3669_v2 = vpop.eup %3668 }
 0x4fc   :  { %v3671_v49 = vpop.eup %3670  ;;  %v4845_v19 = vadd.f32 %v1904_v35, %v1903_v25  ;;  %v2033_v8 = vadd.f32 1.0, %v3669_v2 }
 0x4fd   :  { %v4847_v51 = vadd.f32 1.0, %v3671_v49 }
 0x4fe   :  { %3672 = vrcp.f32 %v2033_v8  ;;  %3435 = vmatmul.msk.f32.vlgmr.msrb.gmra.mxu1 %vm33_vm0, %v4845_v19  ;;  %3436 = vmatmul.msk.f32.vlgmr.msrb.gmra.mxu2 %vm33_vm0, %v4845_v19  ;;  %vm2039_vm8 = vweird.f32 %v2033_v8 }
 0x4ff   :  { %3674 = vrcp.f32 %v4847_v51  ;;  %3437 = vmatmul.msk.f32.vlgmr.msrb.gmra.mxu3 %vm33_vm0, %v4845_v19  ;;  %3440 = vmatmul.msk.f32.vlgmr.msra.gmra.mxu0 %vm33_vm0, %v4845_v19  ;;  %vm2059_vm12 = vweird.f32 %v4847_v51 }
 0x500   :  { %2305 = vmatpush.msrb.mxu1 %v4653_v6  ;;  %2376 = vmatpush.msrb.mxu2 %v4692_v33  ;;  %v2026_v33 = vpop.f32.mrf.mxu0 }
 0x501   :  { %2396 = vmatpush.msrb.mxu3 %v4516_v32  ;;  %2416 = vmatpush.msra.mxu0 %v4559_v61  ;;  %v2045_v61 = vand.u32 2147483648, %v2033_v8 }
 0x502   :  { %2306 = vmatpush.msrb.mxu1 %v4662_v37  ;;  %2377 = vmatpush.msrb.mxu2 %v4701_v26 }
 0x503   :  { %2397 = vmatpush.msrb.mxu3 %v4523_v16  ;;  %2417 = vmatpush.msra.mxu0 %v4577_v9 }
 0x504   :  { %v3673_v22 = vpop.eup %3672  ;;  %2307 = vmatpush.msrb.mxu1 %v4671_v62  ;;  %2378 = vmatpush.msrb.mxu2 %v4708_v20 }
 0x505   :  { %v3675_v45 = vpop.eup %3674  ;;  %v2035_v4 = vmul.f32 %v3673_v22, %v2033_v8  ;;  %2398 = vmatpush.msrb.mxu3 %v4530_v54  ;;  %2418 = vmatpush.msra.mxu0 %v4595_v63  ;;  %vm2040_vm7 = vweird.f32 %v3673_v22  ;;  %v2043_v63 = vand.u32 2147483647, %v2033_v8 }
 0x506   :  { %v2055_v32 = vmul.f32 %v3675_v45, %v4847_v51  ;;  %3441 = vmatmul.msk.f32.vlgmr.msra.gmra.mxu1 %vm33_vm0, %v4845_v19  ;;  %3442 = vmatmul.msk.f32.vlgmr.msra.gmra.mxu2 %vm33_vm0, %v4845_v19  ;;  %vm2041_vm9 = vmor %vm2039_vm8, %vm2040_vm7  ;;  %vm2060_vm11 = vweird.f32 %v3675_v45 }
 0x507   :  { %v2036_v16 = vsub.f32 1.0, %v2035_v4  ;;  %2308 = vmatpush.msrb.mxu1 %v4685_v60  ;;  %2379 = vmatpush.msrb.mxu2 %v4721_v39  ;;  %v1963_v39 = vpop.f32.mrf.mxu1  ;;  %vm2044_vm10 = vcmp.eq.f32.partialorder %v2043_v63, 8.507059e+37  ;;  %vm2061_vm13 = vmor %vm2059_vm12, %vm2060_vm11 }
 0x508   :  { %v2056_v9 = vsub.f32 1.0, %v2055_v32  ;;  %2399 = vmatpush.msrb.mxu3 %v4537_v28  ;;  %2419 = vmatpush.msra.mxu0 %v4613_v40  ;;  %v2046_v28 = vor.u32 1.1754944e-38, %v2045_v61  ;;  %v2027_v40 = vadd.f32 %v4714_v29, %v2026_v33  ;;  %v1964_v58 = vadd.f32 %v4802_v50, %v1963_v39 }
 0x509   :  { %v2037_v54 = vmul.f32 %v3673_v22, %v2036_v16  ;;  %2439 = vmatpush.msra.mxu1 %v4565_v57  ;;  %2459 = vmatpush.msra.mxu2 %v4571_v5 }
 0x50a   :  { %v2057_v26 = vmul.f32 %v3675_v45, %v2056_v9 }
 0x50b   :  { %v2038_v20 = vadd.f32 %v3673_v22, %v2037_v54  ;;  %2440 = vmatpush.msra.mxu1 %v4583_v7  ;;  %2460 = vmatpush.msra.mxu2 %v4589_v55  ;;  %v2065_v7 = vand.u32 2147483648, %v4847_v51  ;;  %v2063_v55 = vand.u32 2147483647, %v4847_v51 }
 0x50c   :  { %v2058_v5 = vadd.f32 %v3675_v45, %v2057_v26 }
 0x50d   :  { %v2042_v43 = vsel %vm2041_vm9, %v3673_v22, %v2038_v20  ;;  %2441 = vmatpush.msra.mxu1 %v4601_v12  ;;  %2461 = vmatpush.msra.mxu2 %v4607_v13  ;;  %v2066_v13 = vor.u32 1.1754944e-38, %v2065_v7  ;;  %vm2064_vm14 = vcmp.eq.f32.partialorder %v2063_v55, 8.507059e+37  ;;  %v2079_v20 = vld [vmem:[#allocation2 + $0xb8] sm:$0xff] }
 0x50e   :  { %v2047_v57 = vsel %vm2044_vm10, %v2046_v28, %v2042_v43  ;;  %v2062_v12 = vsel %vm2061_vm13, %v3675_v45, %v2058_v5 }
 0x50f   :  { %v2069_v59 = vmul.f32 %v2047_v57, %v2027_v40  ;;  %2442 = vmatpush.msra.mxu1 %v4619_v46  ;;  %2462 = vmatpush.msra.mxu2 %v5303_v52  ;;  %v2067_v10 = vsel %vm2064_vm14, %v2066_v13, %v2062_v12  ;;  %v2077_v46 = vld [vmem:[#allocation2 + $0x38] sm:$0xff] }
 0x510   :  { %v2072_v21 = vsub.f32 1.0, %v2067_v10  ;;  %v2074_v56 = vmul.f32 %v2067_v10, %v4819_v0 }
 0x511   :  { %v2070_v34 = vadd.f32 %v2069_v59, %v1964_v58 }
 0x513   :  { %3676 = vtanh.f32 %v2070_v34 }
 0x519   :  { %v3677_v11 = vpop.eup %3676 }
 0x51a   :  { %v2073_v38 = vmul.f32 %v3677_v11, %v2072_v21 }
 0x51c   :  { %v4893_v1 = vadd.f32 %v2074_v56, %v2073_v38 }
 0x51e   :  { %2076 = vst.msk [vmem:[#allocation3 + $0x28] sm:$0xff] %vm33_vm0, %v4893_v1  ;;  %3443 = vmatmul.msk.f32.vlgmr.msra.gmra.mxu3 %vm33_vm0, %v4893_v1  ;;  %3444 = vmatmul.msk.f32.vlgmr.msrb.gmra.mxu0 %vm33_vm0, %v4893_v1 }
 0x51f   :  { %3445 = vmatmul.msk.f32.vlgmr.msrb.gmra.mxu1 %vm33_vm0, %v4893_v1  ;;  %2479 = vmatpush.msra.mxu3 %v4653_v6  ;;  %v2546_v6 = vld [vmem:[%s5297_s1 + $0x198] sm:$0xff] }
 0x520   :  { %2585 = vmatpush.msrb.mxu0 %v2546_v6 }
 0x521   :  { %2480 = vmatpush.msra.mxu3 %v4662_v37 }
 0x523   :  { %2481 = vmatpush.msra.mxu3 %v4671_v62  ;;  %v2545_v62 = vld [vmem:[%s5297_s1 + $0x190] sm:$0xff] }
 0x524   :  { %2586 = vmatpush.msrb.mxu0 %v2545_v62 }
 0x525   :  { %2482 = vmatpush.msra.mxu3 %v4685_v60 }
 0x526   :  { %2587 = vmatpush.msrb.mxu0 %v2544_v14 }
 0x528   :  { %2588 = vmatpush.msrb.mxu0 %v2543_v41 }
 0x57b   :  { %v2100_v0 = vpop.f32.mrf.mxu1 }
 0x57c   :  { %v2143_v52 = vadd.f32 %v2100_v0, %v2077_v46  ;;  %v2207_v23 = vpop.f32.mrf.mxu0 }
 0x57d   :  { %v2208_v58 = vadd.f32 %v4755_v15, %v2207_v23 }
 0x57e   :  { %v3438_v18 = vmul.f32 -1.442695, %v2143_v52  ;;  %v2535_v52 = vld [vmem:[#allocation3] sm:$0xff] }
 0x580   :  { %3678 = vpow2.f32 %v3438_v18 }
 0x581   :  { %v2120_v27 = vpop.f32.mrf.mxu2 }
 0x582   :  { %v2163_v44 = vadd.f32 %v2120_v27, %v2078_v36  ;;  %v2140_v49 = vpop.f32.mrf.mxu3 }
 0x583   :  { %v2227_v22 = vpop.f32.mrf.mxu1  ;;  %v2141_v32 = vadd.f32 %v4631_v53, %v2140_v49 }
 0x584   :  { %v3439_v24 = vmul.f32 -1.442695, %v2163_v44  ;;  %v2228_v9 = vadd.f32 %v4762_v3, %v2227_v22 }
 0x586   :  { %v3679_v48 = vpop.eup %3678  ;;  %3680 = vpow2.f32 %v3439_v24 }
 0x587   :  { %v2147_v47 = vadd.f32 1.0, %v3679_v48 }
 0x589   :  { %3682 = vrcp.f32 %v2147_v47  ;;  %v2159_v30 = vand.u32 2147483648, %v2147_v47  ;;  %v2157_v35 = vand.u32 2147483647, %v2147_v47  ;;  %vm2153_vm1 = vweird.f32 %v2147_v47 }
 0x58b   :  { %v2160_v45 = vor.u32 1.1754944e-38, %v2159_v30  ;;  %vm2158_vm3 = vcmp.eq.f32.partialorder %v2157_v35, 8.507059e+37 }
 0x58c   :  { %v3681_v37 = vpop.eup %3680 }
 0x58d   :  { %v2167_v60 = vadd.f32 1.0, %v3681_v37 }
 0x58f   :  { %v3683_v31 = vpop.eup %3682  ;;  %3684 = vrcp.f32 %v2167_v60  ;;  %v2179_v63 = vand.u32 2147483648, %v2167_v60  ;;  %v2177_v26 = vand.u32 2147483647, %v2167_v60  ;;  %vm2173_vm5 = vweird.f32 %v2167_v60 }
 0x590   :  { %v2149_v17 = vmul.f32 %v3683_v31, %v2147_v47  ;;  %vm2154_vm15 = vweird.f32 %v3683_v31  ;;  %v2536_v47 = vld [vmem:[#allocation3 + $0x8] sm:$0xff] }
 0x591   :  { %vm2155_vm2 = vmor %vm2153_vm1, %vm2154_vm15  ;;  %v2180_v57 = vor.u32 1.1754944e-38, %v2179_v63  ;;  %vm2178_vm7 = vcmp.eq.f32.partialorder %v2177_v26, 8.507059e+37  ;;  %v2539_v63 = vld [vmem:[#allocation3 + $0x20] sm:$0xff]  ;;  %v2641_v26 = vld [vmem:[%s5297_s1 + $0x1b8] sm:$0xff] }
 0x592   :  { %v2150_v42 = vsub.f32 1.0, %v2149_v17  ;;  %2680 = vmatpush.msrb.mxu1 %v2641_v26  ;;  %v3797_v26 = vld [vmem:[%s5297_s1 + $0x267] ss:$0 sm:$0xff] }
 0x594   :  { %v2151_v25 = vmul.f32 %v3683_v31, %v2150_v42 }
 0x595   :  { %v3685_v2 = vpop.eup %3684 }
 0x596   :  { %v2169_v8 = vmul.f32 %v3685_v2, %v2167_v60  ;;  %v2152_v51 = vadd.f32 %v3683_v31, %v2151_v25  ;;  %vm2174_vm4 = vweird.f32 %v3685_v2 }
 0x597   :  { %vm2175_vm6 = vmor %vm2173_vm5, %vm2174_vm4 }
 0x598   :  { %v2170_v4 = vsub.f32 1.0, %v2169_v8  ;;  %v2156_v16 = vsel %vm2155_vm2, %v3683_v31, %v2152_v51  ;;  %v2247_v31 = vpop.f32.mrf.mxu2  ;;  %v2537_v8 = vld [vmem:[#allocation3 + $0x10] sm:$0xff] }
 0x599   :  { %v2161_v61 = vsel %vm2158_vm3, %v2160_v45, %v2156_v16  ;;  %v2248_v25 = vadd.f32 %v4802_v50, %v2247_v31 }
 0x59a   :  { %v2171_v54 = vmul.f32 %v3685_v2, %v2170_v4  ;;  %v2183_v33 = vmul.f32 %v2161_v61, %v2141_v32  ;;  %v2538_v4 = vld [vmem:[#allocation3 + $0x18] sm:$0xff] }
 0x59b   :  { %v2290_v39 = vpop.f32.mrf.mxu0 }
 0x59c   :  { %v2172_v28 = vadd.f32 %v3685_v2, %v2171_v54  ;;  %v2184_v40 = vadd.f32 %v2183_v33, %v2079_v20  ;;  %v2333_v43 = vadd.f32 %v2290_v39, %v2228_v9  ;;  %v2310_v60 = vpop.f32.mrf.mxu1  ;;  %v2540_v33 = vld [vmem:[#allocation3 + $0x28] sm:$0xff]  ;;  %v2640_v20 = vld [vmem:[%s5297_s1 + $0x1b0] sm:$0xff] }
 0x59d   :  { %v2311_v41 = vadd.f32 %v4714_v29, %v2310_v60  ;;  %2681 = vmatpush.msrb.mxu1 %v2640_v20  ;;  %v2639_v39 = vld [vmem:[%s5297_s1 + $0x1a8] sm:$0xff] }
 0x59e   :  { %v2176_v5 = vsel %vm2175_vm6, %v3685_v2, %v2172_v28  ;;  %3686 = vtanh.f32 %v2184_v40  ;;  %v3447_v53 = vmul.f32 -1.442695, %v2333_v43  ;;  %v2638_v28 = vld [vmem:[%s5297_s1 + $0x1a0] sm:$0xff]  ;;  %v4967_v43 = vld [vmem:[%s5297_s1 + $0x268] ss:$0 sm:$0xff] }
 0x59f   :  { %v2181_v59 = vsel %vm2178_vm7, %v2180_v57, %v2176_v5  ;;  %2682 = vmatpush.msrb.mxu1 %v2639_v39 }
 0x5a0   :  { %3688 = vpow2.f32 %v3447_v53  ;;  %v2186_v34 = vsub.f32 1.0, %v2181_v59  ;;  %v2188_v21 = vmul.f32 %v2181_v59, %v4845_v19 }
 0x5a1   :  { %v2270_v7 = vpop.f32.mrf.mxu3  ;;  %2683 = vmatpush.msrb.mxu1 %v2638_v28 }
 0x5a2   :  { %v2313_v55 = vadd.f32 %v2270_v7, %v2208_v58 }
 0x5a4   :  { %v3687_v12 = vpop.eup %3686  ;;  %v3446_v13 = vmul.f32 -1.442695, %v2313_v55 }
 0x5a5   :  { %v2187_v10 = vmul.f32 %v3687_v12, %v2186_v34 }
 0x5a6   :  { %v3689_v11 = vpop.eup %3688  ;;  %3690 = vpow2.f32 %v3446_v13 }
 0x5a7   :  { %v2337_v38 = vadd.f32 1.0, %v3689_v11  ;;  %v2189_v56 = vadd.f32 %v2188_v21, %v2187_v10 }
 0x5a9   :  { %3448 = vmatmul.msk.f32.vlgmr.msrb.gmra.mxu2 %vm33_vm0, %v2189_v56  ;;  %3328 = vst.msk [vmem:[%s5299_s2 + $0xc0] sm:$0xff] %vm33_vm0, %v2189_v56  ;;  %3449 = vmatmul.msk.f32.vlgmr.msrb.gmra.mxu3 %vm33_vm0, %v2189_v56  ;;  %3692 = vrcp.f32 %v2337_v38  ;;  %v2349_v35 = vand.u32 2147483648, %v2337_v38  ;;  %vm2343_vm13 = vweird.f32 %v2337_v38  ;;  %v2347_v49 = vand.u32 2147483647, %v2337_v38 }
 0x5aa   :  { %3450 = vmatmul.msk.f32.vlgmr.msra.gmra.mxu0 %vm33_vm0, %v2189_v56 }
 0x5ab   :  { %v2350_v45 = vor.u32 1.1754944e-38, %v2349_v35  ;;  %vm2348_vm15 = vcmp.eq.f32.partialorder %v2347_v49, 8.507059e+37  ;;  %v2736_v49 = vld [vmem:[%s5297_s1 + $0x1d8] sm:$0xff] }
 0x5ac   :  { %v3691_v46 = vpop.eup %3690  ;;  %2775 = vmatpush.msrb.mxu2 %v2736_v49 }
 0x5ad   :  { %v2317_v0 = vadd.f32 1.0, %v3691_v46 }
 0x5af   :  { %3694 = vrcp.f32 %v2317_v0  ;;  %v3693_v19 = vpop.eup %3692  ;;  %v2329_v48 = vand.u32 2147483648, %v2317_v0  ;;  %v2327_v37 = vand.u32 2147483647, %v2317_v0  ;;  %vm2323_vm9 = vweird.f32 %v2317_v0 }
 0x5b0   :  { %v2339_v18 = vmul.f32 %v3693_v19, %v2337_v38  ;;  %vm2344_vm12 = vweird.f32 %v3693_v19 }
 0x5b1   :  { %v2330_v17 = vor.u32 1.1754944e-38, %v2329_v48  ;;  %vm2328_vm11 = vcmp.eq.f32.partialorder %v2327_v37, 8.507059e+37  ;;  %vm2345_vm14 = vmor %vm2343_vm13, %vm2344_vm12 }
 0x5b2   :  { %3456 = vmatmul.msk.f32.vlgmr.msrb.gmra.mxu0 %vm33_vm0, %v2535_v52  ;;  %v2340_v44 = vsub.f32 1.0, %v2339_v18 }
 0x5b4   :  { %v2341_v62 = vmul.f32 %v3693_v19, %v2340_v44 }
 0x5b5   :  { %v3695_v36 = vpop.eup %3694 }
 0x5b6   :  { %v2319_v27 = vmul.f32 %v3695_v36, %v2317_v0  ;;  %vm2324_vm8 = vweird.f32 %v3695_v36  ;;  %v2342_v23 = vadd.f32 %v3693_v19, %v2341_v62 }
 0x5b7   :  { %vm2325_vm10 = vmor %vm2323_vm9, %vm2324_vm8 }
 0x5b8   :  { %v2320_v24 = vsub.f32 1.0, %v2319_v27  ;;  %v2346_v22 = vsel %vm2345_vm14, %v3693_v19, %v2342_v23 }
 0x5b9   :  { %v2351_v29 = vsel %vm2348_vm15, %v2350_v45, %v2346_v22 }
 0x5ba   :  { %v2321_v6 = vmul.f32 %v3695_v36, %v2320_v24  ;;  %3457 = vmatmul.msk.f32.gmra.mxu0 %vm33_vm0, %v2536_v47  ;;  %v2356_v32 = vsub.f32 1.0, %v2351_v29  ;;  %v2358_v9 = vmul.f32 %v2351_v29, %v4893_v1 }
 0x5bc   :  { %v2322_v14 = vadd.f32 %v3695_v36, %v2321_v6 }
 0x5be   :  { %v2326_v42 = vsel %vm2325_vm10, %v3695_v36, %v2322_v14 }
 0x5bf   :  { %v2331_v30 = vsel %vm2328_vm11, %v2330_v17, %v2326_v42 }
 0x5c0   :  { %v2353_v2 = vmul.f32 %v2331_v30, %v2311_v41 }
 0x5c2   :  { %3458 = vmatmul.msk.f32.gmra.mxu0 %vm33_vm0, %v2537_v8  ;;  %v2354_v51 = vadd.f32 %v2353_v2, %v2248_v25  ;;  %v2807_v8 = vld [vmem:[%s5297_s1 + $0x1f8] sm:$0xff] }
 0x5c3   :  { %2822 = vmatpush.msrb.mxu3 %v2807_v8 }
 0x5c4   :  { %3696 = vtanh.f32 %v2354_v51 }
 0x5ca   :  { %v3697_v16 = vpop.eup %3696  ;;  %3459 = vmatmul.msk.f32.gmra.mxu0 %vm33_vm0, %v2538_v4 }
 0x5cb   :  { %v2357_v61 = vmul.f32 %v3697_v16, %v2356_v32 }
 0x5cd   :  { %v4937_v54 = vadd.f32 %v2358_v9, %v2357_v61 }
 0x5cf   :  { %2360 = vst.msk [vmem:[#allocation3 + $0x30] sm:$0xff] %vm33_vm0, %v4937_v54  ;;  %3451 = vmatmul.msk.f32.vlgmr.msra.gmra.mxu1 %vm33_vm0, %v4937_v54  ;;  %3452 = vmatmul.msk.f32.vlgmr.msra.gmra.mxu2 %vm33_vm0, %v4937_v54 }
 0x5d0   :  { %3453 = vmatmul.msk.f32.vlgmr.msra.gmra.mxu3 %vm33_vm0, %v4937_v54 }
 0x5d2   :  { %3460 = vmatmul.msk.f32.gmra.mxu0 %vm33_vm0, %v2539_v63 }
 0x5d6   :  { %v2541_v1 = vld [vmem:[#allocation3 + $0x30] sm:$0xff] }
 0x5da   :  { %3461 = vmatmul.msk.f32.gmra.mxu0 %vm33_vm0, %v2540_v33 }
 0x5e2   :  { %3462 = vmatmul.msk.f32.gmra.mxu0 %vm33_vm0, %v2541_v1 }
 0x627   :  { %v4962_v40 = vpop.f32.mrf.mxu0 }
 0x628   :  { %v2422_v28 = vadd.f32 %v4802_v50, %v4962_v40 }
 0x62c   :  { %v2381_v38 = vpop.f32.mrf.mxu2  ;;  %v2401_v36 = vpop.f32.mrf.mxu3 }
 0x62d   :  { %v2382_v0 = vadd.f32 %v4755_v15, %v2381_v38  ;;  %v2402_v48 = vadd.f32 %v4762_v3, %v2401_v36 }
 0x62f   :  { %v2590_v57 = vpop.f32.mrf.mxu0 }
 0x630   :  { %v2591_v5 = vadd.f32 %v4967_v43, %v2590_v57 }
 0x632   :  { %vm2614_vm1 = vcmp.ge.f32.partialorder %v2591_v5, 0.0  ;;  %v2622_v53 = vmul.f32 0.25, %v2591_v5 }
 0x634   :  { %v2630_v58 = vsel %vm2614_vm1, %v2591_v5, %v2622_v53 }
 0x635   :  { %3464 = vmatmul.msk.f32.vlgmr.msrb.gmra.mxu1 %vm33_vm0, %v2630_v58 }
 0x637   :  { %v2593_v59 = vpop.f32.mrf.mxu0 }
 0x638   :  { %v2594_v7 = vadd.f32 %v4967_v43, %v2593_v59 }
 0x63a   :  { %v2623_v55 = vmul.f32 0.25, %v2594_v7  ;;  %vm2615_vm2 = vcmp.ge.f32.partialorder %v2594_v7, 0.0 }
 0x63c   :  { %v2631_v34 = vsel %vm2615_vm2, %v2594_v7, %v2623_v55 }
 0x63d   :  { %3465 = vmatmul.msk.f32.gmra.mxu1 %vm33_vm0, %v2631_v34 }
 0x63f   :  { %v2596_v12 = vpop.f32.mrf.mxu0 }
 0x640   :  { %v2597_v13 = vadd.f32 %v4967_v43, %v2596_v12 }
 0x642   :  { %vm2616_vm3 = vcmp.ge.f32.partialorder %v2597_v13, 0.0  ;;  %v2624_v10 = vmul.f32 0.25, %v2597_v13 }
 0x644   :  { %v2632_v21 = vsel %vm2616_vm3, %v2597_v13, %v2624_v10 }
 0x645   :  { %3466 = vmatmul.msk.f32.gmra.mxu1 %vm33_vm0, %v2632_v21 }
 0x647   :  { %v2599_v11 = vpop.f32.mrf.mxu0 }
 0x648   :  { %v2600_v56 = vadd.f32 %v4967_v43, %v2599_v11 }
 0x64a   :  { %vm2617_vm4 = vcmp.ge.f32.partialorder %v2600_v56, 0.0  ;;  %v2625_v46 = vmul.f32 0.25, %v2600_v56 }
 0x64c   :  { %v2444_v19 = vpop.f32.mrf.mxu1  ;;  %v2633_v52 = vsel %vm2617_vm4, %v2600_v56, %v2625_v46  ;;  %v2735_v56 = vld [vmem:[%s5297_s1 + $0x1d0] sm:$0xff] }
 0x64d   :  { %v2487_v18 = vadd.f32 %v2444_v19, %v2382_v0  ;;  %3467 = vmatmul.msk.f32.gmra.mxu1 %vm33_vm0, %v2633_v52  ;;  %v2806_v46 = vld [vmem:[%s5297_s1 + $0x1f0] sm:$0xff]  ;;  %2776 = vmatpush.msrb.mxu2 %v2735_v56  ;;  %v2805_v0 = vld [vmem:[%s5297_s1 + $0x1e8] sm:$0xff]  ;;  %v2733_v19 = vld [vmem:[%s5297_s1 + $0x1c0] sm:$0xff] }
 0x64e   :  { %2823 = vmatpush.msrb.mxu3 %v2806_v46  ;;  %v2804_v52 = vld [vmem:[%s5297_s1 + $0x1e0] sm:$0xff] }
 0x64f   :  { %v3454_v27 = vmul.f32 -1.442695, %v2487_v18  ;;  %v2602_v44 = vpop.f32.mrf.mxu0  ;;  %v5024_v18 = vld [vmem:[%s5297_s1 + $0x269] ss:$0 sm:$0xff] }
 0x650   :  { %v2603_v24 = vadd.f32 %v4967_v43, %v2602_v44  ;;  %2824 = vmatpush.msrb.mxu3 %v2805_v0 }
 0x651   :  { %3698 = vpow2.f32 %v3454_v27 }
 0x652   :  { %vm2618_vm5 = vcmp.ge.f32.partialorder %v2603_v24, 0.0  ;;  %v2626_v47 = vmul.f32 0.25, %v2603_v24  ;;  %v2464_v6 = vpop.f32.mrf.mxu2  ;;  %2825 = vmatpush.msrb.mxu3 %v2804_v52 }
 0x653   :  { %v2507_v37 = vadd.f32 %v2464_v6, %v2402_v48  ;;  %v2484_v61 = vpop.f32.mrf.mxu3 }
 0x654   :  { %v2634_v62 = vsel %vm2618_vm5, %v2603_v24, %v2626_v47  ;;  %v2485_v20 = vadd.f32 %v3797_v26, %v2484_v61  ;;  %v5069_v26 = vld [vmem:[%s5297_s1 + $0x26b] ss:$0 sm:$0xff] }
 0x655   :  { %v3455_v60 = vmul.f32 -1.442695, %v2507_v37  ;;  %3468 = vmatmul.msk.f32.gmra.mxu1 %vm33_vm0, %v2634_v62 }
 0x657   :  { %v3699_v15 = vpop.eup %3698  ;;  %3700 = vpow2.f32 %v3455_v60  ;;  %v2605_v14 = vpop.f32.mrf.mxu0 }
 0x658   :  { %v2491_v31 = vadd.f32 1.0, %v3699_v15  ;;  %v2606_v17 = vadd.f32 %v4967_v43, %v2605_v14 }
 0x65a   :  { %3702 = vrcp.f32 %v2491_v31  ;;  %vm2619_vm6 = vcmp.ge.f32.partialorder %v2606_v17, 0.0  ;;  %v2627_v41 = vmul.f32 0.25, %v2606_v17  ;;  %v2503_v45 = vand.u32 2147483648, %v2491_v31 }
 0x65b   :  { %v2501_v4 = vand.u32 2147483647, %v2491_v31  ;;  %vm2497_vm9 = vweird.f32 %v2491_v31 }
 0x65c   :  { %v2635_v3 = vsel %vm2619_vm6, %v2606_v17, %v2627_v41  ;;  %v2504_v33 = vor.u32 1.1754944e-38, %v2503_v45 }
 0x65d   :  { %v3701_v42 = vpop.eup %3700  ;;  %3469 = vmatmul.msk.f32.gmra.mxu1 %vm33_vm0, %v2635_v3  ;;  %vm2502_vm11 = vcmp.eq.f32.partialorder %v2501_v4, 8.507059e+37 }
 0x65e   :  { %v2511_v23 = vadd.f32 1.0, %v3701_v42 }
 0x65f   :  { %v2608_v30 = vpop.f32.mrf.mxu0 }
 0x660   :  { %v3703_v25 = vpop.eup %3702  ;;  %3704 = vrcp.f32 %v2511_v23  ;;  %v2609_v2 = vadd.f32 %v4967_v43, %v2608_v30  ;;  %v2523_v53 = vand.u32 2147483648, %v2511_v23  ;;  %v2521_v59 = vand.u32 2147483647, %v2511_v23 }
 0x661   :  { %v2493_v35 = vmul.f32 %v3703_v25, %v2491_v31  ;;  %vm2498_vm8 = vweird.f32 %v3703_v25  ;;  %vm2517_vm13 = vweird.f32 %v2511_v23 }
 0x662   :  { %vm2620_vm7 = vcmp.ge.f32.partialorder %v2609_v2, 0.0  ;;  %v2628_v22 = vmul.f32 0.25, %v2609_v2  ;;  %vm2499_vm10 = vmor %vm2497_vm9, %vm2498_vm8  ;;  %v2524_v34 = vor.u32 1.1754944e-38, %v2523_v53  ;;  %vm2522_vm15 = vcmp.eq.f32.partialorder %v2521_v59, 8.507059e+37 }
 0x663   :  { %v2494_v51 = vsub.f32 1.0, %v2493_v35 }
 0x664   :  { %v2636_v32 = vsel %vm2620_vm7, %v2609_v2, %v2628_v22 }
 0x665   :  { %v2495_v29 = vmul.f32 %v3703_v25, %v2494_v51  ;;  %3470 = vmatmul.msk.f32.gmra.mxu1 %vm33_vm0, %v2636_v32 }
 0x666   :  { %v3705_v16 = vpop.eup %3704 }
 0x667   :  { %v2513_v9 = vmul.f32 %v3705_v16, %v2511_v23  ;;  %v2496_v63 = vadd.f32 %v3703_v25, %v2495_v29  ;;  %vm2518_vm12 = vweird.f32 %v3705_v16 }
 0x668   :  { %vm2519_vm14 = vmor %vm2517_vm13, %vm2518_vm12 }
 0x669   :  { %v2514_v1 = vsub.f32 1.0, %v2513_v9  ;;  %v2500_v39 = vsel %vm2499_vm10, %v3703_v25, %v2496_v63  ;;  %v2894_v9 = vld [vmem:[%s5297_s1 + $0x218] sm:$0xff]  ;;  %v2893_v63 = vld [vmem:[%s5297_s1 + $0x210] sm:$0xff] }
 0x66a   :  { %v2505_v57 = vsel %vm2502_vm11, %v2504_v33, %v2500_v39  ;;  %2933 = vmatpush.msra.mxu0 %v2894_v9  ;;  %v2892_v33 = vld [vmem:[%s5297_s1 + $0x208] sm:$0xff] }
 0x66b   :  { %v2515_v5 = vmul.f32 %v3705_v16, %v2514_v1  ;;  %v2527_v58 = vmul.f32 %v2505_v57, %v2485_v20  ;;  %v5064_v1 = vld [vmem:[%s5297_s1 + $0x26a] ss:$0 sm:$0xff] }
 0x66c   :  { %2934 = vmatpush.msra.mxu0 %v2893_v63 }
 0x66d   :  { %v2516_v7 = vadd.f32 %v3705_v16, %v2515_v5  ;;  %v2528_v55 = vadd.f32 %v2527_v58, %v2422_v28 }
 0x66e   :  { %2935 = vmatpush.msra.mxu0 %v2892_v33 }
 0x66f   :  { %v2520_v12 = vsel %vm2519_vm14, %v3705_v16, %v2516_v7  ;;  %3706 = vtanh.f32 %v2528_v55 }
 0x670   :  { %v2525_v13 = vsel %vm2522_vm15, %v2524_v34, %v2520_v12  ;;  %v19_v34 = vld [vmem:[%s5298_s0 + $0x40] sm:$0xff] }
 0x671   :  { %v2530_v10 = vsub.f32 1.0, %v2525_v13  ;;  %v2532_v50 = vmul.f32 %v2525_v13, %v4937_v54  ;;  %v2734_v54 = vld [vmem:[%s5297_s1 + $0x1c8] sm:$0xff] }
 0x672   :  { %2777 = vmatpush.msrb.mxu2 %v2734_v54  ;;  %v20_v54 = vld [vmem:[%s5298_s0 + $0x48] sm:$0xff] }
 0x674   :  { %2778 = vmatpush.msrb.mxu2 %v2733_v19 }
 0x675   :  { %v3707_v21 = vpop.eup %3706 }
 0x676   :  { %v2531_v11 = vmul.f32 %v3707_v21, %v2530_v10 }
 0x678   :  { %v2533_v40 = vadd.f32 %v2532_v50, %v2531_v11 }
 0x67a   :  { %2534 = vst.msk [vmem:[#allocation3 + $0x38] sm:$0xff] %vm33_vm0, %v2533_v40 }
 0x67b   :  { %3329 = vst.msk [vmem:[%s5299_s2 + $0xc8] sm:$0xff] %vm33_vm0, %v2533_v40 }
 0x681   :  { %v2542_v38 = vld [vmem:[#allocation3 + $0x38] sm:$0xff] }
 0x682   :  { %3463 = vmatmul.msk.f32.gmra.mxu0 %vm33_vm0, %v2542_v38 }
 0x6b2   :  { %v2685_v36 = vpop.f32.mrf.mxu1 }
 0x6b3   :  { %v2686_v27 = vadd.f32 %v5024_v18, %v2685_v36 }
 0x6b5   :  { %vm2709_vm1 = vcmp.ge.f32.partialorder %v2686_v27, 0.0  ;;  %v2717_v44 = vmul.f32 0.25, %v2686_v27 }
 0x6b7   :  { %v2725_v24 = vsel %vm2709_vm1, %v2686_v27, %v2717_v44 }
 0x6b8   :  { %3472 = vmatmul.msk.f32.vlgmr.msrb.gmra.mxu2 %vm33_vm0, %v2725_v24  ;;  %3480 = vmatmul.msk.f32.vlgmr.msrb.gmra.mxu3 %vm33_vm0, %v2725_v24 }
 0x6ba   :  { %v2688_v48 = vpop.f32.mrf.mxu1 }
 0x6bb   :  { %v2689_v47 = vadd.f32 %v5024_v18, %v2688_v48 }
 0x6bd   :  { %v2718_v6 = vmul.f32 0.25, %v2689_v47  ;;  %vm2710_vm2 = vcmp.ge.f32.partialorder %v2689_v47, 0.0 }
 0x6bf   :  { %v2726_v37 = vsel %vm2710_vm2, %v2689_v47, %v2718_v6  ;;  %v21_v6 = vld [vmem:[%s5298_s0 + $0x50] sm:$0xff] }
 0x6c0   :  { %3473 = vmatmul.msk.f32.gmra.mxu2 %vm33_vm0, %v2726_v37  ;;  %3481 = vmatmul.msk.f32.gmra.mxu3 %vm33_vm0, %v2726_v37 }
 0x6c2   :  { %v2691_v62 = vpop.f32.mrf.mxu1 }
 0x6c3   :  { %v2692_v60 = vadd.f32 %v5024_v18, %v2691_v62 }
 0x6c5   :  { %vm2711_vm3 = vcmp.ge.f32.partialorder %v2692_v60, 0.0  ;;  %v2719_v15 = vmul.f32 0.25, %v2692_v60 }
 0x6c7   :  { %v2727_v14 = vsel %vm2711_vm3, %v2692_v60, %v2719_v15 }
 0x6c8   :  { %3474 = vmatmul.msk.f32.gmra.mxu2 %vm33_vm0, %v2727_v14  ;;  %3482 = vmatmul.msk.f32.gmra.mxu3 %vm33_vm0, %v2727_v14 }
 0x6ca   :  { %v2694_v31 = vpop.f32.mrf.mxu1 }
 0x6cb   :  { %v2695_v17 = vadd.f32 %v5024_v18, %v2694_v31 }
 0x6cd   :  { %vm2712_vm4 = vcmp.ge.f32.partialorder %v2695_v17, 0.0  ;;  %v2720_v41 = vmul.f32 0.25, %v2695_v17 }
 0x6cf   :  { %v2728_v42 = vsel %vm2712_vm4, %v2695_v17, %v2720_v41 }
 0x6d0   :  { %3475 = vmatmul.msk.f32.gmra.mxu2 %vm33_vm0, %v2728_v42  ;;  %3483 = vmatmul.msk.f32.gmra.mxu3 %vm33_vm0, %v2728_v42 }
 0x6d2   :  { %v2697_v3 = vpop.f32.mrf.mxu1 }
 0x6d3   :  { %v2698_v23 = vadd.f32 %v5024_v18, %v2697_v3  ;;  %v22_v3 = vld [vmem:[%s5298_s0 + $0x58] sm:$0xff] }
 0x6d5   :  { %vm2713_vm5 = vcmp.ge.f32.partialorder %v2698_v23, 0.0  ;;  %v2721_v30 = vmul.f32 0.25, %v2698_v23 }
 0x6d7   :  { %v2729_v25 = vsel %vm2713_vm5, %v2698_v23, %v2721_v30 }
 0x6d8   :  { %3476 = vmatmul.msk.f32.gmra.mxu2 %vm33_vm0, %v2729_v25  ;;  %3484 = vmatmul.msk.f32.gmra.mxu3 %vm33_vm0, %v2729_v25 }
 0x6da   :  { %v2700_v35 = vpop.f32.mrf.mxu1 }
 0x6db   :  { %v2701_v2 = vadd.f32 %v5024_v18, %v2700_v35 }
 0x6dd   :  { %vm2714_vm6 = vcmp.ge.f32.partialorder %v2701_v2, 0.0  ;;  %v2722_v49 = vmul.f32 0.25, %v2701_v2 }
 0x6df   :  { %v2730_v8 = vsel %vm2714_vm6, %v2701_v2, %v2722_v49 }
 0x6e0   :  { %3477 = vmatmul.msk.f32.gmra.mxu2 %vm33_vm0, %v2730_v8  ;;  %3485 = vmatmul.msk.f32.gmra.mxu3 %vm33_vm0, %v2730_v8 }
 0x6e2   :  { %v2703_v51 = vpop.f32.mrf.mxu1 }
 0x6e3   :  { %v2704_v22 = vadd.f32 %v5024_v18, %v2703_v51 }
 0x6e5   :  { %vm2715_vm7 = vcmp.ge.f32.partialorder %v2704_v22, 0.0  ;;  %v2723_v45 = vmul.f32 0.25, %v2704_v22 }
 0x6e7   :  { %v2731_v29 = vsel %vm2715_vm7, %v2704_v22, %v2723_v45  ;;  %v23_v22 = vld [vmem:[%s5298_s0 + $0x60] sm:$0xff] }
 0x6e8   :  { %3478 = vmatmul.msk.f32.gmra.mxu2 %vm33_vm0, %v2731_v29  ;;  %3486 = vmatmul.msk.f32.gmra.mxu3 %vm33_vm0, %v2731_v29 }
 0x6ff   :  { %v2611_v4 = vpop.f32.mrf.mxu0 }
 0x700   :  { %v2612_v32 = vadd.f32 %v4967_v43, %v2611_v4  ;;  %v2891_v43 = vld [vmem:[%s5297_s1 + $0x200] sm:$0xff]  ;;  %v2989_v4 = vld [vmem:[%s5297_s1 + $0x238] sm:$0xff] }
 0x701   :  { %2936 = vmatpush.msra.mxu0 %v2891_v43  ;;  %3028 = vmatpush.msra.mxu1 %v2989_v4 }
 0x702   :  { %vm2621_vm8 = vcmp.ge.f32.partialorder %v2612_v32, 0.0  ;;  %v2629_v16 = vmul.f32 0.25, %v2612_v32 }
 0x704   :  { %v2637_v61 = vsel %vm2621_vm8, %v2612_v32, %v2629_v16 }
 0x705   :  { %3471 = vmatmul.msk.f32.gmra.mxu1 %vm33_vm0, %v2637_v61 }
 0x73b   :  { %v2780_v20 = vpop.f32.mrf.mxu2  ;;  %v2827_v39 = vpop.f32.mrf.mxu3 }
 0x73c   :  { %v2781_v28 = vadd.f32 %v5064_v1, %v2780_v20  ;;  %v2828_v57 = vadd.f32 %v5069_v26, %v2827_v39  ;;  %v24_v39 = vld [vmem:[%s5298_s0 + $0x68] sm:$0xff] }
 0x73e   :  { %3312 = vst.msk [vmem:[%s5299_s2 + $0x40] sm:$0xff] %vm33_vm0, %v2781_v28  ;;  %v2851_v5 = vmul.f32 0.5, %v2828_v57 }
 0x73f   :  { %3320 = vst.msk [vmem:[%s5299_s2 + $0x80] sm:$0xff] %vm33_vm0, %v2828_v57 }
 0x740   :  { %v2859_v53 = vmul.f32 1.442695, %v2851_v5 }
 0x742   :  { %3708 = vpow2.f32 %v2859_v53 }
 0x743   :  { %v2783_v58 = vpop.f32.mrf.mxu2  ;;  %v2830_v59 = vpop.f32.mrf.mxu3 }
 0x744   :  { %v2784_v7 = vadd.f32 %v5064_v1, %v2783_v58  ;;  %v2831_v55 = vadd.f32 %v5069_v26, %v2830_v59  ;;  %v25_v58 = vld [vmem:[%s5298_s0 + $0x70] sm:$0xff] }
 0x746   :  { %3313 = vst.msk [vmem:[%s5299_s2 + $0x48] sm:$0xff] %vm33_vm0, %v2784_v7  ;;  %v2852_v12 = vmul.f32 0.5, %v2831_v55 }
 0x747   :  { %3321 = vst.msk [vmem:[%s5299_s2 + $0x88] sm:$0xff] %vm33_vm0, %v2831_v55 }
 0x748   :  { %v3709_v13 = vpop.eup %3708  ;;  %v2861_v10 = vmul.f32 1.442695, %v2852_v12 }
 0x749   :  { %v2875_v21 = vmul.f32 %v3709_v13, %v19_v34 }
 0x74a   :  { %3710 = vpow2.f32 %v2861_v10 }
 0x74b   :  { %v2883_v11 = vadd.f32 %v2875_v21, %v2781_v28  ;;  %v2786_v50 = vpop.f32.mrf.mxu2  ;;  %v2833_v40 = vpop.f32.mrf.mxu3  ;;  %v2988_v21 = vld [vmem:[%s5297_s1 + $0x230] sm:$0xff] }
 0x74c   :  { %v2787_v38 = vadd.f32 %v5064_v1, %v2786_v50  ;;  %v2834_v56 = vadd.f32 %v5069_v26, %v2833_v40  ;;  %3029 = vmatpush.msra.mxu1 %v2988_v21  ;;  %v5187_v50 = vld [vmem:[%s5297_s1 + $0x26c] ss:$0 sm:$0xff] }
 0x74d   :  { %3488 = vmatmul.msk.f32.vlgmr.msra.gmra.mxu0 %vm33_vm0, %v2883_v11  ;;  %v2987_v11 = vld [vmem:[%s5297_s1 + $0x228] sm:$0xff] }
 0x74e   :  { %3314 = vst.msk [vmem:[%s5299_s2 + $0x50] sm:$0xff] %vm33_vm0, %v2787_v38  ;;  %v2853_v46 = vmul.f32 0.5, %v2834_v56  ;;  %3030 = vmatpush.msra.mxu1 %v2987_v11 }
 0x74f   :  { %3322 = vst.msk [vmem:[%s5299_s2 + $0x90] sm:$0xff] %vm33_vm0, %v2834_v56 }
 0x750   :  { %v3711_v0 = vpop.eup %3710  ;;  %v2863_v19 = vmul.f32 1.442695, %v2853_v46 }
 0x751   :  { %v2876_v52 = vmul.f32 %v3711_v0, %v20_v54 }
 0x752   :  { %3712 = vpow2.f32 %v2863_v19 }
 0x753   :  { %v2789_v36 = vpop.f32.mrf.mxu2  ;;  %v2836_v27 = vpop.f32.mrf.mxu3  ;;  %v2884_v44 = vadd.f32 %v2876_v52, %v2784_v7 }
 0x754   :  { %v2790_v24 = vadd.f32 %v5064_v1, %v2789_v36  ;;  %v2837_v48 = vadd.f32 %v5069_v26, %v2836_v27 }
 0x755   :  { %3489 = vmatmul.msk.f32.gmra.mxu0 %vm33_vm0, %v2884_v44 }
 0x756   :  { %3315 = vst.msk [vmem:[%s5299_s2 + $0x58] sm:$0xff] %vm33_vm0, %v2790_v24  ;;  %v2854_v47 = vmul.f32 0.5, %v2837_v48 }
 0x757   :  { %3323 = vst.msk [vmem:[%s5299_s2 + $0x98] sm:$0xff] %vm33_vm0, %v2837_v48 }
 0x758   :  { %v3713_v37 = vpop.eup %3712  ;;  %v2865_v62 = vmul.f32 1.442695, %v2854_v47 }
 0x759   :  { %v2877_v60 = vmul.f32 %v3713_v37, %v21_v6 }
 0x75a   :  { %3714 = vpow2.f32 %v2865_v62 }
 0x75b   :  { %v2792_v15 = vpop.f32.mrf.mxu2  ;;  %v2839_v14 = vpop.f32.mrf.mxu3  ;;  %v2885_v31 = vadd.f32 %v2877_v60, %v2787_v38 }
 0x75c   :  { %v2793_v17 = vadd.f32 %v5064_v1, %v2792_v15  ;;  %v2840_v41 = vadd.f32 %v5069_v26, %v2839_v14 }
 0x75d   :  { %3490 = vmatmul.msk.f32.gmra.mxu0 %vm33_vm0, %v2885_v31 }
 0x75e   :  { %3316 = vst.msk [vmem:[%s5299_s2 + $0x60] sm:$0xff] %vm33_vm0, %v2793_v17  ;;  %v2855_v42 = vmul.f32 0.5, %v2840_v41 }
 0x75f   :  { %3324 = vst.msk [vmem:[%s5299_s2 + $0xa0] sm:$0xff] %vm33_vm0, %v2840_v41 }
 0x760   :  { %v3715_v23 = vpop.eup %3714  ;;  %v2867_v30 = vmul.f32 1.442695, %v2855_v42 }
 0x761   :  { %v2878_v25 = vmul.f32 %v3715_v23, %v22_v3 }
 0x762   :  { %3716 = vpow2.f32 %v2867_v30  ;;  %v3084_v30 = vld [vmem:[%s5297_s1 + $0x258] sm:$0xff] }
 0x763   :  { %v2886_v35 = vadd.f32 %v2878_v25, %v2790_v24  ;;  %v2795_v2 = vpop.f32.mrf.mxu2  ;;  %v2842_v49 = vpop.f32.mrf.mxu3  ;;  %3123 = vmatpush.msra.mxu2 %v3084_v30 }
 0x764   :  { %v2796_v8 = vadd.f32 %v5064_v1, %v2795_v2  ;;  %v2843_v51 = vadd.f32 %v5069_v26, %v2842_v49 }
 0x765   :  { %3491 = vmatmul.msk.f32.gmra.mxu0 %vm33_vm0, %v2886_v35 }
 0x766   :  { %3317 = vst.msk [vmem:[%s5299_s2 + $0x68] sm:$0xff] %vm33_vm0, %v2796_v8  ;;  %v2856_v45 = vmul.f32 0.5, %v2843_v51 }
 0x767   :  { %3325 = vst.msk [vmem:[%s5299_s2 + $0xa8] sm:$0xff] %vm33_vm0, %v2843_v51 }
 0x768   :  { %v3717_v29 = vpop.eup %3716  ;;  %v2869_v32 = vmul.f32 1.442695, %v2856_v45 }
 0x769   :  { %v2879_v16 = vmul.f32 %v3717_v29, %v23_v22  ;;  %v26_v29 = vld [vmem:[%s5298_s0 + $0x78] sm:$0xff] }
 0x76a   :  { %3718 = vpow2.f32 %v2869_v32  ;;  %v3083_v32 = vld [vmem:[%s5297_s1 + $0x250] sm:$0xff] }
 0x76b   :  { %v2887_v61 = vadd.f32 %v2879_v16, %v2793_v17  ;;  %v2798_v9 = vpop.f32.mrf.mxu2  ;;  %v2845_v63 = vpop.f32.mrf.mxu3  ;;  %3124 = vmatpush.msra.mxu2 %v3083_v32  ;;  %v3082_v16 = vld [vmem:[%s5297_s1 + $0x248] sm:$0xff] }
 0x76c   :  { %v2799_v33 = vadd.f32 %v5064_v1, %v2798_v9  ;;  %v2846_v43 = vadd.f32 %v5069_v26, %v2845_v63  ;;  %v5232_v9 = vld [vmem:[%s5297_s1 + $0x26d] ss:$0 sm:$0xff] }
 0x76d   :  { %3492 = vmatmul.msk.f32.gmra.mxu0 %vm33_vm0, %v2887_v61  ;;  %3125 = vmatpush.msra.mxu2 %v3082_v16  ;;  %v3081_v61 = vld [vmem:[%s5297_s1 + $0x240] sm:$0xff] }
 0x76e   :  { %3318 = vst.msk [vmem:[%s5299_s2 + $0x70] sm:$0xff] %vm33_vm0, %v2799_v33  ;;  %v2857_v20 = vmul.f32 0.5, %v2846_v43 }
 0x76f   :  { %3326 = vst.msk [vmem:[%s5299_s2 + $0xb0] sm:$0xff] %vm33_vm0, %v2846_v43  ;;  %3126 = vmatpush.msra.mxu2 %v3081_v61 }
 0x770   :  { %v3719_v28 = vpop.eup %3718  ;;  %v2871_v57 = vmul.f32 1.442695, %v2857_v20 }
 0x771   :  { %v2880_v5 = vmul.f32 %v3719_v28, %v24_v39 }
 0x772   :  { %3720 = vpow2.f32 %v2871_v57 }
 0x773   :  { %v2888_v53 = vadd.f32 %v2880_v5, %v2796_v8 }
 0x775   :  { %3493 = vmatmul.msk.f32.gmra.mxu0 %vm33_vm0, %v2888_v53 }
 0x778   :  { %v3721_v59 = vpop.eup %3720 }
 0x779   :  { %v2881_v7 = vmul.f32 %v3721_v59, %v25_v58 }
 0x77b   :  { %v2889_v55 = vadd.f32 %v2881_v7, %v2799_v33 }
 0x77d   :  { %3494 = vmatmul.msk.f32.gmra.mxu0 %vm33_vm0, %v2889_v55 }
 0x782   :  { %v2706_v34 = vpop.f32.mrf.mxu1 }
 0x783   :  { %v2707_v12 = vadd.f32 %v5024_v18, %v2706_v34  ;;  %v2986_v18 = vld [vmem:[%s5297_s1 + $0x220] sm:$0xff] }
 0x784   :  { %3031 = vmatpush.msra.mxu1 %v2986_v18 }
 0x785   :  { %vm2716_vm9 = vcmp.ge.f32.partialorder %v2707_v12, 0.0  ;;  %v2724_v13 = vmul.f32 0.25, %v2707_v12 }
 0x787   :  { %v2732_v10 = vsel %vm2716_vm9, %v2707_v12, %v2724_v13 }
 0x788   :  { %3479 = vmatmul.msk.f32.gmra.mxu2 %vm33_vm0, %v2732_v10  ;;  %3487 = vmatmul.msk.f32.gmra.mxu3 %vm33_vm0, %v2732_v10 }
 0x7ca   :  { %v2938_v40 = vpop.f32.mrf.mxu0 }
 0x7cb   :  { %v2939_v38 = vadd.f32 %v5187_v50, %v2938_v40 }
 0x7cd   :  { %vm2962_vm10 = vcmp.ge.f32.partialorder %v2939_v38, 0.0  ;;  %v2970_v56 = vmul.f32 0.25, %v2939_v38 }
 0x7cf   :  { %v2978_v46 = vsel %vm2962_vm10, %v2939_v38, %v2970_v56 }
 0x7d0   :  { %3496 = vmatmul.msk.f32.vlgmr.msra.gmra.mxu1 %vm33_vm0, %v2978_v46 }
 0x7d2   :  { %v2941_v54 = vpop.f32.mrf.mxu0 }
 0x7d3   :  { %v2942_v0 = vadd.f32 %v5187_v50, %v2941_v54 }
 0x7d5   :  { %vm2963_vm11 = vcmp.ge.f32.partialorder %v2942_v0, 0.0  ;;  %v2971_v19 = vmul.f32 0.25, %v2942_v0 }
 0x7d7   :  { %v2979_v52 = vsel %vm2963_vm11, %v2942_v0, %v2971_v19 }
 0x7d8   :  { %3497 = vmatmul.msk.f32.gmra.mxu1 %vm33_vm0, %v2979_v52 }
 0x7da   :  { %v2944_v36 = vpop.f32.mrf.mxu0 }
 0x7db   :  { %v2945_v27 = vadd.f32 %v5187_v50, %v2944_v36 }
 0x7dd   :  { %vm2964_vm12 = vcmp.ge.f32.partialorder %v2945_v27, 0.0  ;;  %v2972_v44 = vmul.f32 0.25, %v2945_v27 }
 0x7df   :  { %v2980_v24 = vsel %vm2964_vm12, %v2945_v27, %v2972_v44 }
 0x7e0   :  { %3498 = vmatmul.msk.f32.gmra.mxu1 %vm33_vm0, %v2980_v24 }
 0x7e2   :  { %v2947_v48 = vpop.f32.mrf.mxu0 }
 0x7e3   :  { %v2948_v47 = vadd.f32 %v5187_v50, %v2947_v48  ;;  %v5253_v48 = vld [vmem:[%s5297_s1 + $0x26e] ss:$0 sm:$0xff] }
 0x7e5   :  { %vm2965_vm13 = vcmp.ge.f32.partialorder %v2948_v47, 0.0  ;;  %v2973_v6 = vmul.f32 0.25, %v2948_v47 }
 0x7e7   :  { %v2981_v37 = vsel %vm2965_vm13, %v2948_v47, %v2973_v6 }
 0x7e8   :  { %3499 = vmatmul.msk.f32.gmra.mxu1 %vm33_vm0, %v2981_v37 }
 0x7ea   :  { %v2950_v62 = vpop.f32.mrf.mxu0 }
 0x7eb   :  { %v2951_v60 = vadd.f32 %v5187_v50, %v2950_v62 }
 0x7ed   :  { %vm2966_vm14 = vcmp.ge.f32.partialorder %v2951_v60, 0.0  ;;  %v2974_v15 = vmul.f32 0.25, %v2951_v60 }
 0x7ef   :  { %v2982_v14 = vsel %vm2966_vm14, %v2951_v60, %v2974_v15 }
 0x7f0   :  { %3500 = vmatmul.msk.f32.gmra.mxu1 %vm33_vm0, %v2982_v14 }
 0x7f2   :  { %v2953_v31 = vpop.f32.mrf.mxu0 }
 0x7f3   :  { %v2954_v17 = vadd.f32 %v5187_v50, %v2953_v31 }
 0x7f5   :  { %vm2967_vm15 = vcmp.ge.f32.partialorder %v2954_v17, 0.0  ;;  %v2975_v41 = vmul.f32 0.25, %v2954_v17 }
 0x7f7   :  { %v2983_v42 = vsel %vm2967_vm15, %v2954_v17, %v2975_v41 }
 0x7f8   :  { %3501 = vmatmul.msk.f32.gmra.mxu1 %vm33_vm0, %v2983_v42 }
 0x7fa   :  { %v2956_v3 = vpop.f32.mrf.mxu0 }
 0x7fb   :  { %v2957_v23 = vadd.f32 %v5187_v50, %v2956_v3 }
 0x7fd   :  { %vm2968_vm1 = vcmp.ge.f32.partialorder %v2957_v23, 0.0  ;;  %v2976_v25 = vmul.f32 0.25, %v2957_v23 }
 0x7ff   :  { %v2984_v35 = vsel %vm2968_vm1, %v2957_v23, %v2976_v25 }
 0x800   :  { %3502 = vmatmul.msk.f32.gmra.mxu1 %vm33_vm0, %v2984_v35 }
 0x80b   :  { %v2801_v2 = vpop.f32.mrf.mxu2  ;;  %v2848_v49 = vpop.f32.mrf.mxu3 }
 0x80c   :  { %v2802_v8 = vadd.f32 %v5064_v1, %v2801_v2  ;;  %v2849_v51 = vadd.f32 %v5069_v26, %v2848_v49 }
 0x80e   :  { %3319 = vst.msk [vmem:[%s5299_s2 + $0x78] sm:$0xff] %vm33_vm0, %v2802_v8  ;;  %v2858_v22 = vmul.f32 0.5, %v2849_v51 }
 0x80f   :  { %3327 = vst.msk [vmem:[%s5299_s2 + $0xb8] sm:$0xff] %vm33_vm0, %v2849_v51 }
 0x810   :  { %v2873_v45 = vmul.f32 1.442695, %v2858_v22 }
 0x812   :  { %3722 = vpow2.f32 %v2873_v45 }
 0x818   :  { %v3723_v1 = vpop.eup %3722 }
 0x819   :  { %v2882_v4 = vmul.f32 %v3723_v1, %v26_v29 }
 0x81b   :  { %v2890_v26 = vadd.f32 %v2882_v4, %v2802_v8 }
 0x81d   :  { %3495 = vmatmul.msk.f32.gmra.mxu0 %vm33_vm0, %v2890_v26 }
 0x84d   :  { %v3033_v63 = vpop.f32.mrf.mxu1 }
 0x84e   :  { %v3034_v33 = vadd.f32 %v5232_v9, %v3033_v63 }
 0x850   :  { %vm3057_vm2 = vcmp.ge.f32.partialorder %v3034_v33, 0.0  ;;  %v3065_v43 = vmul.f32 0.25, %v3034_v33 }
 0x852   :  { %v3073_v20 = vsel %vm3057_vm2, %v3034_v33, %v3065_v43 }
 0x853   :  { %3504 = vmatmul.msk.f32.vlgmr.msra.gmra.mxu2 %vm33_vm0, %v3073_v20 }
 0x855   :  { %v3036_v39 = vpop.f32.mrf.mxu1 }
 0x856   :  { %v3037_v28 = vadd.f32 %v5232_v9, %v3036_v39 }
 0x858   :  { %vm3058_vm3 = vcmp.ge.f32.partialorder %v3037_v28, 0.0  ;;  %v3066_v57 = vmul.f32 0.25, %v3037_v28 }
 0x85a   :  { %v3074_v5 = vsel %vm3058_vm3, %v3037_v28, %v3066_v57 }
 0x85b   :  { %3505 = vmatmul.msk.f32.gmra.mxu2 %vm33_vm0, %v3074_v5 }
 0x85d   :  { %v3039_v53 = vpop.f32.mrf.mxu1 }
 0x85e   :  { %v3040_v58 = vadd.f32 %v5232_v9, %v3039_v53 }
 0x860   :  { %vm3059_vm4 = vcmp.ge.f32.partialorder %v3040_v58, 0.0  ;;  %v3067_v59 = vmul.f32 0.25, %v3040_v58 }
 0x862   :  { %v3075_v7 = vsel %vm3059_vm4, %v3040_v58, %v3067_v59 }
 0x863   :  { %3506 = vmatmul.msk.f32.gmra.mxu2 %vm33_vm0, %v3075_v7 }
 0x865   :  { %v3042_v55 = vpop.f32.mrf.mxu1 }
 0x866   :  { %v3043_v34 = vadd.f32 %v5232_v9, %v3042_v55 }
 0x868   :  { %vm3060_vm5 = vcmp.ge.f32.partialorder %v3043_v34, 0.0  ;;  %v3068_v12 = vmul.f32 0.25, %v3043_v34 }
 0x86a   :  { %v3076_v13 = vsel %vm3060_vm5, %v3043_v34, %v3068_v12 }
 0x86b   :  { %3507 = vmatmul.msk.f32.gmra.mxu2 %vm33_vm0, %v3076_v13 }
 0x86d   :  { %v3045_v10 = vpop.f32.mrf.mxu1 }
 0x86e   :  { %v3046_v21 = vadd.f32 %v5232_v9, %v3045_v10 }
 0x870   :  { %vm3061_vm6 = vcmp.ge.f32.partialorder %v3046_v21, 0.0  ;;  %v3069_v11 = vmul.f32 0.25, %v3046_v21 }
 0x872   :  { %v3077_v18 = vsel %vm3061_vm6, %v3046_v21, %v3069_v11 }
 0x873   :  { %3508 = vmatmul.msk.f32.gmra.mxu2 %vm33_vm0, %v3077_v18 }
 0x875   :  { %v3048_v40 = vpop.f32.mrf.mxu1 }
 0x876   :  { %v3049_v38 = vadd.f32 %v5232_v9, %v3048_v40 }
 0x878   :  { %vm3062_vm7 = vcmp.ge.f32.partialorder %v3049_v38, 0.0  ;;  %v3070_v56 = vmul.f32 0.25, %v3049_v38 }
 0x87a   :  { %v3078_v46 = vsel %vm3062_vm7, %v3049_v38, %v3070_v56 }
 0x87b   :  { %3509 = vmatmul.msk.f32.gmra.mxu2 %vm33_vm0, %v3078_v46 }
 0x87d   :  { %v3051_v54 = vpop.f32.mrf.mxu1 }
 0x87e   :  { %v3052_v0 = vadd.f32 %v5232_v9, %v3051_v54 }
 0x880   :  { %vm3063_vm8 = vcmp.ge.f32.partialorder %v3052_v0, 0.0  ;;  %v3071_v19 = vmul.f32 0.25, %v3052_v0 }
 0x882   :  { %v3079_v52 = vsel %vm3063_vm8, %v3052_v0, %v3071_v19 }
 0x883   :  { %3510 = vmatmul.msk.f32.gmra.mxu2 %vm33_vm0, %v3079_v52 }
 0x89a   :  { %v2959_v36 = vpop.f32.mrf.mxu0 }
 0x89b   :  { %v2960_v27 = vadd.f32 %v5187_v50, %v2959_v36 }
 0x89d   :  { %vm2969_vm9 = vcmp.ge.f32.partialorder %v2960_v27, 0.0  ;;  %v2977_v44 = vmul.f32 0.25, %v2960_v27 }
 0x89f   :  { %v2985_v24 = vsel %vm2969_vm9, %v2960_v27, %v2977_v44 }
 0x8a0   :  { %3503 = vmatmul.msk.f32.gmra.mxu1 %vm33_vm0, %v2985_v24 }
 0x8d6   :  { %v3128_v47 = vpop.f32.mrf.mxu2 }
 0x8d7   :  { %v3129_v6 = vadd.f32 %v5253_v48, %v3128_v47 }
 0x8d9   :  { %v3512_v37 = vmul.f32 -1.442695, %v3129_v6 }
 0x8db   :  { %3724 = vpow2.f32 %v3512_v37 }
 0x8de   :  { %v3131_v62 = vpop.f32.mrf.mxu2 }
 0x8df   :  { %v3132_v60 = vadd.f32 %v5253_v48, %v3131_v62 }
 0x8e1   :  { %v3725_v15 = vpop.eup %3724  ;;  %v3513_v50 = vmul.f32 -1.442695, %v3132_v60 }
 0x8e2   :  { %v3176_v14 = vadd.f32 1.0, %v3725_v15 }
 0x8e3   :  { %3726 = vpow2.f32 %v3513_v50 }
 0x8e4   :  { %3728 = vrcp.f32 %v3176_v14  ;;  %v3195_v35 = vand.u32 2147483648, %v3176_v14  ;;  %v3193_v8 = vand.u32 2147483647, %v3176_v14  ;;  %vm3189_vm11 = vweird.f32 %v3176_v14 }
 0x8e6   :  { %v3134_v31 = vpop.f32.mrf.mxu2  ;;  %v3196_v4 = vor.u32 1.1754944e-38, %v3195_v35  ;;  %vm3194_vm13 = vcmp.eq.f32.partialorder %v3193_v8, 8.507059e+37 }
 0x8e7   :  { %v3135_v17 = vadd.f32 %v5253_v48, %v3134_v31 }
 0x8e9   :  { %v3727_v41 = vpop.eup %3726  ;;  %v3514_v42 = vmul.f32 -1.442695, %v3135_v17 }
 0x8ea   :  { %v3729_v3 = vpop.eup %3728  ;;  %v3177_v23 = vadd.f32 1.0, %v3727_v41 }
 0x8eb   :  { %v3185_v30 = vmul.f32 %v3729_v3, %v3176_v14  ;;  %3730 = vpow2.f32 %v3514_v42  ;;  %vm3190_vm10 = vweird.f32 %v3729_v3 }
 0x8ec   :  { %3732 = vrcp.f32 %v3177_v23  ;;  %vm3191_vm12 = vmor %vm3189_vm11, %vm3190_vm10  ;;  %v3210_v33 = vand.u32 2147483648, %v3177_v23  ;;  %v3208_v39 = vand.u32 2147483647, %v3177_v23  ;;  %vm3204_vm15 = vweird.f32 %v3177_v23 }
 0x8ed   :  { %v3186_v25 = vsub.f32 1.0, %v3185_v30 }
 0x8ee   :  { %v3137_v2 = vpop.f32.mrf.mxu2  ;;  %v3211_v59 = vor.u32 1.1754944e-38, %v3210_v33  ;;  %vm3209_vm2 = vcmp.eq.f32.partialorder %v3208_v39, 8.507059e+37 }
 0x8ef   :  { %v3187_v49 = vmul.f32 %v3729_v3, %v3186_v25  ;;  %v3138_v51 = vadd.f32 %v5253_v48, %v3137_v2 }
 0x8f1   :  { %v3731_v22 = vpop.eup %3730  ;;  %v3188_v45 = vadd.f32 %v3729_v3, %v3187_v49  ;;  %v3515_v29 = vmul.f32 -1.442695, %v3138_v51 }
 0x8f2   :  { %v3733_v1 = vpop.eup %3732  ;;  %v3178_v26 = vadd.f32 1.0, %v3731_v22 }
 0x8f3   :  { %v3192_v32 = vsel %vm3191_vm12, %v3729_v3, %v3188_v45  ;;  %v3200_v16 = vmul.f32 %v3733_v1, %v3177_v23  ;;  %3734 = vpow2.f32 %v3515_v29  ;;  %vm3205_vm14 = vweird.f32 %v3733_v1 }
 0x8f4   :  { %v3197_v61 = vsel %vm3194_vm13, %v3196_v4, %v3192_v32  ;;  %3736 = vrcp.f32 %v3178_v26  ;;  %vm3206_vm1 = vmor %vm3204_vm15, %vm3205_vm14  ;;  %v3225_v10 = vand.u32 2147483648, %v3178_v26  ;;  %v3223_v11 = vand.u32 2147483647, %v3178_v26 }
 0x8f5   :  { %3304 = vst.msk [vmem:[%s5299_s2] sm:$0xff] %vm33_vm0, %v3197_v61  ;;  %v3201_v63 = vsub.f32 1.0, %v3200_v16  ;;  %vm3219_vm4 = vweird.f32 %v3178_v26 }
 0x8f6   :  { %v3140_v43 = vpop.f32.mrf.mxu2  ;;  %v3226_v54 = vor.u32 1.1754944e-38, %v3225_v10  ;;  %vm3224_vm6 = vcmp.eq.f32.partialorder %v3223_v11, 8.507059e+37 }
 0x8f7   :  { %v3202_v20 = vmul.f32 %v3733_v1, %v3201_v63  ;;  %v3141_v28 = vadd.f32 %v5253_v48, %v3140_v43 }
 0x8f9   :  { %v3735_v57 = vpop.eup %3734  ;;  %v3203_v5 = vadd.f32 %v3733_v1, %v3202_v20  ;;  %v3516_v53 = vmul.f32 -1.442695, %v3141_v28 }
 0x8fa   :  { %v3737_v58 = vpop.eup %3736  ;;  %v3179_v7 = vadd.f32 1.0, %v3735_v57 }
 0x8fb   :  { %v3207_v55 = vsel %vm3206_vm1, %v3733_v1, %v3203_v5  ;;  %v3215_v34 = vmul.f32 %v3737_v58, %v3178_v26  ;;  %3738 = vpow2.f32 %v3516_v53  ;;  %vm3220_vm3 = vweird.f32 %v3737_v58 }
 0x8fc   :  { %v3212_v12 = vsel %vm3209_vm2, %v3211_v59, %v3207_v55  ;;  %3740 = vrcp.f32 %v3179_v7  ;;  %vm3221_vm5 = vmor %vm3219_vm4, %vm3220_vm3  ;;  %v3240_v24 = vand.u32 2147483648, %v3179_v7  ;;  %v3238_v6 = vand.u32 2147483647, %v3179_v7 }
 0x8fd   :  { %3305 = vst.msk [vmem:[%s5299_s2 + $0x8] sm:$0xff] %vm33_vm0, %v3212_v12  ;;  %v3216_v13 = vsub.f32 1.0, %v3215_v34  ;;  %vm3234_vm8 = vweird.f32 %v3179_v7 }
 0x8fe   :  { %v3143_v18 = vpop.f32.mrf.mxu2  ;;  %v3241_v50 = vor.u32 1.1754944e-38, %v3240_v24  ;;  %vm3239_vm10 = vcmp.eq.f32.partialorder %v3238_v6, 8.507059e+37 }
 0x8ff   :  { %v3217_v21 = vmul.f32 %v3737_v58, %v3216_v13  ;;  %v3144_v40 = vadd.f32 %v5253_v48, %v3143_v18 }
 0x901   :  { %v3739_v38 = vpop.eup %3738  ;;  %v3218_v56 = vadd.f32 %v3737_v58, %v3217_v21  ;;  %v3517_v19 = vmul.f32 -1.442695, %v3144_v40 }
 0x902   :  { %v3741_v46 = vpop.eup %3740  ;;  %v3180_v0 = vadd.f32 1.0, %v3739_v38 }
 0x903   :  { %v3222_v52 = vsel %vm3221_vm5, %v3737_v58, %v3218_v56  ;;  %v3230_v36 = vmul.f32 %v3741_v46, %v3179_v7  ;;  %vm3235_vm7 = vweird.f32 %v3741_v46 }
 0x904   :  { %v3227_v27 = vsel %vm3224_vm6, %v3226_v54, %v3222_v52  ;;  %3742 = vrcp.f32 %v3180_v0  ;;  %vm3236_vm9 = vmor %vm3234_vm8, %vm3235_vm7  ;;  %v3255_v30 = vand.u32 2147483648, %v3180_v0  ;;  %v3253_v35 = vand.u32 2147483647, %v3180_v0 }
 0x905   :  { %3306 = vst.msk [vmem:[%s5299_s2 + $0x10] sm:$0xff] %vm33_vm0, %v3227_v27  ;;  %v3231_v44 = vsub.f32 1.0, %v3230_v36  ;;  %3744 = vpow2.f32 %v3517_v19  ;;  %vm3249_vm12 = vweird.f32 %v3180_v0 }
 0x906   :  { %v3146_v37 = vpop.f32.mrf.mxu2  ;;  %v3256_v8 = vor.u32 1.1754944e-38, %v3255_v30  ;;  %vm3254_vm14 = vcmp.eq.f32.partialorder %v3253_v35, 8.507059e+37 }
 0x907   :  { %v3232_v47 = vmul.f32 %v3741_v46, %v3231_v44  ;;  %v3147_v62 = vadd.f32 %v5253_v48, %v3146_v37 }
 0x909   :  { %v3233_v60 = vadd.f32 %v3741_v46, %v3232_v47  ;;  %v3518_v14 = vmul.f32 -1.442695, %v3147_v62 }
 0x90a   :  { %v3743_v15 = vpop.eup %3742 }
 0x90b   :  { %v3745_v31 = vpop.eup %3744  ;;  %v3237_v17 = vsel %vm3236_vm9, %v3741_v46, %v3233_v60  ;;  %v3245_v41 = vmul.f32 %v3743_v15, %v3180_v0  ;;  %3746 = vpow2.f32 %v3518_v14  ;;  %vm3250_vm11 = vweird.f32 %v3743_v15 }
 0x90c   :  { %v3242_v42 = vsel %vm3239_vm10, %v3241_v50, %v3237_v17  ;;  %v3181_v3 = vadd.f32 1.0, %v3745_v31  ;;  %vm3251_vm13 = vmor %vm3249_vm12, %vm3250_vm11 }
 0x90d   :  { %3307 = vst.msk [vmem:[%s5299_s2 + $0x18] sm:$0xff] %vm33_vm0, %v3242_v42  ;;  %v3246_v23 = vsub.f32 1.0, %v3245_v41 }
 0x90e   :  { %3748 = vrcp.f32 %v3181_v3  ;;  %v3270_v26 = vand.u32 2147483648, %v3181_v3  ;;  %v3268_v16 = vand.u32 2147483647, %v3181_v3  ;;  %vm3264_vm1 = vweird.f32 %v3181_v3 }
 0x90f   :  { %v3247_v25 = vmul.f32 %v3743_v15, %v3246_v23 }
 0x910   :  { %v3271_v33 = vor.u32 1.1754944e-38, %v3270_v26  ;;  %vm3269_vm3 = vcmp.eq.f32.partialorder %v3268_v16, 8.507059e+37 }
 0x911   :  { %v3248_v2 = vadd.f32 %v3743_v15, %v3247_v25  ;;  %v3747_v49 = vpop.eup %3746 }
 0x912   :  { %v3182_v22 = vadd.f32 1.0, %v3747_v49 }
 0x913   :  { %v3252_v51 = vsel %vm3251_vm13, %v3743_v15, %v3248_v2 }
 0x914   :  { %v3749_v45 = vpop.eup %3748  ;;  %v3257_v29 = vsel %vm3254_vm14, %v3256_v8, %v3252_v51  ;;  %3750 = vrcp.f32 %v3182_v22  ;;  %v3283_v53 = vand.u32 2147483647, %v3182_v22  ;;  %v3285_v58 = vand.u32 2147483648, %v3182_v22 }
 0x915   :  { %3308 = vst.msk [vmem:[%s5299_s2 + $0x20] sm:$0xff] %vm33_vm0, %v3257_v29  ;;  %v3260_v1 = vmul.f32 %v3749_v45, %v3181_v3  ;;  %vm3265_vm15 = vweird.f32 %v3749_v45  ;;  %vm3279_vm6 = vweird.f32 %v3182_v22 }
 0x916   :  { %vm3266_vm2 = vmor %vm3264_vm1, %vm3265_vm15  ;;  %v3286_v12 = vor.u32 1.1754944e-38, %v3285_v58  ;;  %vm3284_vm8 = vcmp.eq.f32.partialorder %v3283_v53, 8.507059e+37 }
 0x917   :  { %v3261_v4 = vsub.f32 1.0, %v3260_v1 }
 0x919   :  { %v3262_v32 = vmul.f32 %v3749_v45, %v3261_v4 }
 0x91a   :  { %v3751_v61 = vpop.eup %3750 }
 0x91b   :  { %v3263_v63 = vadd.f32 %v3749_v45, %v3262_v32  ;;  %v3275_v43 = vmul.f32 %v3751_v61, %v3182_v22  ;;  %vm3280_vm4 = vweird.f32 %v3751_v61 }
 0x91c   :  { %vm3281_vm7 = vmor %vm3279_vm6, %vm3280_vm4 }
 0x91d   :  { %v3267_v20 = vsel %vm3266_vm2, %v3749_v45, %v3263_v63  ;;  %v3054_v39 = vpop.f32.mrf.mxu1  ;;  %v3276_v57 = vsub.f32 1.0, %v3275_v43 }
 0x91e   :  { %v3272_v28 = vsel %vm3269_vm3, %v3271_v33, %v3267_v20  ;;  %v3055_v5 = vadd.f32 %v5232_v9, %v3054_v39 }
 0x91f   :  { %3309 = vst.msk [vmem:[%s5299_s2 + $0x28] sm:$0xff] %vm33_vm0, %v3272_v28  ;;  %v3277_v59 = vmul.f32 %v3751_v61, %v3276_v57 }
 0x920   :  { %vm3064_vm5 = vcmp.ge.f32.partialorder %v3055_v5, 0.0  ;;  %v3072_v7 = vmul.f32 0.25, %v3055_v5 }
 0x921   :  { %v3278_v55 = vadd.f32 %v3751_v61, %v3277_v59 }
 0x922   :  { %v3080_v34 = vsel %vm3064_vm5, %v3055_v5, %v3072_v7 }
 0x923   :  { %3511 = vmatmul.msk.f32.gmra.mxu2 %vm33_vm0, %v3080_v34  ;;  %v3282_v13 = vsel %vm3281_vm7, %v3751_v61, %v3278_v55 }
 0x924   :  { %v3287_v9 = vsel %vm3284_vm8, %v3286_v12, %v3282_v13 }
 0x925   :  { %3310 = vst.msk [vmem:[%s5299_s2 + $0x30] sm:$0xff] %vm33_vm0, %v3287_v9 }
 0x9a6   :  { %v3149_v10 = vpop.f32.mrf.mxu2 }
 0x9a7   :  { %v3150_v21 = vadd.f32 %v5253_v48, %v3149_v10 }
 0x9a9   :  { %v3519_v11 = vmul.f32 -1.442695, %v3150_v21 }
 0x9ab   :  { %3752 = vpow2.f32 %v3519_v11 }
 0x9b1   :  { %v3753_v18 = vpop.eup %3752 }
 0x9b2   :  { %v3183_v40 = vadd.f32 1.0, %v3753_v18 }
 0x9b4   :  { %3754 = vrcp.f32 %v3183_v40  ;;  %v3300_v54 = vand.u32 2147483648, %v3183_v40  ;;  %v3298_v19 = vand.u32 2147483647, %v3183_v40  ;;  %vm3294_vm10 = vweird.f32 %v3183_v40 }
 0x9b6   :  { %v3301_v36 = vor.u32 1.1754944e-38, %v3300_v54  ;;  %vm3299_vm12 = vcmp.eq.f32.partialorder %v3298_v19, 8.507059e+37 }
 0x9ba   :  { %v3755_v38 = vpop.eup %3754 }
 0x9bb   :  { %v3290_v56 = vmul.f32 %v3755_v38, %v3183_v40  ;;  %vm3295_vm9 = vweird.f32 %v3755_v38 }
 0x9bc   :  { %vm3296_vm11 = vmor %vm3294_vm10, %vm3295_vm9 }
 0x9bd   :  { %v3291_v46 = vsub.f32 1.0, %v3290_v56 }
 0x9bf   :  { %v3292_v0 = vmul.f32 %v3755_v38, %v3291_v46 }
 0x9c1   :  { %v3293_v52 = vadd.f32 %v3755_v38, %v3292_v0 }
 0x9c3   :  { %v3297_v27 = vsel %vm3296_vm11, %v3755_v38, %v3293_v52 }
 0x9c4   :  { %v3302_v44 = vsel %vm3299_vm12, %v3301_v36, %v3297_v27 }
 0x9c5   :  { %3311 = vst.msk [vmem:[%s5299_s2 + $0x38] sm:$0xff] %vm33_vm0, %v3302_v44 }

</bundles_post_ra>
